<compile_context>
chip_gen: v6e
topology: v6e:2x2x1
jax: 0.10.0
libtpu: 0.0.40
codegen_flags: <defaults>
</compile_context>

<pallas_src>
import numpy as np
import jax
import jax.numpy as jnp
from jax import lax
from jax.experimental import pallas as pl
from jax.experimental.pallas import tpu as pltpu

# ----------------- configuration (mirrors Retina / SparseAutoencoder defaults) ----
DOG_SIZE = 7
DOG_SIGMA = 2.0
DOG_K = 1.6

SAE_FILTERS = 32
SAE_KERNEL = 4
SAE_STRIDE = 2
SAE_PADDING = 1
SAE_SPARSITY = 25

_BISECT_ITERS = 34          # >= 32 -> exact k-th-largest over the full finite-f32 key range
_KEY_LO = -2139095040       # < key(-FLT_MAX)
_KEY_HI = 2139095040        # > key(+FLT_MAX)


# ----------------------------- host-side construction -----------------------------
def make_dog_filter(size, sigma, k):
  ax = np.arange(size, dtype=np.float64) - (size - 1) / 2.0
  xx, yy = np.meshgrid(ax, ax)
  g1 = np.exp(-(xx ** 2 + yy ** 2) / (2.0 * sigma ** 2))
  g1 /= g1.sum()
  s2 = sigma * k
  g2 = np.exp(-(xx ** 2 + yy ** 2) / (2.0 * s2 ** 2))
  g2 /= g2.sum()
  return (g1 - g2).astype(np.float32)


def make_dog_operator_phase_major(dog, h, w):
  """Depthwise zero-padded 'same' DoG conv as a dense (HW, HW) linear operator.

  acc[c, col(oh,ow)] = sum_in x[c, in] * M[in, col], with PHASE-MAJOR output columns
  col(oh,ow) = (2*(oh%2)+(ow%2))*(ho*wo) + (oh//2)*wo + (ow//2): the four stride-2
  pixel parities land in four contiguous ho*wo lane blocks (what the cortex taps need).
  """
  ksz = dog.shape[0]
  pad = ksz // 2
  ho, wo = h // 2, w // 2
  mat = np.zeros((h * w, h * w), np.float32)
  for oh in range(h):
    for ow in range(w):
      col = (2 * (oh % 2) + (ow % 2)) * (ho * wo) + (oh // 2) * wo + (ow // 2)
      for ky in range(ksz):
        ih = oh + ky - pad
        if ih < 0 or ih >= h:
          continue
        for kx in range(ksz):
          iw = ow + kx - pad
          if iw < 0 or iw >= w:
            continue
          mat[ih * w + iw, col] = dog[ky, kx]
  return mat


def _enc_taps(ho, wo):
  """Conv2d(k=4, s=2, p=1) taps in phase-major lane space.

  Output (u,v) reads input (2u-1+ky, 2v-1+kx) = phase (py,px), index (u+di, v+dj) with
  py=(ky-1)%2, di=(ky-1)//2 (same in x) -> constant lane offset
  off = (2*py+px)*ho*wo + di*wo + dj.  Tap order t = ky*K+kx matches the weight packing.
  """
  taps = []
  for ky in range(SAE_KERNEL):
    py, di = (ky - 1) % 2, (ky - 1) // 2
    for kx in range(SAE_KERNEL):
      px, dj = (kx - 1) % 2, (kx - 1) // 2
      taps.append((di, dj, (2 * py + px) * ho * wo + di * wo + dj))
  return taps


def _dec_taps(ho, wo):
  """ConvTranspose2d(k=4, s=2, p=1): each output phase reads the 3x3 encoding neighbourhood."""
  return [(dy, dx, dy * wo + dx) for dy in (-1, 0, 1) for dx in (-1, 0, 1)]


def _tap_masks(taps, b, h, w):
  """0/1 column-validity masks in the padded (B*H*W) lane space (live block = first ho*wo)."""
  ho, wo = h // 2, w // 2
  hw = h * w
  r = np.arange(b * hw) % hw
  i, j = r // wo, r % wo
  masks = []
  for di, dj, _ in taps:
    ok = (r < ho * wo) & (i + di >= 0) & (i + di < ho) & (j + dj >= 0) & (j + dj < wo)
    masks.append(ok)
  return np.stack(masks, 0).astype(np.float32)


def init_params(key, in_channels):
  c2 = 2 * in_channels
  k_enc, k_dec = jax.random.split(key, 2)
  kd_enc = SAE_KERNEL * SAE_KERNEL * c2            # encoder contraction dim (ky,kx,c2)
  kd_dec = SAE_KERNEL * SAE_KERNEL * SAE_FILTERS   # decoder contraction dim (ky,kx,f)
  return {
      "w_enc": jax.random.normal(k_enc, (kd_enc, SAE_FILTERS), jnp.float32) * 0.05,
      "b_enc": jnp.zeros((SAE_FILTERS,), jnp.float32),
      "w_dec": jax.random.normal(k_dec, (kd_dec, c2), jnp.float32) * 0.05,
      "b_dec": jnp.zeros((c2,), jnp.float32),
  }


# PyTorch ConvTranspose2d(k=4, s=2, p=1): output row 2u+py reads encoding row u+dy through
# kernel row ky with ky = py + 1 - 2*dy  (py=0 -> ky in {1,3}; py=1 -> ky in {0,2}).
_CT_KTAP = {(0, 0): 1, (0, -1): 3, (1, 1): 0, (1, 0): 2}


def pack_constants(params, b, c, h, w):
  """One-time repacking of every weight/operator/mask into kernel layout (hoisted per review)."""
  assert SAE_KERNEL == 4 and SAE_STRIDE == 2 and SAE_PADDING == 1
  assert h % 2 == 0 and w % 2 == 0
  c2 = 2 * c
  f = SAE_FILTERS
  k = SAE_KERNEL
  ho, wo = h // SAE_STRIDE, w // SAE_STRIDE
  ch_pad = ((c2 + 7) // 8) * 8

  dog = make_dog_filter(DOG_SIZE, DOG_SIGMA, DOG_K)
  dog_op = make_dog_operator_phase_major(dog, h, w)

  # Encoder: (k*k*2C, F) -> (F, k*k*ch_pad); columns tap-major, channel minor, zero-padded
  # to 8 rows per tap so the in-kernel RHS concat is sublane-aligned.
  w_enc = np.asarray(params["w_enc"], np.float32).reshape(k * k, c2, f)
  w_enc_p = np.zeros((k * k, ch_pad, f), np.float32)
  w_enc_p[:, :c2, :] = w_enc
  w_enc_p = w_enc_p.transpose(2, 0, 1).reshape(f, k * k * ch_pad)

  # Decoder: (k*k*F, 2C) -> 4-output-phase x 3x3-tap matrix (4*2C, 9*F).
  w_dec = np.asarray(params["w_dec"], np.float32)
  w_dec_p = np.zeros((4 * c2, 9 * f), np.float32)
  for p in range(4):
    py, px = p // 2, p % 2
    for t2, (dy, dx, _) in enumerate(_dec_taps(ho, wo)):
      ky, kx = _CT_KTAP.get((py, dy)), _CT_KTAP.get((px, dx))
      if ky is None or kx is None:
        continue
      blk = w_dec[(ky * k + kx) * f:(ky * k + kx + 1) * f, :]     # (F, 2C)
      w_dec_p[p * c2:(p + 1) * c2, t2 * f:(t2 + 1) * f] = blk.T
  b_dec_p = np.tile(np.asarray(params["b_dec"], np.float32).reshape(c2, 1), (4, 1))

  return {
      "dog": jnp.asarray(dog_op, jnp.bfloat16),
      "w_enc": jnp.asarray(w_enc_p, jnp.bfloat16),
      "b_enc": jnp.asarray(params["b_enc"], jnp.float32).reshape(f, 1),
      "enc_mask": jnp.asarray(_tap_masks(_enc_taps(ho, wo), b, h, w)),
      "w_dec": jnp.asarray(w_dec_p, jnp.bfloat16),
      "b_dec": jnp.asarray(b_dec_p, jnp.float32),
      "dec_mask": jnp.asarray(_tap_masks(_dec_taps(ho, wo), b, h, w)),
  }


# ------------------------------------ forward --------------------------------------
def visual_path_forward(x_nchw, kc):
  b, c, h, w = x_nchw.shape
  c2 = 2 * c
  hw = h * w
  n_pad = b * hw                       # lane dim: (batch, phase-major pixel)
  ho, wo = h // SAE_STRIDE, w // SAE_STRIDE
  m = ho * wo                          # live lanes per sample block
  f = SAE_FILTERS
  ch_pad = ((c2 + 7) // 8) * 8
  enc_taps = _enc_taps(ho, wo)
  dec_taps = _dec_taps(ho, wo)

  def kernel(x_ref, dog_ref, w_enc_ref, b_enc_ref, emask_ref,
             w_dec_ref, b_dec_ref, dmask_ref, ret_ref, enc_ref, dec_ref):
    # ---- Retina: per-sample depthwise DoG 'same' conv as one MXU matmul each ------
    acc = jnp.concatenate(
        [jnp.dot(x_ref[:, i * hw:(i + 1) * hw], dog_ref[...],
                 preferred_element_type=jnp.float32) for i in range(b)],
        axis=-1)                                                    # (C, B*HW) f32
    planes = jnp.concatenate([jnp.maximum(acc, 0.0),                # DoG+ channels
                              jnp.maximum(-acc, 0.0)], axis=0)      # DoG- channels
    ret_ref[...] = planes                                           # target (2C, B*HW)

    # ---- Cortex encoder: Conv2d(2C -> F, k=4, s=2, p=1) ---------------------------
    # 16 taps = constant lane shifts of the phase-major planes; one lane-dense matmul.
    if ch_pad > c2:
      planes_p = jnp.concatenate(
          [planes, jnp.zeros((ch_pad - c2, n_pad), jnp.float32)], axis=0)
    else:
      planes_p = planes
    emask = emask_ref[...]
    pieces = []
    for t, (_, _, off) in enumerate(enc_taps):
      shifted = pltpu.roll(planes_p, (-off) % n_pad, axis=1) if off else planes_p
      pieces.append(shifted * emask[t:t + 1, :])
    rhs_e = jnp.concatenate(pieces, axis=0).astype(jnp.bfloat16)    # (16*ch_pad, B*HW)
    enc = jnp.dot(w_enc_ref[...], rhs_e,
                  preferred_element_type=jnp.float32) + b_enc_ref[...]   # (F, B*HW)

    # ---- Per-sample top-k sparsity: exact threshold via bisection on int32 keys ----
    bits = pltpu.bitcast(enc, jnp.int32)
    keys = jnp.where(bits >= 0, bits, jnp.int32(-2 ** 31) - bits)   # order-preserving map
    masked = []
    for i in range(b):
      live = keys[:, i * hw:i * hw + m]                             # (F, ho*wo) live block

      def body(_, carry, live=live):
        lo, hi = carry
        mid = (lo >> 1) + (hi >> 1) + (lo & hi & 1)                 # overflow-free midpoint
        cnt = jnp.sum((live >= mid).astype(jnp.int32))
        take = cnt >= SAE_SPARSITY
        return jnp.where(take, mid, lo), jnp.where(take, hi, mid)

      thr, _ = lax.fori_loop(0, _BISECT_ITERS, body,
                             (jnp.int32(_KEY_LO), jnp.int32(_KEY_HI)))
      blk = slice(i * hw, (i + 1) * hw)
      masked.append(jnp.where(keys[:, blk] >= thr, enc[:, blk], 0.0))
    enc_m = jnp.concatenate(masked, axis=-1)                        # sparse encoding (F, B*HW)
    enc_ref[...] = enc_m

    # ---- Cortex decoder: ConvTranspose2d(F -> 2C, k=4, s=2, p=1), 4-phase form -----
    dmask = dmask_ref[...]
    dpieces = []
    for t, (_, _, off) in enumerate(dec_taps):
      shifted = pltpu.roll(enc_m, (-off) % n_pad, axis=1) if off else enc_m
      dpieces.append(shifted * dmask[t:t + 1, :])
    rhs_d = jnp.concatenate(dpieces, axis=0).astype(jnp.bfloat16)   # (9*F, B*HW)
    dec_ref[...] = jnp.dot(w_dec_ref[...], rhs_d,
                           preferred_element_type=jnp.float32) + b_dec_ref[...]

  # Input layout: channels on sublanes, (batch, pixel) on lanes; bf16 for the MXU.
  xr = x_nchw.transpose(1, 0, 2, 3).reshape(c, n_pad).astype(jnp.bfloat16)
  vmem = pl.BlockSpec(memory_space=pltpu.MemorySpace.VMEM)
  ret, enc, dec = pl.pallas_call(
      kernel,
      out_shape=(jax.ShapeDtypeStruct((c2, n_pad), jnp.float32),
                 jax.ShapeDtypeStruct((f, n_pad), jnp.float32),
                 jax.ShapeDtypeStruct((4 * c2, n_pad), jnp.float32)),
      in_specs=[vmem] * 8,
      out_specs=(vmem, vmem, vmem),
  )(xr, kc["dog"], kc["w_enc"], kc["b_enc"], kc["enc_mask"],
    kc["w_dec"], kc["b_dec"], kc["dec_mask"])

  # Tiny XLA layout plumbing back to NCHW (phase-major lanes -> interleaved pixels).
  target = (ret.reshape(c2, b, 2, 2, ho, wo)
            .transpose(1, 0, 4, 2, 5, 3).reshape(b, c2, h, w))
  encoding = enc.reshape(f, b, 4, ho, wo)[:, :, 0].transpose(1, 0, 2, 3)
  decoding = (dec.reshape(2, 2, c2, b, 4, ho, wo)[:, :, :, :, 0]
              .transpose(3, 2, 4, 0, 5, 1).reshape(b, c2, h, w))
  return encoding, decoding, target


# -------------------------------------- main ---------------------------------------
if __name__ == "__main__":
  # >= 4 images folded into the lane dimension per the review (fills the 256-wide MXU).
  B, C, H, W = 4, 3, 16, 16

  key = jax.random.PRNGKey(0)
  k_x, k_p = jax.random.split(key)
  x = jax.random.normal(k_x, (B, C, H, W), jnp.float32)
  params = init_params(k_p, C)
  kc = pack_constants(params, B, C, H, W)      # hoisted: never re-packed per forward call

  fwd = jax.jit(visual_path_forward)
  encoding, decoding, target = fwd(x, kc)
  jax.block_until_ready((encoding, decoding, target))

  ho, wo = H // SAE_STRIDE, W // SAE_STRIDE
  assert encoding.shape == (B, SAE_FILTERS, ho, wo)
  assert decoding.shape == (B, 2 * C, H, W)
  assert target.shape == (B, 2 * C, H, W)
  assert bool(jnp.isfinite(encoding).all() & jnp.isfinite(decoding).all()
              & jnp.isfinite(target).all())
  # top-k sparsity sanity: each sample keeps ~SAE_SPARSITY active units (ties kept via >=).
  nnz = jnp.sum(encoding.reshape(B, -1) != 0.0, axis=1)
  assert bool(jnp.all(nnz >= SAE_SPARSITY)) and bool(jnp.all(nnz <= SAE_SPARSITY + 8))
  print("KERNEL_OK")
</pallas_src>

<mosaic_0001>
module attributes {stable_mosaic.version = 11 : i64} {
  func.func @kernel(%arg0: memref<3x1024xbf16, #tpu.memory_space<vmem>>, %arg1: memref<256x256xbf16, #tpu.memory_space<vmem>>, %arg2: memref<32x128xbf16, #tpu.memory_space<vmem>>, %arg3: memref<32x1xf32, #tpu.memory_space<vmem>>, %arg4: memref<16x1024xf32, #tpu.memory_space<vmem>>, %arg5: memref<24x288xbf16, #tpu.memory_space<vmem>>, %arg6: memref<24x1xf32, #tpu.memory_space<vmem>>, %arg7: memref<9x1024xf32, #tpu.memory_space<vmem>>, %arg8: memref<6x1024xf32, #tpu.memory_space<vmem>>, %arg9: memref<32x1024xf32, #tpu.memory_space<vmem>>, %arg10: memref<24x1024xf32, #tpu.memory_space<vmem>>) attributes {dimension_semantics = [], scalar_prefetch = 0 : i64, scratch_operands = 0 : i64, tpu.core_type = #tpu.core_type<tc>} {
    %c0 = arith.constant 0 : index
    %c0_0 = arith.constant 0 : index
    %0 = vector.load %arg0[%c0, %c0_0] : memref<3x1024xbf16, #tpu.memory_space<vmem>>, vector<3x256xbf16>
    %c0_1 = arith.constant 0 : index
    %c0_2 = arith.constant 0 : index
    %1 = vector.load %arg1[%c0_1, %c0_2] : memref<256x256xbf16, #tpu.memory_space<vmem>>, vector<256x256xbf16>
    %cst = arith.constant dense<0.000000e+00> : vector<3x256xf32>
    %2 = tpu.matmul %0, %1, %cst {dimension_numbers = #tpu.dot_dimension_numbers<[1], [0], [0], [1], [0, 0, 1, 1], [], []>} : vector<3x256xbf16>, vector<256x256xbf16>, vector<3x256xf32> -> vector<3x256xf32>
    %c0_3 = arith.constant 0 : index
    %c256 = arith.constant 256 : index
    %3 = vector.load %arg0[%c0_3, %c256] : memref<3x1024xbf16, #tpu.memory_space<vmem>>, vector<3x256xbf16>
    %c0_4 = arith.constant 0 : index
    %c0_5 = arith.constant 0 : index
    %4 = vector.load %arg1[%c0_4, %c0_5] : memref<256x256xbf16, #tpu.memory_space<vmem>>, vector<256x256xbf16>
    %cst_6 = arith.constant dense<0.000000e+00> : vector<3x256xf32>
    %5 = tpu.matmul %3, %4, %cst_6 {dimension_numbers = #tpu.dot_dimension_numbers<[1], [0], [0], [1], [0, 0, 1, 1], [], []>} : vector<3x256xbf16>, vector<256x256xbf16>, vector<3x256xf32> -> vector<3x256xf32>
    %c0_7 = arith.constant 0 : index
    %c512 = arith.constant 512 : index
    %6 = vector.load %arg0[%c0_7, %c512] : memref<3x1024xbf16, #tpu.memory_space<vmem>>, vector<3x256xbf16>
    %c0_8 = arith.constant 0 : index
    %c0_9 = arith.constant 0 : index
    %7 = vector.load %arg1[%c0_8, %c0_9] : memref<256x256xbf16, #tpu.memory_space<vmem>>, vector<256x256xbf16>
    %cst_10 = arith.constant dense<0.000000e+00> : vector<3x256xf32>
    %8 = tpu.matmul %6, %7, %cst_10 {dimension_numbers = #tpu.dot_dimension_numbers<[1], [0], [0], [1], [0, 0, 1, 1], [], []>} : vector<3x256xbf16>, vector<256x256xbf16>, vector<3x256xf32> -> vector<3x256xf32>
    %c0_11 = arith.constant 0 : index
    %c768 = arith.constant 768 : index
    %9 = vector.load %arg0[%c0_11, %c768] : memref<3x1024xbf16, #tpu.memory_space<vmem>>, vector<3x256xbf16>
    %c0_12 = arith.constant 0 : index
    %c0_13 = arith.constant 0 : index
    %10 = vector.load %arg1[%c0_12, %c0_13] : memref<256x256xbf16, #tpu.memory_space<vmem>>, vector<256x256xbf16>
    %cst_14 = arith.constant dense<0.000000e+00> : vector<3x256xf32>
    %11 = tpu.matmul %9, %10, %cst_14 {dimension_numbers = #tpu.dot_dimension_numbers<[1], [0], [0], [1], [0, 0, 1, 1], [], []>} : vector<3x256xbf16>, vector<256x256xbf16>, vector<3x256xf32> -> vector<3x256xf32>
    %12 = tpu.concatenate %2, %5, %8, %11 in 1 : vector<3x256xf32>, vector<3x256xf32>, vector<3x256xf32>, vector<3x256xf32> -> vector<3x1024xf32>
    %cst_15 = arith.constant 0.000000e+00 : f32
    %13 = vector.broadcast %cst_15 : f32 to vector<3x1024xf32>
    %14 = arith.maximumf %12, %13 : vector<3x1024xf32>
    %cst_16 = arith.constant 0.000000e+00 : f32
    %15 = vector.broadcast %cst_16 : f32 to vector<3x1024xf32>
    %16 = arith.subf %15, %12 : vector<3x1024xf32>
    %cst_17 = arith.constant 0.000000e+00 : f32
    %17 = vector.broadcast %cst_17 : f32 to vector<3x1024xf32>
    %18 = arith.maximumf %16, %17 : vector<3x1024xf32>
    %19 = tpu.concatenate %14, %18 in 0 : vector<3x1024xf32>, vector<3x1024xf32> -> vector<6x1024xf32>
    %c0_18 = arith.constant 0 : index
    %c0_19 = arith.constant 0 : index
    %20 = vector.load %arg8[%c0_18, %c0_19] : memref<6x1024xf32, #tpu.memory_space<vmem>>, vector<6x1024xf32>
    tpu.vector_store %arg8[%c0_18, %c0_19], %19 {strides = array<i32>} : memref<6x1024xf32, #tpu.memory_space<vmem>>, vector<6x1024xf32>,
    %cst_20 = arith.constant 0.000000e+00 : f32
    %21 = vector.broadcast %cst_20 : f32 to vector<2x1024xf32>
    %22 = tpu.concatenate %19, %21 in 0 : vector<6x1024xf32>, vector<2x1024xf32> -> vector<8x1024xf32>
    %c0_21 = arith.constant 0 : index
    %c0_22 = arith.constant 0 : index
    %23 = vector.load %arg4[%c0_21, %c0_22] : memref<16x1024xf32, #tpu.memory_space<vmem>>, vector<16x1024xf32>
    %c841_i32 = arith.constant 841 : i32
    %24 = tpu.dynamic_rotate %22 by %c841_i32 dim 1 : vector<8x1024xf32>, i32 -> vector<8x1024xf32>
    %25 = vector.extract_strided_slice %23 {offsets = [0, 0], sizes = [1, 1024], strides = [1, 1]} : vector<16x1024xf32> to vector<1x1024xf32>
    %26 = vector.broadcast %25 : vector<1x1024xf32> to vector<8x1024xf32>
    %27 = arith.mulf %24, %26 : vector<8x1024xf32>
    %c904_i32 = arith.constant 904 : i32
    %28 = tpu.dynamic_rotate %22 by %c904_i32 dim 1 : vector<8x1024xf32>, i32 -> vector<8x1024xf32>
    %29 = vector.extract_strided_slice %23 {offsets = [1, 0], sizes = [1, 1024], strides = [1, 1]} : vector<16x1024xf32> to vector<1x1024xf32>
    %30 = vector.broadcast %29 : vector<1x1024xf32> to vector<8x1024xf32>
    %31 = arith.mulf %28, %30 : vector<8x1024xf32>
    %c840_i32 = arith.constant 840 : i32
    %32 = tpu.dynamic_rotate %22 by %c840_i32 dim 1 : vector<8x1024xf32>, i32 -> vector<8x1024xf32>
    %33 = vector.extract_strided_slice %23 {offsets = [2, 0], sizes = [1, 1024], strides = [1, 1]} : vector<16x1024xf32> to vector<1x1024xf32>
    %34 = vector.broadcast %33 : vector<1x1024xf32> to vector<8x1024xf32>
    %35 = arith.mulf %32, %34 : vector<8x1024xf32>
    %c903_i32 = arith.constant 903 : i32
    %36 = tpu.dynamic_rotate %22 by %c903_i32 dim 1 : vector<8x1024xf32>, i32 -> vector<8x1024xf32>
    %37 = vector.extract_strided_slice %23 {offsets = [3, 0], sizes = [1, 1024], strides = [1, 1]} : vector<16x1024xf32> to vector<1x1024xf32>
    %38 = vector.broadcast %37 : vector<1x1024xf32> to vector<8x1024xf32>
    %39 = arith.mulf %36, %38 : vector<8x1024xf32>
    %c961_i32 = arith.constant 961 : i32
    %40 = tpu.dynamic_rotate %22 by %c961_i32 dim 1 : vector<8x1024xf32>, i32 -> vector<8x1024xf32>
    %41 = vector.extract_strided_slice %23 {offsets = [4, 0], sizes = [1, 1024], strides = [1, 1]} : vector<16x1024xf32> to vector<1x1024xf32>
    %42 = vector.broadcast %41 : vector<1x1024xf32> to vector<8x1024xf32>
    %43 = arith.mulf %40, %42 : vector<8x1024xf32>
    %44 = vector.extract_strided_slice %23 {offsets = [5, 0], sizes = [1, 1024], strides = [1, 1]} : vector<16x1024xf32> to vector<1x1024xf32>
    %45 = vector.broadcast %44 : vector<1x1024xf32> to vector<8x1024xf32>
    %46 = arith.mulf %22, %45 : vector<8x1024xf32>
    %c960_i32 = arith.constant 960 : i32
    %47 = tpu.dynamic_rotate %22 by %c960_i32 dim 1 : vector<8x1024xf32>, i32 -> vector<8x1024xf32>
    %48 = vector.extract_strided_slice %23 {offsets = [6, 0], sizes = [1, 1024], strides = [1, 1]} : vector<16x1024xf32> to vector<1x1024xf32>
    %49 = vector.broadcast %48 : vector<1x1024xf32> to vector<8x1024xf32>
    %50 = arith.mulf %47, %49 : vector<8x1024xf32>
    %c1023_i32 = arith.constant 1023 : i32
    %51 = tpu.dynamic_rotate %22 by %c1023_i32 dim 1 : vector<8x1024xf32>, i32 -> vector<8x1024xf32>
    %52 = vector.extract_strided_slice %23 {offsets = [7, 0], sizes = [1, 1024], strides = [1, 1]} : vector<16x1024xf32> to vector<1x1024xf32>
    %53 = vector.broadcast %52 : vector<1x1024xf32> to vector<8x1024xf32>
    %54 = arith.mulf %51, %53 : vector<8x1024xf32>
    %c833_i32 = arith.constant 833 : i32
    %55 = tpu.dynamic_rotate %22 by %c833_i32 dim 1 : vector<8x1024xf32>, i32 -> vector<8x1024xf32>
    %56 = vector.extract_strided_slice %23 {offsets = [8, 0], sizes = [1, 1024], strides = [1, 1]} : vector<16x1024xf32> to vector<1x1024xf32>
    %57 = vector.broadcast %56 : vector<1x1024xf32> to vector<8x1024xf32>
    %58 = arith.mulf %55, %57 : vector<8x1024xf32>
    %c896_i32 = arith.constant 896 : i32
    %59 = tpu.dynamic_rotate %22 by %c896_i32 dim 1 : vector<8x1024xf32>, i32 -> vector<8x1024xf32>
    %60 = vector.extract_strided_slice %23 {offsets = [9, 0], sizes = [1, 1024], strides = [1, 1]} : vector<16x1024xf32> to vector<1x1024xf32>
    %61 = vector.broadcast %60 : vector<1x1024xf32> to vector<8x1024xf32>
    %62 = arith.mulf %59, %61 : vector<8x1024xf32>
    %c832_i32 = arith.constant 832 : i32
    %63 = tpu.dynamic_rotate %22 by %c832_i32 dim 1 : vector<8x1024xf32>, i32 -> vector<8x1024xf32>
    %64 = vector.extract_strided_slice %23 {offsets = [10, 0], sizes = [1, 1024], strides = [1, 1]} : vector<16x1024xf32> to vector<1x1024xf32>
    %65 = vector.broadcast %64 : vector<1x1024xf32> to vector<8x1024xf32>
    %66 = arith.mulf %63, %65 : vector<8x1024xf32>
    %c895_i32 = arith.constant 895 : i32
    %67 = tpu.dynamic_rotate %22 by %c895_i32 dim 1 : vector<8x1024xf32>, i32 -> vector<8x1024xf32>
    %68 = vector.extract_strided_slice %23 {offsets = [11, 0], sizes = [1, 1024], strides = [1, 1]} : vector<16x1024xf32> to vector<1x1024xf32>
    %69 = vector.broadcast %68 : vector<1x1024xf32> to vector<8x1024xf32>
    %70 = arith.mulf %67, %69 : vector<8x1024xf32>
    %c953_i32 = arith.constant 953 : i32
    %71 = tpu.dynamic_rotate %22 by %c953_i32 dim 1 : vector<8x1024xf32>, i32 -> vector<8x1024xf32>
    %72 = vector.extract_strided_slice %23 {offsets = [12, 0], sizes = [1, 1024], strides = [1, 1]} : vector<16x1024xf32> to vector<1x1024xf32>
    %73 = vector.broadcast %72 : vector<1x1024xf32> to vector<8x1024xf32>
    %74 = arith.mulf %71, %73 : vector<8x1024xf32>
    %c1016_i32 = arith.constant 1016 : i32
    %75 = tpu.dynamic_rotate %22 by %c1016_i32 dim 1 : vector<8x1024xf32>, i32 -> vector<8x1024xf32>
    %76 = vector.extract_strided_slice %23 {offsets = [13, 0], sizes = [1, 1024], strides = [1, 1]} : vector<16x1024xf32> to vector<1x1024xf32>
    %77 = vector.broadcast %76 : vector<1x1024xf32> to vector<8x1024xf32>
    %78 = arith.mulf %75, %77 : vector<8x1024xf32>
    %c952_i32 = arith.constant 952 : i32
    %79 = tpu.dynamic_rotate %22 by %c952_i32 dim 1 : vector<8x1024xf32>, i32 -> vector<8x1024xf32>
    %80 = vector.extract_strided_slice %23 {offsets = [14, 0], sizes = [1, 1024], strides = [1, 1]} : vector<16x1024xf32> to vector<1x1024xf32>
    %81 = vector.broadcast %80 : vector<1x1024xf32> to vector<8x1024xf32>
    %82 = arith.mulf %79, %81 : vector<8x1024xf32>
    %c1015_i32 = arith.constant 1015 : i32
    %83 = tpu.dynamic_rotate %22 by %c1015_i32 dim 1 : vector<8x1024xf32>, i32 -> vector<8x1024xf32>
    %84 = vector.extract_strided_slice %23 {offsets = [15, 0], sizes = [1, 1024], strides = [1, 1]} : vector<16x1024xf32> to vector<1x1024xf32>
    %85 = vector.broadcast %84 : vector<1x1024xf32> to vector<8x1024xf32>
    %86 = arith.mulf %83, %85 : vector<8x1024xf32>
    %87 = tpu.concatenate %27, %31, %35, %39, %43, %46, %50, %54, %58, %62, %66, %70, %74, %78, %82, %86 in 0 : vector<8x1024xf32>, vector<8x1024xf32>, vector<8x1024xf32>, vector<8x1024xf32>, vector<8x1024xf32>, vector<8x1024xf32>, vector<8x1024xf32>, vector<8x1024xf32>, vector<8x1024xf32>, vector<8x1024xf32>, vector<8x1024xf32>, vector<8x1024xf32>, vector<8x1024xf32>, vector<8x1024xf32>, vector<8x1024xf32>, vector<8x1024xf32> -> vector<128x1024xf32>
    %88 = arith.truncf %87 : vector<128x1024xf32> to vector<128x1024xbf16>
    %c0_23 = arith.constant 0 : index
    %c0_24 = arith.constant 0 : index
    %89 = vector.load %arg2[%c0_23, %c0_24] : memref<32x128xbf16, #tpu.memory_space<vmem>>, vector<32x128xbf16>
    %cst_25 = arith.constant dense<0.000000e+00> : vector<32x1024xf32>
    %90 = tpu.matmul %89, %88, %cst_25 {dimension_numbers = #tpu.dot_dimension_numbers<[1], [0], [0], [1], [0, 0, 1, 1], [], []>} : vector<32x128xbf16>, vector<128x1024xbf16>, vector<32x1024xf32> -> vector<32x1024xf32>
    %c0_26 = arith.constant 0 : index
    %c0_27 = arith.constant 0 : index
    %91 = vector.load %arg3[%c0_26, %c0_27] : memref<32x1xf32, #tpu.memory_space<vmem>>, vector<32x1xf32>
    %92 = vector.broadcast %91 : vector<32x1xf32> to vector<32x1024xf32>
    %93 = arith.addf %90, %92 : vector<32x1024xf32>
    %94 = tpu.bitcast %93 : vector<32x1024xf32> -> vector<32x1024xi32>
    %c0_i32 = arith.constant 0 : i32
    %95 = vector.broadcast %c0_i32 : i32 to vector<32x1024xi32>
    %96 = arith.cmpi sge, %94, %95 : vector<32x1024xi32>
    %c-2147483648_i32 = arith.constant -2147483648 : i32
    %97 = vector.broadcast %c-2147483648_i32 : i32 to vector<32x1024xi32>
    %98 = arith.subi %97, %94 : vector<32x1024xi32>
    %99 = arith.select %96, %94, %98 : vector<32x1024xi1>, vector<32x1024xi32>
    %100 = vector.extract_strided_slice %99 {offsets = [0, 0], sizes = [32, 64], strides = [1, 1]} : vector<32x1024xi32> to vector<32x64xi32>
    %c-2139095040_i32 = arith.constant -2139095040 : i32
    %c2139095040_i32 = arith.constant 2139095040 : i32
    %c0_i32_28 = arith.constant 0 : i32
    %c34_i32 = arith.constant 34 : i32
    %101 = arith.addi %c0_i32_28, %c34_i32 : i32
    %c1_i32 = arith.constant 1 : i32
    %102:2 = scf.for %arg11 = %c0_i32_28 to %101 step %c1_i32 iter_args(%arg12 = %c-2139095040_i32, %arg13 = %c2139095040_i32) -> (i32, i32)  : i32 {
      %c1_i32_63 = arith.constant 1 : i32
      %182 = arith.shrsi %arg12, %c1_i32_63 : i32
      %c1_i32_64 = arith.constant 1 : i32
      %183 = arith.shrsi %arg13, %c1_i32_64 : i32
      %184 = arith.addi %182, %183 : i32
      %185 = arith.andi %arg12, %arg13 : i32
      %c1_i32_65 = arith.constant 1 : i32
      %186 = arith.andi %185, %c1_i32_65 : i32
      %187 = arith.addi %184, %186 : i32
      %188 = vector.broadcast %187 : i32 to vector<32x64xi32>
      %189 = arith.cmpi sge, %100, %188 : vector<32x64xi32>
      %190 = arith.extui %189 : vector<32x64xi1> to vector<32x64xi32>
      %191 = vector.shape_cast %190 : vector<32x64xi32> to vector<1x32x64xi32>
      %cst_66 = arith.constant dense<0> : vector<1xi32>
      %192 = vector.multi_reduction <add>, %191, %cst_66 [1, 2] : vector<1x32x64xi32> to vector<1xi32>
      %193 = vector.shape_cast %192 : vector<1xi32> to vector<1x1x1xi32>
      %194 = vector.extract %193[0, 0, 0] : i32 from vector<1x1x1xi32>
      %c25_i32 = arith.constant 25 : i32
      %195 = arith.cmpi sge, %194, %c25_i32 : i32
      %196 = arith.select %195, %187, %arg12 : i32
      %197 = arith.select %195, %arg13, %187 : i32
      scf.yield %196, %197 : i32, i32
    }
    %103 = vector.extract_strided_slice %99 {offsets = [0, 0], sizes = [32, 256], strides = [1, 1]} : vector<32x1024xi32> to vector<32x256xi32>
    %104 = vector.broadcast %102#0 : i32 to vector<32x256xi32>
    %105 = arith.cmpi sge, %103, %104 : vector<32x256xi32>
    %106 = vector.extract_strided_slice %93 {offsets = [0, 0], sizes = [32, 256], strides = [1, 1]} : vector<32x1024xf32> to vector<32x256xf32>
    %cst_29 = arith.constant 0.000000e+00 : f32
    %107 = vector.broadcast %cst_29 : f32 to vector<32x256xf32>
    %108 = arith.select %105, %106, %107 : vector<32x256xi1>, vector<32x256xf32>
    %109 = vector.extract_strided_slice %99 {offsets = [0, 256], sizes = [32, 64], strides = [1, 1]} : vector<32x1024xi32> to vector<32x64xi32>
    %c-2139095040_i32_30 = arith.constant -2139095040 : i32
    %c2139095040_i32_31 = arith.constant 2139095040 : i32
    %c0_i32_32 = arith.constant 0 : i32
    %c34_i32_33 = arith.constant 34 : i32
    %110 = arith.addi %c0_i32_32, %c34_i32_33 : i32
    %c1_i32_34 = arith.constant 1 : i32
    %111:2 = scf.for %arg11 = %c0_i32_32 to %110 step %c1_i32_34 iter_args(%arg12 = %c-2139095040_i32_30, %arg13 = %c2139095040_i32_31) -> (i32, i32)  : i32 {
      %c1_i32_63 = arith.constant 1 : i32
      %182 = arith.shrsi %arg12, %c1_i32_63 : i32
      %c1_i32_64 = arith.constant 1 : i32
      %183 = arith.shrsi %arg13, %c1_i32_64 : i32
      %184 = arith.addi %182, %183 : i32
      %185 = arith.andi %arg12, %arg13 : i32
      %c1_i32_65 = arith.constant 1 : i32
      %186 = arith.andi %185, %c1_i32_65 : i32
      %187 = arith.addi %184, %186 : i32
      %188 = vector.broadcast %187 : i32 to vector<32x64xi32>
      %189 = arith.cmpi sge, %109, %188 : vector<32x64xi32>
      %190 = arith.extui %189 : vector<32x64xi1> to vector<32x64xi32>
      %191 = vector.shape_cast %190 : vector<32x64xi32> to vector<1x32x64xi32>
      %cst_66 = arith.constant dense<0> : vector<1xi32>
      %192 = vector.multi_reduction <add>, %191, %cst_66 [1, 2] : vector<1x32x64xi32> to vector<1xi32>
      %193 = vector.shape_cast %192 : vector<1xi32> to vector<1x1x1xi32>
      %194 = vector.extract %193[0, 0, 0] : i32 from vector<1x1x1xi32>
      %c25_i32 = arith.constant 25 : i32
      %195 = arith.cmpi sge, %194, %c25_i32 : i32
      %196 = arith.select %195, %187, %arg12 : i32
      %197 = arith.select %195, %arg13, %187 : i32
      scf.yield %196, %197 : i32, i32
    }
    %112 = vector.extract_strided_slice %99 {offsets = [0, 256], sizes = [32, 256], strides = [1, 1]} : vector<32x1024xi32> to vector<32x256xi32>
    %113 = vector.broadcast %111#0 : i32 to vector<32x256xi32>
    %114 = arith.cmpi sge, %112, %113 : vector<32x256xi32>
    %115 = vector.extract_strided_slice %93 {offsets = [0, 256], sizes = [32, 256], strides = [1, 1]} : vector<32x1024xf32> to vector<32x256xf32>
    %cst_35 = arith.constant 0.000000e+00 : f32
    %116 = vector.broadcast %cst_35 : f32 to vector<32x256xf32>
    %117 = arith.select %114, %115, %116 : vector<32x256xi1>, vector<32x256xf32>
    %118 = vector.extract_strided_slice %99 {offsets = [0, 512], sizes = [32, 64], strides = [1, 1]} : vector<32x1024xi32> to vector<32x64xi32>
    %c-2139095040_i32_36 = arith.constant -2139095040 : i32
    %c2139095040_i32_37 = arith.constant 2139095040 : i32
    %c0_i32_38 = arith.constant 0 : i32
    %c34_i32_39 = arith.constant 34 : i32
    %119 = arith.addi %c0_i32_38, %c34_i32_39 : i32
    %c1_i32_40 = arith.constant 1 : i32
    %120:2 = scf.for %arg11 = %c0_i32_38 to %119 step %c1_i32_40 iter_args(%arg12 = %c-2139095040_i32_36, %arg13 = %c2139095040_i32_37) -> (i32, i32)  : i32 {
      %c1_i32_63 = arith.constant 1 : i32
      %182 = arith.shrsi %arg12, %c1_i32_63 : i32
      %c1_i32_64 = arith.constant 1 : i32
      %183 = arith.shrsi %arg13, %c1_i32_64 : i32
      %184 = arith.addi %182, %183 : i32
      %185 = arith.andi %arg12, %arg13 : i32
      %c1_i32_65 = arith.constant 1 : i32
      %186 = arith.andi %185, %c1_i32_65 : i32
      %187 = arith.addi %184, %186 : i32
      %188 = vector.broadcast %187 : i32 to vector<32x64xi32>
      %189 = arith.cmpi sge, %118, %188 : vector<32x64xi32>
      %190 = arith.extui %189 : vector<32x64xi1> to vector<32x64xi32>
      %191 = vector.shape_cast %190 : vector<32x64xi32> to vector<1x32x64xi32>
      %cst_66 = arith.constant dense<0> : vector<1xi32>
      %192 = vector.multi_reduction <add>, %191, %cst_66 [1, 2] : vector<1x32x64xi32> to vector<1xi32>
      %193 = vector.shape_cast %192 : vector<1xi32> to vector<1x1x1xi32>
      %194 = vector.extract %193[0, 0, 0] : i32 from vector<1x1x1xi32>
      %c25_i32 = arith.constant 25 : i32
      %195 = arith.cmpi sge, %194, %c25_i32 : i32
      %196 = arith.select %195, %187, %arg12 : i32
      %197 = arith.select %195, %arg13, %187 : i32
      scf.yield %196, %197 : i32, i32
    }
    %121 = vector.extract_strided_slice %99 {offsets = [0, 512], sizes = [32, 256], strides = [1, 1]} : vector<32x1024xi32> to vector<32x256xi32>
    %122 = vector.broadcast %120#0 : i32 to vector<32x256xi32>
    %123 = arith.cmpi sge, %121, %122 : vector<32x256xi32>
    %124 = vector.extract_strided_slice %93 {offsets = [0, 512], sizes = [32, 256], strides = [1, 1]} : vector<32x1024xf32> to vector<32x256xf32>
    %cst_41 = arith.constant 0.000000e+00 : f32
    %125 = vector.broadcast %cst_41 : f32 to vector<32x256xf32>
    %126 = arith.select %123, %124, %125 : vector<32x256xi1>, vector<32x256xf32>
    %127 = vector.extract_strided_slice %99 {offsets = [0, 768], sizes = [32, 64], strides = [1, 1]} : vector<32x1024xi32> to vector<32x64xi32>
    %c-2139095040_i32_42 = arith.constant -2139095040 : i32
    %c2139095040_i32_43 = arith.constant 2139095040 : i32
    %c0_i32_44 = arith.constant 0 : i32
    %c34_i32_45 = arith.constant 34 : i32
    %128 = arith.addi %c0_i32_44, %c34_i32_45 : i32
    %c1_i32_46 = arith.constant 1 : i32
    %129:2 = scf.for %arg11 = %c0_i32_44 to %128 step %c1_i32_46 iter_args(%arg12 = %c-2139095040_i32_42, %arg13 = %c2139095040_i32_43) -> (i32, i32)  : i32 {
      %c1_i32_63 = arith.constant 1 : i32
      %182 = arith.shrsi %arg12, %c1_i32_63 : i32
      %c1_i32_64 = arith.constant 1 : i32
      %183 = arith.shrsi %arg13, %c1_i32_64 : i32
      %184 = arith.addi %182, %183 : i32
      %185 = arith.andi %arg12, %arg13 : i32
      %c1_i32_65 = arith.constant 1 : i32
      %186 = arith.andi %185, %c1_i32_65 : i32
      %187 = arith.addi %184, %186 : i32
      %188 = vector.broadcast %187 : i32 to vector<32x64xi32>
      %189 = arith.cmpi sge, %127, %188 : vector<32x64xi32>
      %190 = arith.extui %189 : vector<32x64xi1> to vector<32x64xi32>
      %191 = vector.shape_cast %190 : vector<32x64xi32> to vector<1x32x64xi32>
      %cst_66 = arith.constant dense<0> : vector<1xi32>
      %192 = vector.multi_reduction <add>, %191, %cst_66 [1, 2] : vector<1x32x64xi32> to vector<1xi32>
      %193 = vector.shape_cast %192 : vector<1xi32> to vector<1x1x1xi32>
      %194 = vector.extract %193[0, 0, 0] : i32 from vector<1x1x1xi32>
      %c25_i32 = arith.constant 25 : i32
      %195 = arith.cmpi sge, %194, %c25_i32 : i32
      %196 = arith.select %195, %187, %arg12 : i32
      %197 = arith.select %195, %arg13, %187 : i32
      scf.yield %196, %197 : i32, i32
    }
    %130 = vector.extract_strided_slice %99 {offsets = [0, 768], sizes = [32, 256], strides = [1, 1]} : vector<32x1024xi32> to vector<32x256xi32>
    %131 = vector.broadcast %129#0 : i32 to vector<32x256xi32>
    %132 = arith.cmpi sge, %130, %131 : vector<32x256xi32>
    %133 = vector.extract_strided_slice %93 {offsets = [0, 768], sizes = [32, 256], strides = [1, 1]} : vector<32x1024xf32> to vector<32x256xf32>
    %cst_47 = arith.constant 0.000000e+00 : f32
    %134 = vector.broadcast %cst_47 : f32 to vector<32x256xf32>
    %135 = arith.select %132, %133, %134 : vector<32x256xi1>, vector<32x256xf32>
    %136 = tpu.concatenate %108, %117, %126, %135 in 1 : vector<32x256xf32>, vector<32x256xf32>, vector<32x256xf32>, vector<32x256xf32> -> vector<32x1024xf32>
    %c0_48 = arith.constant 0 : index
    %c0_49 = arith.constant 0 : index
    %137 = vector.load %arg9[%c0_48, %c0_49] : memref<32x1024xf32, #tpu.memory_space<vmem>>, vector<32x1024xf32>
    tpu.vector_store %arg9[%c0_48, %c0_49], %136 {strides = array<i32>} : memref<32x1024xf32, #tpu.memory_space<vmem>>, vector<32x1024xf32>,
    %c0_50 = arith.constant 0 : index
    %c0_51 = arith.constant 0 : index
    %138 = vector.load %arg7[%c0_50, %c0_51] : memref<9x1024xf32, #tpu.memory_space<vmem>>, vector<9x1024xf32>
    %c9_i32 = arith.constant 9 : i32
    %139 = tpu.dynamic_rotate %136 by %c9_i32 dim 1 : vector<32x1024xf32>, i32 -> vector<32x1024xf32>
    %140 = vector.extract_strided_slice %138 {offsets = [0, 0], sizes = [1, 1024], strides = [1, 1]} : vector<9x1024xf32> to vector<1x1024xf32>
    %141 = vector.broadcast %140 : vector<1x1024xf32> to vector<32x1024xf32>
    %142 = arith.mulf %139, %141 : vector<32x1024xf32>
    %c8_i32 = arith.constant 8 : i32
    %143 = tpu.dynamic_rotate %136 by %c8_i32 dim 1 : vector<32x1024xf32>, i32 -> vector<32x1024xf32>
    %144 = vector.extract_strided_slice %138 {offsets = [1, 0], sizes = [1, 1024], strides = [1, 1]} : vector<9x1024xf32> to vector<1x1024xf32>
    %145 = vector.broadcast %144 : vector<1x1024xf32> to vector<32x1024xf32>
    %146 = arith.mulf %143, %145 : vector<32x1024xf32>
    %c7_i32 = arith.constant 7 : i32
    %147 = tpu.dynamic_rotate %136 by %c7_i32 dim 1 : vector<32x1024xf32>, i32 -> vector<32x1024xf32>
    %148 = vector.extract_strided_slice %138 {offsets = [2, 0], sizes = [1, 1024], strides = [1, 1]} : vector<9x1024xf32> to vector<1x1024xf32>
    %149 = vector.broadcast %148 : vector<1x1024xf32> to vector<32x1024xf32>
    %150 = arith.mulf %147, %149 : vector<32x1024xf32>
    %c1_i32_52 = arith.constant 1 : i32
    %151 = tpu.dynamic_rotate %136 by %c1_i32_52 dim 1 : vector<32x1024xf32>, i32 -> vector<32x1024xf32>
    %152 = vector.extract_strided_slice %138 {offsets = [3, 0], sizes = [1, 1024], strides = [1, 1]} : vector<9x1024xf32> to vector<1x1024xf32>
    %153 = vector.broadcast %152 : vector<1x1024xf32> to vector<32x1024xf32>
    %154 = arith.mulf %151, %153 : vector<32x1024xf32>
    %155 = vector.extract_strided_slice %138 {offsets = [4, 0], sizes = [1, 1024], strides = [1, 1]} : vector<9x1024xf32> to vector<1x1024xf32>
    %156 = vector.broadcast %155 : vector<1x1024xf32> to vector<32x1024xf32>
    %157 = arith.mulf %136, %156 : vector<32x1024xf32>
    %c1023_i32_53 = arith.constant 1023 : i32
    %158 = tpu.dynamic_rotate %136 by %c1023_i32_53 dim 1 : vector<32x1024xf32>, i32 -> vector<32x1024xf32>
    %159 = vector.extract_strided_slice %138 {offsets = [5, 0], sizes = [1, 1024], strides = [1, 1]} : vector<9x1024xf32> to vector<1x1024xf32>
    %160 = vector.broadcast %159 : vector<1x1024xf32> to vector<32x1024xf32>
    %161 = arith.mulf %158, %160 : vector<32x1024xf32>
    %c1017_i32 = arith.constant 1017 : i32
    %162 = tpu.dynamic_rotate %136 by %c1017_i32 dim 1 : vector<32x1024xf32>, i32 -> vector<32x1024xf32>
    %163 = vector.extract_strided_slice %138 {offsets = [6, 0], sizes = [1, 1024], strides = [1, 1]} : vector<9x1024xf32> to vector<1x1024xf32>
    %164 = vector.broadcast %163 : vector<1x1024xf32> to vector<32x1024xf32>
    %165 = arith.mulf %162, %164 : vector<32x1024xf32>
    %c1016_i32_54 = arith.constant 1016 : i32
    %166 = tpu.dynamic_rotate %136 by %c1016_i32_54 dim 1 : vector<32x1024xf32>, i32 -> vector<32x1024xf32>
    %167 = vector.extract_strided_slice %138 {offsets = [7, 0], sizes = [1, 1024], strides = [1, 1]} : vector<9x1024xf32> to vector<1x1024xf32>
    %168 = vector.broadcast %167 : vector<1x1024xf32> to vector<32x1024xf32>
    %169 = arith.mulf %166, %168 : vector<32x1024xf32>
    %c1015_i32_55 = arith.constant 1015 : i32
    %170 = tpu.dynamic_rotate %136 by %c1015_i32_55 dim 1 : vector<32x1024xf32>, i32 -> vector<32x1024xf32>
    %171 = vector.extract_strided_slice %138 {offsets = [8, 0], sizes = [1, 1024], strides = [1, 1]} : vector<9x1024xf32> to vector<1x1024xf32>
    %172 = vector.broadcast %171 : vector<1x1024xf32> to vector<32x1024xf32>
    %173 = arith.mulf %170, %172 : vector<32x1024xf32>
    %174 = tpu.concatenate %142, %146, %150, %154, %157, %161, %165, %169, %173 in 0 : vector<32x1024xf32>, vector<32x1024xf32>, vector<32x1024xf32>, vector<32x1024xf32>, vector<32x1024xf32>, vector<32x1024xf32>, vector<32x1024xf32>, vector<32x1024xf32>, vector<32x1024xf32> -> vector<288x1024xf32>
    %175 = arith.truncf %174 : vector<288x1024xf32> to vector<288x1024xbf16>
    %c0_56 = arith.constant 0 : index
    %c0_57 = arith.constant 0 : index
    %176 = vector.load %arg5[%c0_56, %c0_57] : memref<24x288xbf16, #tpu.memory_space<vmem>>, vector<24x288xbf16>
    %cst_58 = arith.constant dense<0.000000e+00> : vector<24x1024xf32>
    %177 = tpu.matmul %176, %175, %cst_58 {dimension_numbers = #tpu.dot_dimension_numbers<[1], [0], [0], [1], [0, 0, 1, 1], [], []>} : vector<24x288xbf16>, vector<288x1024xbf16>, vector<24x1024xf32> -> vector<24x1024xf32>
    %c0_59 = arith.constant 0 : index
    %c0_60 = arith.constant 0 : index
    %178 = vector.load %arg6[%c0_59, %c0_60] : memref<24x1xf32, #tpu.memory_space<vmem>>, vector<24x1xf32>
    %179 = vector.broadcast %178 : vector<24x1xf32> to vector<24x1024xf32>
    %180 = arith.addf %177, %179 : vector<24x1024xf32>
    %c0_61 = arith.constant 0 : index
    %c0_62 = arith.constant 0 : index
    %181 = vector.load %arg10[%c0_61, %c0_62] : memref<24x1024xf32, #tpu.memory_space<vmem>>, vector<24x1024xf32>
    tpu.vector_store %arg10[%c0_61, %c0_62], %180 {strides = array<i32>} : memref<24x1024xf32, #tpu.memory_space<vmem>>, vector<24x1024xf32>,
    return
  }
}

</mosaic_0001>

<bundles_post_ra>
// kernel: visual_path_forward.1
= control target key start
LH: loop header
LB: loop body
LE: loop exit
PB: predicated region body
PF: predicated region fallthrough
CT: control target
= control target key end

     0   :  { %16 = vsyncpa [#allocation3], 0  ;;  %s9222_s0 = inlined_call_operand.vmem [shape: bf16[3,1024], index: 0, kind: input, shape index: {}]   ;;  %s9223_s1 = inlined_call_operand.hbm [shape: bf16[256,256], index: 1, kind: input, shape index: {}]   ;;  %s9224_s2 = inlined_call_operand.hbm [shape: bf16[32,128], index: 2, kind: input, shape index: {}]   ;;  %s9225_s3 = inlined_call_operand.vmem [shape: f32[32,1], index: 3, kind: input, shape index: {}]   ;;  %s9226_s4 = inlined_call_operand.hbm [shape: f32[16,1024], index: 4, kind: input, shape index: {}]   ;;  %s9227_s5 = inlined_call_operand.hbm [shape: bf16[24,288], index: 5, kind: input, shape index: {}]   ;;  %s9228_s6 = inlined_call_operand.vmem [shape: f32[24,1], index: 6, kind: input, shape index: {}]   ;;  %s9229_s7 = inlined_call_operand.hbm [shape: f32[9,1024], index: 7, kind: input, shape index: {}]   ;;  %s9230_s8 = inlined_call_operand.vmem [shape: f32[6,1024], index: 8, kind: output, shape index: {0}]   ;;  %s9231_s9 = inlined_call_operand.vmem [shape: f32[32,1024], index: 9, kind: output, shape index: {1}]   ;;  %s9232_s10 = inlined_call_operand.vmem [shape: f32[24,1024], index: 10, kind: output, shape index: {2}]  }
   0x1   :  { %17 = vsyncpa [#allocation5], 0 }
   0x2   :  { %18 = vsyncpa [#allocation8], 0  ;;  %s4829_s13 = smov [#allocation4]  }
   0x3   :  { %s38_s14 = sshll.u32 %s4829_s13, 4  ;;  %s39_s14 = int_to_ptr.vmem [resolvable:$true] %s38_s14 }
   0x4   :  { %s4635_s15 = scalar_lea.vmem %s39_s14, 256  ;;  %p4640_p1 = scmp.lt.s32.totalorder %s39_s14, %s39_s14 }
   0x5   :  { %p4636_p0 = scmp.ne.s32.totalorder %s39_s14, %s4635_s15  ;;  %p4641_p2 = scmp.lt.s32.totalorder %s4635_s15, %s4635_s15 }
   0x7   :  { %p4642_p3 = por %p4641_p2, %p4640_p1 }
   0x9   :  { %p4643_p4 = pnand %p4642_p3, %p4636_p0 }
   0xb   :  { %4646 = shalt.err (!%p4643_p4)
}
   0xc   :  { %s4830_s16 = smov 64   ;;  %s4831_s17 = smov 4  }
   0xd   :  { %44 = dma.hbm_to_vmem [thread:$0]  %s9224_s2, 256, %s39_s14, [#allocation5], %s4830_s16, %s4830_s16, %s4831_s17  }
   0xe   :  { %s4832_s20 = smov [#allocation7]  }
   0xf   :  { %s64_s21 = sshll.u32 %s4832_s20, 4  ;;  %s65_s21 = int_to_ptr.vmem [resolvable:$true] %s64_s21 }
  0x10   :  { %s4655_s22 = scalar_lea.vmem %s65_s21, 576  ;;  %p4660_p6 = scmp.lt.s32.totalorder %s65_s21, %s65_s21 }
  0x11   :  { %p4656_p5 = scmp.ne.s32.totalorder %s65_s21, %s4655_s22  ;;  %p4661_p7 = scmp.lt.s32.totalorder %s4655_s22, %s4655_s22 }
  0x13   :  { %p4662_p8 = por %p4661_p7, %p4660_p6 }
  0x15   :  { %p4663_p9 = pnand %p4662_p8, %p4656_p5 }
  0x17   :  { %4666 = shalt.err (!%p4663_p9)
}
  0x18   :  { %s4833_s23 = smov 192   ;;  %s4834_s24 = smov 12  }
  0x19   :  { %70 = dma.hbm_to_vmem [thread:$0]  %s9227_s5, 576, %s65_s21, [#allocation8], %s4833_s23, %s4833_s23, %s4834_s24  }
  0x1a   :  { %s4835_s27 = smov [#allocation2]  }
  0x1b   :  { %s26_s28 = sshll.u32 %s4835_s27, 4  ;;  %s27_s28 = int_to_ptr.vmem [resolvable:$true] %s26_s28 }
  0x1c   :  { %s4675_s2 = scalar_lea.vmem %s27_s28, 4096  ;;  %p4680_p11 = scmp.lt.s32.totalorder %s27_s28, %s27_s28 }
  0x1d   :  { %p4676_p10 = scmp.ne.s32.totalorder %s27_s28, %s4675_s2  ;;  %p4681_p12 = scmp.lt.s32.totalorder %s4675_s2, %s4675_s2 }
  0x1f   :  { %p4682_p13 = por %p4681_p12, %p4680_p11 }
  0x21   :  { %p4683_p0 = pnand %p4682_p13, %p4676_p10 }
  0x23   :  { %4686 = shalt.err (!%p4683_p0)
}
  0x24   :  { %s4836_s29 = smov 128   ;;  %s4837_s30 = smov 8  }
  0x25   :  { %32 = dma.hbm_to_vmem [thread:$0]  %s9223_s1, 4096, %s27_s28, [#allocation3], %s4836_s29, %s4836_s29, %s4837_s30  }
  0x26   :  { %s4838_s13 = smov [#allocation6]  }
  0x27   :  { %s52_s14 = sshll.u32 %s4838_s13, 4  ;;  %s53_s14 = int_to_ptr.vmem [resolvable:$true] %s52_s14 }
  0x28   :  { %s4695_s5 = scalar_lea.vmem %s53_s14, 2048  ;;  %p4700_p2 = scmp.lt.s32.totalorder %s53_s14, %s53_s14 }
  0x29   :  { %p4696_p1 = scmp.ne.s32.totalorder %s53_s14, %s4695_s5  ;;  %p4701_p3 = scmp.lt.s32.totalorder %s4695_s5, %s4695_s5 }
  0x2b   :  { %p4702_p4 = por %p4701_p3, %p4700_p2 }
  0x2d   :  { %p4703_p5 = pnand %p4702_p4, %p4696_p1 }
  0x2f   :  { %4706 = shalt.err (!%p4703_p5)
}
  0x30   :  { %s4839_s15 = smov 1024   ;;  %s4840_s19 = smov [#allocation9]  }
  0x31   :  { %58 = dma.hbm_to_vmem [thread:$0]  %s9226_s4, 2048, %s53_s14, [#allocation5], %s4839_s15, %s4839_s15, %s4830_s16  }
  0x32   :  { %s78_s20 = sshll.u32 %s4840_s19, 4  ;;  %s79_s20 = int_to_ptr.vmem [resolvable:$true] %s78_s20 }
  0x33   :  { %s4715_s1 = scalar_lea.vmem %s79_s20, 2048  ;;  %p4720_p7 = scmp.lt.s32.totalorder %s79_s20, %s79_s20 }
  0x34   :  { %p4716_p6 = scmp.ne.s32.totalorder %s79_s20, %s4715_s1  ;;  %p4721_p8 = scmp.lt.s32.totalorder %s4715_s1, %s4715_s1 }
  0x36   :  { %p4722_p9 = por %p4721_p8, %p4720_p7 }
  0x38   :  { %p4723_p10 = pnand %p4722_p9, %p4716_p6 }
  0x3a   :  { %4726 = shalt.err (!%p4723_p10)
}
  0x3b   :  { %84 = dma.hbm_to_vmem [thread:$0]  %s9229_s7, 2048, %s79_s20, [#allocation8], %s4839_s15, %s4839_s15, %s4830_s16  }
  0x3c   :  { %4775 = dma.done.wait [#allocation3], 4096  }
  0x3d   :  { %4776 = vsyncadd [#allocation3], 4294963200 }
  0x3e   :  { %4777 = dma.done.wait [#allocation5], 2304  }
  0x3f   :  { %4778 = vsyncadd [#allocation5], 4294964992 }
  0x40   :  { %4779 = dma.done.wait [#allocation8], 2624  }
  0x41   :  { %4780 = vsyncadd [#allocation8], 4294964672  ;;  %v4933_v0 = vld [vmem:[#allocation2 + $0x74] ss:$8 sps:$4 sm:$0xff]   ;;  %v4935_v1 = vld [vmem:[#allocation2 + $0x70] ss:$8 sps:$4 sm:$0xff]  }
  0x42   :  { %305 = vmatprep.subr.bf16.mxu0 %v4933_v0  ;;  %358 = vmatprep.subr.bf16.mxu1 %v4933_v0  ;;  %v4939_v2 = vld [vmem:[#allocation2 + $0x64] ss:$8 sps:$4 sm:$0xff]   ;;  %v4943_v3 = vld [vmem:[#allocation2 + $0x60] ss:$8 sps:$4 sm:$0xff]   ;;  %v4947_v4 = vld [vmem:[#allocation2 + $0x54] ss:$8 sps:$4 sm:$0xff]  }
  0x43   :  { %306 = vmatpush1.bf16.msra.mxu0 %v4935_v1  ;;  %359 = vmatpush1.bf16.msra.mxu1 %v4935_v1  ;;  %v4951_v5 = vld [vmem:[#allocation2 + $0x50] ss:$8 sps:$4 sm:$0xff]   ;;  %v4955_v6 = vld [vmem:[#allocation2 + $0x44] ss:$8 sps:$4 sm:$0xff]   ;;  %v4959_v7 = vld [vmem:[#allocation2 + $0x40] ss:$8 sps:$4 sm:$0xff]  }
  0x44   :  { %307 = vmatprep.subr.bf16.mxu0 %v4939_v2  ;;  %360 = vmatprep.subr.bf16.mxu1 %v4939_v2  ;;  %v4963_v8 = vld [vmem:[#allocation2 + $0x34] ss:$8 sps:$4 sm:$0xff]   ;;  %v4967_v9 = vld [vmem:[#allocation2 + $0x30] ss:$8 sps:$4 sm:$0xff]   ;;  %v4971_v10 = vld [vmem:[#allocation2 + $0x24] ss:$8 sps:$4 sm:$0xff]  }
  0x45   :  { %v4975_v11 = vld [vmem:[#allocation2 + $0x20] ss:$8 sps:$4 sm:$0xff]   ;;  %v4979_v12 = vld [vmem:[#allocation2 + $0x14] ss:$8 sps:$4 sm:$0xff]   ;;  %v4995_v16 = vld [vmem:[#allocation2 + $0x10] ss:$8 sps:$4 sm:$0xff]  }
  0x46   :  { %v4984_v13 = vld.sshfl [vmem:[%s9222_s0] sm:$0x33 pattern:$0x76325410]  ;;  %v5001_v18 = vld [vmem:[#allocation2 + $0x4] ss:$8 sps:$4 sm:$0xff]  }
  0x47   :  { %308 = vmatpush1.bf16.msra.mxu0 %v4943_v3  ;;  %361 = vmatpush1.bf16.msra.mxu1 %v4943_v3  ;;  %v142_v14 = vcombine.high %v4984_v13, %v4984_v13  ;;  %v4991_v15 = vld.sshfl [vmem:[%s9222_s0 + $0x4] sm:$0x33 pattern:$0x76325410]  ;;  %v5005_v19 = vld [vmem:[#allocation2] ss:$8 sps:$4 sm:$0xff]  }
  0x48   :  { %309 = vmatprep.subr.bf16.mxu0 %v4947_v4  ;;  %362 = vmatprep.subr.bf16.mxu1 %v4947_v4  ;;  %v355_v17 = vcombine.high %v4991_v15, %v4991_v15  ;;  %v5009_v20 = vld [vmem:[#allocation2 + $0xf4] ss:$8 sps:$4 sm:$0xff]   ;;  %v5013_v21 = vld [vmem:[#allocation2 + $0xf0] ss:$8 sps:$4 sm:$0xff]   ;;  %v5017_v22 = vld [vmem:[#allocation2 + $0xe4] ss:$8 sps:$4 sm:$0xff]  }
  0x49   :  { %337 = vmatprep.mubr.bf16.mxu0 %v142_v14  ;;  %v5021_v23 = vld [vmem:[#allocation2 + $0xe0] ss:$8 sps:$4 sm:$0xff]   ;;  %v5025_v24 = vld [vmem:[#allocation2 + $0xd4] ss:$8 sps:$4 sm:$0xff]   ;;  %v5029_v25 = vld [vmem:[#allocation2 + $0xd0] ss:$8 sps:$4 sm:$0xff]  }
  0x4a   :  { %390 = vmatprep.mubr.bf16.mxu1 %v355_v17  ;;  %v5033_v26 = vld [vmem:[#allocation2 + $0xc4] ss:$8 sps:$4 sm:$0xff]   ;;  %v5037_v27 = vld [vmem:[#allocation2 + $0xc0] ss:$8 sps:$4 sm:$0xff]   ;;  %v5041_v28 = vld [vmem:[#allocation2 + $0xb4] ss:$8 sps:$4 sm:$0xff]  }
  0x4b   :  { %310 = vmatpush1.bf16.msra.mxu0 %v4951_v5  ;;  %363 = vmatpush1.bf16.msra.mxu1 %v4951_v5  ;;  %v5045_v29 = vld [vmem:[#allocation2 + $0xb0] ss:$8 sps:$4 sm:$0xff]   ;;  %v5049_v30 = vld [vmem:[#allocation2 + $0xa4] ss:$8 sps:$4 sm:$0xff]   ;;  %v5053_v31 = vld [vmem:[#allocation2 + $0xa0] ss:$8 sps:$4 sm:$0xff]  }
  0x4c   :  { %311 = vmatprep.subr.bf16.mxu0 %v4955_v6  ;;  %364 = vmatprep.subr.bf16.mxu1 %v4955_v6  ;;  %v5057_v32 = vld [vmem:[#allocation2 + $0x94] ss:$8 sps:$4 sm:$0xff]   ;;  %v5061_v33 = vld [vmem:[#allocation2 + $0x90] ss:$8 sps:$4 sm:$0xff]   ;;  %v5065_v34 = vld [vmem:[#allocation2 + $0x84] ss:$8 sps:$4 sm:$0xff]  }
  0x4d   :  { %v5069_v35 = vld [vmem:[#allocation2 + $0x80] ss:$8 sps:$4 sm:$0xff]   ;;  %v5081_v37 = vld.sshfl [vmem:[%s9222_s0 + $0xc] sm:$0x33 pattern:$0x76325410] }
  0x4e   :  { %v5076_v36 = vld.sshfl [vmem:[%s9222_s0 + $0x8] sm:$0x33 pattern:$0x76325410]  ;;  %v461_v39 = vcombine.high %v5081_v37, %v5081_v37  ;;  %vm553_vm0 = vcmask 1042432   ;;  %vm570_vm1 = vcmask 1045504  }
  0x4f   :  { %312 = vmatpush1.bf16.msra.mxu0 %v4959_v7  ;;  %365 = vmatpush1.bf16.msra.mxu1 %v4959_v7  ;;  %v408_v38 = vcombine.high %v5076_v36, %v5076_v36  ;;  %s4841_s12 = smov 119   ;;  %s4842_s13 = smov 56  }
  0x50   :  { %313 = vmatprep.subr.bf16.mxu0 %v4963_v8  ;;  %366 = vmatprep.subr.bf16.mxu1 %v4963_v8  ;;  %s4843_s18 = smov 57   ;;  %s4844_s19 = smov 120  }
  0x51   :  { %s4845_s20 = smov 127   ;;  %s4846_s1 = smov 65  }
  0x52   :  { %s4847_s21 = smov 7   ;;  %s4848_s22 = smov 72  }
  0x53   :  { %314 = vmatpush1.bf16.msra.mxu0 %v4967_v9  ;;  %367 = vmatpush1.bf16.msra.mxu1 %v4967_v9  ;;  %s4849_s4 = smov 73   ;;  %s6619_s15 = smov 2155872256  }
  0x54   :  { %315 = vmatprep.subr.bf16.mxu0 %v4971_v10  ;;  %368 = vmatprep.subr.bf16.mxu1 %v4971_v10  ;;  %s6621_s17 = smov 0  }
  0x57   :  { %316 = vmatpush1.bf16.msra.mxu0 %v4975_v11  ;;  %369 = vmatpush1.bf16.msra.mxu1 %v4975_v11 }
  0x58   :  { %317 = vmatprep.subr.bf16.mxu0 %v4979_v12  ;;  %370 = vmatprep.subr.bf16.mxu1 %v4979_v12 }
  0x5b   :  { %318 = vmatpush1.bf16.msra.mxu0 %v4995_v16  ;;  %371 = vmatpush1.bf16.msra.mxu1 %v4995_v16 }
  0x5c   :  { %319 = vmatprep.subr.bf16.mxu0 %v5001_v18  ;;  %372 = vmatprep.subr.bf16.mxu1 %v5001_v18 }
  0x5f   :  { %320 = vmatpush1.bf16.msra.mxu0 %v5005_v19  ;;  %373 = vmatpush1.bf16.msra.mxu1 %v5005_v19 }
  0x60   :  { %321 = vmatprep.subr.bf16.mxu0 %v5009_v20  ;;  %374 = vmatprep.subr.bf16.mxu1 %v5009_v20 }
  0x63   :  { %322 = vmatpush2.bf16.msra.mxu0 %v5013_v21  ;;  %375 = vmatpush2.bf16.msra.mxu1 %v5013_v21 }
  0x64   :  { %323 = vmatprep.subr.bf16.mxu0 %v5017_v22  ;;  %376 = vmatprep.subr.bf16.mxu1 %v5017_v22 }
  0x67   :  { %324 = vmatpush2.bf16.msra.mxu0 %v5021_v23  ;;  %377 = vmatpush2.bf16.msra.mxu1 %v5021_v23 }
  0x68   :  { %325 = vmatprep.subr.bf16.mxu0 %v5025_v24  ;;  %378 = vmatprep.subr.bf16.mxu1 %v5025_v24 }
  0x6b   :  { %326 = vmatpush2.bf16.msra.mxu0 %v5029_v25  ;;  %379 = vmatpush2.bf16.msra.mxu1 %v5029_v25 }
  0x6c   :  { %327 = vmatprep.subr.bf16.mxu0 %v5033_v26  ;;  %380 = vmatprep.subr.bf16.mxu1 %v5033_v26 }
  0x6f   :  { %328 = vmatpush2.bf16.msra.mxu0 %v5037_v27  ;;  %381 = vmatpush2.bf16.msra.mxu1 %v5037_v27 }
  0x70   :  { %329 = vmatprep.subr.bf16.mxu0 %v5041_v28  ;;  %382 = vmatprep.subr.bf16.mxu1 %v5041_v28 }
  0x73   :  { %330 = vmatpush2.bf16.msra.mxu0 %v5045_v29  ;;  %383 = vmatpush2.bf16.msra.mxu1 %v5045_v29 }
  0x74   :  { %331 = vmatprep.subr.bf16.mxu0 %v5049_v30  ;;  %384 = vmatprep.subr.bf16.mxu1 %v5049_v30 }
  0x77   :  { %332 = vmatpush2.bf16.msra.mxu0 %v5053_v31  ;;  %385 = vmatpush2.bf16.msra.mxu1 %v5053_v31 }
  0x78   :  { %333 = vmatprep.subr.bf16.mxu0 %v5057_v32  ;;  %386 = vmatprep.subr.bf16.mxu1 %v5057_v32 }
  0x7b   :  { %334 = vmatpush2.bf16.msra.mxu0 %v5061_v33  ;;  %387 = vmatpush2.bf16.msra.mxu1 %v5061_v33 }
  0x7c   :  { %335 = vmatprep.subr.bf16.mxu0 %v5065_v34  ;;  %388 = vmatprep.subr.bf16.mxu1 %v5065_v34 }
  0x7f   :  { %336 = vmatpush2.bf16.msra.mxu0 %v5069_v35  ;;  %389 = vmatpush2.bf16.msra.mxu1 %v5069_v35 }
  0x80   :  { %411 = vmatprep.subr.bf16.mxu0 %v4933_v0  ;;  %464 = vmatprep.subr.bf16.mxu1 %v4933_v0 }
  0x82   :  { %338 = vmatmul.mubr.bf16.vlgmr.msra.gmra.mxu0 %v4984_v13  ;;  %391 = vmatmul.mubr.bf16.vlgmr.msra.gmra.mxu1 %v4991_v15 }
  0x83   :  { %412 = vmatpush1.bf16.msra.mxu0 %v4935_v1  ;;  %465 = vmatpush1.bf16.msra.mxu1 %v4935_v1 }
  0x84   :  { %413 = vmatprep.subr.bf16.mxu0 %v4939_v2  ;;  %466 = vmatprep.subr.bf16.mxu1 %v4939_v2 }
  0x85   :  { %443 = vmatprep.mubr.bf16.mxu0 %v408_v38  ;;  %496 = vmatprep.mubr.bf16.mxu1 %v461_v39 }
  0x87   :  { %414 = vmatpush1.bf16.msra.mxu0 %v4943_v3  ;;  %467 = vmatpush1.bf16.msra.mxu1 %v4943_v3 }
  0x88   :  { %415 = vmatprep.subr.bf16.mxu0 %v4947_v4  ;;  %468 = vmatprep.subr.bf16.mxu1 %v4947_v4 }
  0x8b   :  { %416 = vmatpush1.bf16.msra.mxu0 %v4951_v5  ;;  %469 = vmatpush1.bf16.msra.mxu1 %v4951_v5 }
  0x8c   :  { %417 = vmatprep.subr.bf16.mxu0 %v4955_v6  ;;  %470 = vmatprep.subr.bf16.mxu1 %v4955_v6 }
  0x8f   :  { %418 = vmatpush1.bf16.msra.mxu0 %v4959_v7  ;;  %471 = vmatpush1.bf16.msra.mxu1 %v4959_v7 }
  0x90   :  { %419 = vmatprep.subr.bf16.mxu0 %v4963_v8  ;;  %472 = vmatprep.subr.bf16.mxu1 %v4963_v8 }
  0x93   :  { %420 = vmatpush1.bf16.msra.mxu0 %v4967_v9  ;;  %473 = vmatpush1.bf16.msra.mxu1 %v4967_v9 }
  0x94   :  { %421 = vmatprep.subr.bf16.mxu0 %v4971_v10  ;;  %474 = vmatprep.subr.bf16.mxu1 %v4971_v10 }
  0x97   :  { %422 = vmatpush1.bf16.msra.mxu0 %v4975_v11  ;;  %475 = vmatpush1.bf16.msra.mxu1 %v4975_v11 }
  0x98   :  { %423 = vmatprep.subr.bf16.mxu0 %v4979_v12  ;;  %476 = vmatprep.subr.bf16.mxu1 %v4979_v12 }
  0x9b   :  { %424 = vmatpush1.bf16.msra.mxu0 %v4995_v16  ;;  %477 = vmatpush1.bf16.msra.mxu1 %v4995_v16 }
  0x9c   :  { %425 = vmatprep.subr.bf16.mxu0 %v5001_v18  ;;  %478 = vmatprep.subr.bf16.mxu1 %v5001_v18 }
  0x9f   :  { %426 = vmatpush1.bf16.msra.mxu0 %v5005_v19  ;;  %479 = vmatpush1.bf16.msra.mxu1 %v5005_v19 }
  0xa0   :  { %427 = vmatprep.subr.bf16.mxu0 %v5009_v20  ;;  %480 = vmatprep.subr.bf16.mxu1 %v5009_v20 }
  0xa3   :  { %428 = vmatpush2.bf16.msra.mxu0 %v5013_v21  ;;  %481 = vmatpush2.bf16.msra.mxu1 %v5013_v21 }
  0xa4   :  { %429 = vmatprep.subr.bf16.mxu0 %v5017_v22  ;;  %482 = vmatprep.subr.bf16.mxu1 %v5017_v22 }
  0xa7   :  { %430 = vmatpush2.bf16.msra.mxu0 %v5021_v23  ;;  %483 = vmatpush2.bf16.msra.mxu1 %v5021_v23 }
  0xa8   :  { %431 = vmatprep.subr.bf16.mxu0 %v5025_v24  ;;  %484 = vmatprep.subr.bf16.mxu1 %v5025_v24 }
  0xab   :  { %432 = vmatpush2.bf16.msra.mxu0 %v5029_v25  ;;  %485 = vmatpush2.bf16.msra.mxu1 %v5029_v25 }
  0xac   :  { %433 = vmatprep.subr.bf16.mxu0 %v5033_v26  ;;  %486 = vmatprep.subr.bf16.mxu1 %v5033_v26 }
  0xaf   :  { %434 = vmatpush2.bf16.msra.mxu0 %v5037_v27  ;;  %487 = vmatpush2.bf16.msra.mxu1 %v5037_v27 }
  0xb0   :  { %435 = vmatprep.subr.bf16.mxu0 %v5041_v28  ;;  %488 = vmatprep.subr.bf16.mxu1 %v5041_v28 }
  0xb3   :  { %436 = vmatpush2.bf16.msra.mxu0 %v5045_v29  ;;  %489 = vmatpush2.bf16.msra.mxu1 %v5045_v29 }
  0xb4   :  { %437 = vmatprep.subr.bf16.mxu0 %v5049_v30  ;;  %490 = vmatprep.subr.bf16.mxu1 %v5049_v30 }
  0xb7   :  { %438 = vmatpush2.bf16.msra.mxu0 %v5053_v31  ;;  %491 = vmatpush2.bf16.msra.mxu1 %v5053_v31 }
  0xb8   :  { %439 = vmatprep.subr.bf16.mxu0 %v5057_v32  ;;  %492 = vmatprep.subr.bf16.mxu1 %v5057_v32 }
  0xbb   :  { %440 = vmatpush2.bf16.msra.mxu0 %v5061_v33  ;;  %493 = vmatpush2.bf16.msra.mxu1 %v5061_v33 }
  0xbc   :  { %441 = vmatprep.subr.bf16.mxu0 %v5065_v34  ;;  %494 = vmatprep.subr.bf16.mxu1 %v5065_v34 }
  0xbf   :  { %442 = vmatpush2.bf16.msra.mxu0 %v5069_v35  ;;  %495 = vmatpush2.bf16.msra.mxu1 %v5069_v35 }
  0xc2   :  { %444 = vmatmul.mubr.bf16.vlgmr.msra.gmra.mxu0 %v5076_v36  ;;  %497 = vmatmul.mubr.bf16.vlgmr.msra.gmra.mxu1 %v5081_v37 }
 0x142   :  { %v339_v40 = vpop.f32.mrf.mxu0  ;;  %v392_v41 = vpop.f32.mrf.mxu1 }
 0x143   :  { %v513_v42 = vsub.f32 0.0, %v339_v40  ;;  %v515_v43 = vsub.f32 0.0, %v392_v41  ;;  %v505_v46 = vmax.f32 %v339_v40, 0.0  ;;  %v507_v54 = vmax.f32 %v392_v41, 0.0 }
 0x144   :  { %v341_v44 = vpop.f32.mrf.mxu0  ;;  %v394_v45 = vpop.f32.mrf.mxu1 }
 0x145   :  { %v521_v47 = vmax.f32 %v513_v42, 0.0  ;;  %v523_v48 = vmax.f32 %v515_v43, 0.0  ;;  %v514_v49 = vsub.f32 0.0, %v341_v44  ;;  %v516_v50 = vsub.f32 0.0, %v394_v45 }
 0x146   :  { %v343_v51 = vpop.f32.mrf.mxu0  ;;  %v396_v52 = vpop.f32.mrf.mxu1  ;;  %v506_v62 = vmax.f32 %v341_v44, 0.0  ;;  %v508_v1 = vmax.f32 %v394_v45, 0.0 }
 0x147   :  { %v537_v53 = vrot.slane %v521_v47, 5  ;;  %v539_v55 = vrot.slane %v523_v48, 5  ;;  %v522_v56 = vmax.f32 %v514_v49, 0.0  ;;  %v524_v57 = vmax.f32 %v516_v50, 0.0 }
 0x148   :  { %v344_v58 = vpop.f32.mrf.mxu0  ;;  %v397_v59 = vpop.f32.mrf.mxu1  ;;  %v9233_v48 = vmov 0  }
 0x149   :  { %v554_v60 = vsel %vm553_vm0, %v505_v46, %v537_v53  ;;  %v556_v61 = vsel %vm553_vm0, %v507_v54, %v539_v55  ;;  %v538_v63 = vrot.slane %v522_v56, 5  ;;  %v540_v2 = vrot.slane %v524_v57, 5  ;;  %1648 = vmatprep.mubr.bf16.mxu0 %v9233_v48  ;;  %1701 = vmatprep.mubr.bf16.mxu1 %v9233_v48 }
 0x14a   :  { %562 = vst [vmem:[%s9230_s8] sm:$0x3f] %v554_v60  ;;  %564 = vst [vmem:[%s9230_s8 + $0x10] sm:$0x3f] %v556_v61  ;;  %v5166_v0 = vsel %vm570_vm1, %v556_v61, 0.0  ;;  %v5181_v5 = vsel %vm570_vm1, %v554_v60, 0.0  ;;  %4516 = vset.pattern.permute.xlu1 %v9233_v48  ;;  %4515 = vset.pattern.permute.xlu0 %v9233_v48  ;;  %v611_v55 = vlaneseq }
 0x14b   :  { %9379 = vst [vmem:[#allocation13_spill] sm:$0xff] %v5166_v0  ;;  %v555_v3 = vsel %vm553_vm0, %v506_v62, %v538_v63  ;;  %1451 = vrot.lane.b32.xlu1 %v5166_v0, %s4841_s12  ;;  %1386 = vrot.lane.b32.xlu0 %v5166_v0, %s4842_s13  ;;  %v557_v4 = vsel %vm553_vm0, %v508_v1, %v540_v2  ;;  %v5418_v2 = vld [vmem:[#allocation6 + $0x40] sm:$0xff] }
 0x14c   :  { %563 = vst [vmem:[%s9230_s8 + $0x8] sm:$0x3f] %v555_v3  ;;  %565 = vst [vmem:[%s9230_s8 + $0x18] sm:$0x3f] %v557_v4  ;;  %v5216_v6 = vsel %vm570_vm1, %v555_v3, 0.0  ;;  %v5227_v7 = vsel %vm570_vm1, %v557_v4, 0.0 }
 0x14d   :  { %v5397_v58 = vand.u32 127, %v611_v55  ;;  %v5399_v59 = vshrl.u32 %v611_v55, 7  ;;  %v5420_v3 = vld [vmem:[#allocation6 + $0x48] sm:$0xff] }
 0x14f   :  { %1447 = vrot.lane.b32.xlu1 %v5181_v5, %s4841_s12  ;;  %1382 = vrot.lane.b32.xlu0 %v5181_v5, %s4842_s13  ;;  %9390 = vst [vmem:[#allocation24_spill] sm:$0xff] %v5397_v58  ;;  %v5406_v62 = vsub.s32 6, %v5399_v59  ;;  %v5413_v63 = vsub.s32 7, %v5399_v59  ;;  %vm1398_vm2 = vcmp.lt.s32.totalorder %v5397_v58, 56  ;;  %vm1463_vm3 = vcmp.lt.s32.totalorder %v5397_v58, 119 }
 0x150   :  { %v5494_v55 = vsub.s32 2, %v5399_v59  ;;  %vm1268_vm4 = vcmp.lt.s32.totalorder %v5397_v58, 57  ;;  %vm978_vm5 = vcmp.lt.s32.totalorder %v5397_v58, 64  ;;  %vm1043_vm6 = vcmp.lt.s32.totalorder %v5397_v58, 127 }
 0x151   :  { %9392 = vst [vmem:[#allocation26_spill] sm:$0xff] %v5406_v62  ;;  %9393 = vst [vmem:[#allocation27_spill] sm:$0xff] %v5413_v63  ;;  %vm1333_vm7 = vcmp.lt.s32.totalorder %v5397_v58, 120  ;;  %vm873_vm8 = vcmp.lt.s32.totalorder %v5397_v58, 65  ;;  %vm808_vm9 = vcmp.lt.s32.totalorder %v5397_v58, 7  ;;  %vm743_vm10 = vcmp.lt.s32.totalorder %v5397_v58, 72 }
 0x152   :  { %9397 = vst [vmem:[#allocation31_spill] sm:$0xff] %v5494_v55  ;;  %vm613_vm11 = vcmp.lt.s32.totalorder %v5397_v58, 73  ;;  %vm678_vm12 = vcmp.lt.s32.totalorder %v5397_v58, 8 }
 0x153   :  { %1256 = vrot.lane.b32.xlu1 %v5166_v0, %s4843_s18  ;;  %1252 = vrot.lane.b32.xlu0 %v5181_v5, %s4843_s18 }
 0x157   :  { %1321 = vrot.lane.b32.xlu1 %v5166_v0, %s4844_s19  ;;  %966 = vrot.lane.b32.xlu0 %v5166_v0, %s4830_s16 }
 0x15b   :  { %1317 = vrot.lane.b32.xlu1 %v5181_v5, %s4844_s19  ;;  %1031 = vrot.lane.b32.xlu0 %v5166_v0, %s4845_s20 }
 0x15f   :  { %962 = vrot.lane.b32.xlu1 %v5181_v5, %s4830_s16  ;;  %861 = vrot.lane.b32.xlu0 %v5166_v0, %s4846_s1 }
 0x163   :  { %857 = vrot.lane.b32.xlu1 %v5181_v5, %s4846_s1  ;;  %1027 = vrot.lane.b32.xlu0 %v5181_v5, %s4845_s20 }
 0x167   :  { %796 = vrot.lane.b32.xlu1 %v5166_v0, %s4847_s21  ;;  %731 = vrot.lane.b32.xlu0 %v5166_v0, %s4848_s22 }
 0x16b   :  { %792 = vrot.lane.b32.xlu1 %v5181_v5, %s4847_s21  ;;  %599 = vrot.lane.b32.xlu0 %v5166_v0, %s4849_s4 }
 0x16f   :  { %666 = vrot.lane.b32.xlu1 %v5166_v0, %s4837_s30  ;;  %1384 = vrot.lane.b32.xlu0 %v5216_v6, %s4842_s13 }
 0x173   :  { %662 = vrot.lane.b32.xlu1 %v5181_v5, %s4837_s30  ;;  %1449 = vrot.lane.b32.xlu0 %v5216_v6, %s4841_s12 }
 0x177   :  { %1388 = vrot.lane.b32.xlu1 %v5227_v7, %s4842_s13  ;;  %1453 = vrot.lane.b32.xlu0 %v5227_v7, %s4841_s12 }
 0x17b   :  { %968 = vrot.lane.b32.xlu1 %v5227_v7, %s4830_s16  ;;  %1254 = vrot.lane.b32.xlu0 %v5216_v6, %s4843_s18 }
 0x17f   :  { %1033 = vrot.lane.b32.xlu1 %v5227_v7, %s4845_s20  ;;  %1258 = vrot.lane.b32.xlu0 %v5227_v7, %s4843_s18 }
 0x182   :  { %v445_v8 = vpop.f32.mrf.mxu0  ;;  %v498_v9 = vpop.f32.mrf.mxu1 }
 0x183   :  { %1029 = vrot.lane.b32.xlu1 %v5216_v6, %s4845_s20  ;;  %1319 = vrot.lane.b32.xlu0 %v5216_v6, %s4844_s19  ;;  %v517_v10 = vsub.f32 0.0, %v445_v8  ;;  %v519_v11 = vsub.f32 0.0, %v498_v9  ;;  %v509_v12 = vmax.f32 %v445_v8, 0.0  ;;  %v511_v17 = vmax.f32 %v498_v9, 0.0 }
 0x184   :  { %v447_v13 = vpop.f32.mrf.mxu0  ;;  %v500_v14 = vpop.f32.mrf.mxu1  ;;  %v1410_v8 = vrot.slane %v5418_v2, %v5406_v62  ;;  %v1414_v9 = vrot.slane %v5420_v3, %v5406_v62 }
 0x185   :  { %v525_v15 = vmax.f32 %v517_v10, 0.0  ;;  %v518_v16 = vsub.f32 0.0, %v447_v13  ;;  %v527_v18 = vmax.f32 %v519_v11, 0.0  ;;  %v520_v20 = vsub.f32 0.0, %v500_v14 }
 0x186   :  { %v449_v19 = vpop.f32.mrf.mxu0  ;;  %v502_v21 = vpop.f32.mrf.mxu1  ;;  %v510_v23 = vmax.f32 %v447_v13, 0.0  ;;  %v512_v27 = vmax.f32 %v500_v14, 0.0  ;;  %v1475_v11 = vrot.slane %v5418_v2, %v5413_v63  ;;  %v5441_v14 = vld [vmem:[#allocation6 + $0x50] sm:$0xff] }
 0x187   :  { %v541_v22 = vrot.slane %v525_v15, 5  ;;  %v526_v24 = vmax.f32 %v518_v16, 0.0  ;;  %863 = vrot.lane.b32.xlu1 %v5227_v7, %s4846_s1  ;;  %1323 = vrot.lane.b32.xlu0 %v5227_v7, %s4844_s19  ;;  %v543_v25 = vrot.slane %v527_v18, 5  ;;  %v528_v28 = vmax.f32 %v520_v20, 0.0 }
 0x188   :  { %v450_v26 = vpop.f32.mrf.mxu0  ;;  %v503_v29 = vpop.f32.mrf.mxu1  ;;  %v1483_v21 = vrot.slane %v5441_v14, %v5413_v63 }
 0x189   :  { %v558_v30 = vsel %vm553_vm0, %v509_v12, %v541_v22  ;;  %v542_v31 = vrot.slane %v526_v24, 5  ;;  %v560_v32 = vsel %vm553_vm0, %v511_v17, %v543_v25  ;;  %v544_v33 = vrot.slane %v528_v28, 5 }
 0x18a   :  { %566 = vst [vmem:[%s9230_s8 + $0x20] sm:$0x3f] %v558_v30  ;;  %568 = vst [vmem:[%s9230_s8 + $0x30] sm:$0x3f] %v560_v32  ;;  %v5274_v36 = vsel %vm570_vm1, %v558_v30, 0.0  ;;  %v5301_v37 = vsel %vm570_vm1, %v560_v32, 0.0  ;;  %v1479_v12 = vrot.slane %v5420_v3, %v5413_v63  ;;  %v1418_v17 = vrot.slane %v5441_v14, %v5406_v62 }
 0x18b   :  { %v559_v34 = vsel %vm553_vm0, %v510_v23, %v542_v31  ;;  %733 = vrot.lane.b32.xlu1 %v5227_v7, %s4848_s22  ;;  %964 = vrot.lane.b32.xlu0 %v5216_v6, %s4830_s16  ;;  %v561_v35 = vsel %vm553_vm0, %v512_v27, %v544_v33  ;;  %9380 = vst [vmem:[#allocation14_spill] sm:$0xff] %v5301_v37 }
 0x18c   :  { %567 = vst [vmem:[%s9230_s8 + $0x28] sm:$0x3f] %v559_v34  ;;  %569 = vst [vmem:[%s9230_s8 + $0x38] sm:$0x3f] %v561_v35  ;;  %v5312_v38 = vsel %vm570_vm1, %v559_v34, 0.0  ;;  %v5355_v47 = vsel %vm570_vm1, %v561_v35, 0.0 }
 0x18d   :  { %9381 = vst [vmem:[#allocation15_spill] sm:$0xff] %v5312_v38  ;;  %9385 = vst [vmem:[#allocation19_spill] sm:$0xff] %v5355_v47 }
 0x18f   :  { %601 = vrot.lane.b32.xlu1 %v5227_v7, %s4849_s4  ;;  %859 = vrot.lane.b32.xlu0 %v5216_v6, %s4846_s1 }
 0x193   :  { %794 = vrot.lane.b32.xlu0 %v5216_v6, %s4847_s21  ;;  %1390 = vrot.lane.b32.xlu1 %v5274_v36, %s4842_s13 }
 0x197   :  { %798 = vrot.lane.b32.xlu0 %v5227_v7, %s4847_s21  ;;  %1455 = vrot.lane.b32.xlu1 %v5274_v36, %s4841_s12 }
 0x19b   :  { %729 = vrot.lane.b32.xlu0 %v5216_v6, %s4848_s22  ;;  %1260 = vrot.lane.b32.xlu1 %v5274_v36, %s4843_s18 }
 0x19f   :  { %664 = vrot.lane.b32.xlu0 %v5216_v6, %s4837_s30  ;;  %1325 = vrot.lane.b32.xlu1 %v5274_v36, %s4844_s19 }
 0x1a3   :  { %668 = vrot.lane.b32.xlu0 %v5227_v7, %s4837_s30  ;;  %800 = vrot.lane.b32.xlu1 %v5274_v36, %s4847_s21 }
 0x1a7   :  { %597 = vrot.lane.b32.xlu0 %v5216_v6, %s4849_s4  ;;  %670 = vrot.lane.b32.xlu1 %v5274_v36, %s4837_s30 }
 0x1ab   :  { %970 = vrot.lane.b32.xlu0 %v5274_v36, %s4830_s16  ;;  %1394 = vrot.lane.b32.xlu1 %v5301_v37, %s4842_s13 }
 0x1af   :  { %1035 = vrot.lane.b32.xlu0 %v5274_v36, %s4845_s20  ;;  %1264 = vrot.lane.b32.xlu1 %v5301_v37, %s4843_s18 }
 0x1b3   :  { %865 = vrot.lane.b32.xlu0 %v5274_v36, %s4846_s1  ;;  %972 = vrot.lane.b32.xlu1 %v5312_v38, %s4830_s16 }
 0x1b7   :  { %735 = vrot.lane.b32.xlu0 %v5274_v36, %s4848_s22  ;;  %1037 = vrot.lane.b32.xlu1 %v5312_v38, %s4845_s20 }
 0x1bb   :  { %603 = vrot.lane.b32.xlu0 %v5274_v36, %s4849_s4  ;;  %867 = vrot.lane.b32.xlu1 %v5312_v38, %s4846_s1 }
 0x1bd   :  { %v5326_v39 = vpop.permute.xlu1 %1451  ;;  %v5328_v40 = vpop.permute.xlu0 %1386 }
 0x1bf   :  { %1459 = vrot.lane.b32.xlu0 %v5301_v37, %s4841_s12  ;;  %737 = vrot.lane.b32.xlu1 %v5312_v38, %s4848_s22 }
 0x1c1   :  { %v5334_v41 = vpop.permute.xlu1 %1447  ;;  %v5336_v42 = vpop.permute.xlu0 %1382 }
 0x1c2   :  { %9382 = vst [vmem:[#allocation16_spill] sm:$0xff] %v5334_v41  ;;  %9383 = vst [vmem:[#allocation17_spill] sm:$0xff] %v5336_v42 }
 0x1c3   :  { %1329 = vrot.lane.b32.xlu0 %v5301_v37, %s4844_s19  ;;  %605 = vrot.lane.b32.xlu1 %v5312_v38, %s4849_s4 }
 0x1c5   :  { %v5342_v43 = vpop.permute.xlu1 %1256  ;;  %v5344_v44 = vpop.permute.xlu0 %1252 }
 0x1c6   :  { %9384 = vst [vmem:[#allocation18_spill] sm:$0xff] %v5344_v44 }
 0x1c7   :  { %974 = vrot.lane.b32.xlu0 %v5301_v37, %s4830_s16  ;;  %1457 = vrot.lane.b32.xlu1 %v5312_v38, %s4841_s12 }
 0x1c9   :  { %v5350_v45 = vpop.permute.xlu1 %1321  ;;  %v5352_v46 = vpop.permute.xlu0 %966 }
 0x1cb   :  { %1039 = vrot.lane.b32.xlu0 %v5301_v37, %s4845_s20  ;;  %1461 = vrot.lane.b32.xlu1 %v5355_v47, %s4841_s12 }
 0x1cd   :  { %v5363_v49 = vpop.permute.xlu1 %1317  ;;  %v5365_v50 = vpop.permute.xlu0 %1031 }
 0x1ce   :  { %9386 = vst [vmem:[#allocation20_spill] sm:$0xff] %v5363_v49 }
 0x1cf   :  { %869 = vrot.lane.b32.xlu0 %v5301_v37, %s4846_s1  ;;  %739 = vrot.lane.b32.xlu1 %v5301_v37, %s4848_s22 }
 0x1d1   :  { %v5373_v51 = vpop.permute.xlu1 %962  ;;  %v5375_v52 = vpop.permute.xlu0 %861 }
 0x1d2   :  { %9387 = vst [vmem:[#allocation21_spill] sm:$0xff] %v5373_v51 }
 0x1d3   :  { %1392 = vrot.lane.b32.xlu0 %v5312_v38, %s4842_s13  ;;  %607 = vrot.lane.b32.xlu1 %v5301_v37, %s4849_s4 }
 0x1d5   :  { %v5381_v53 = vpop.permute.xlu1 %857  ;;  %v5383_v54 = vpop.permute.xlu0 %1027 }
 0x1d6   :  { %9388 = vst [vmem:[#allocation22_spill] sm:$0xff] %v5381_v53  ;;  %9389 = vst [vmem:[#allocation23_spill] sm:$0xff] %v5383_v54 }
 0x1d7   :  { %1396 = vrot.lane.b32.xlu0 %v5355_v47, %s4842_s13  ;;  %1327 = vrot.lane.b32.xlu1 %v5312_v38, %s4844_s19 }
 0x1d9   :  { %v5389_v56 = vpop.permute.xlu1 %796  ;;  %v5391_v57 = vpop.permute.xlu0 %731 }
 0x1db   :  { %1262 = vrot.lane.b32.xlu0 %v5312_v38, %s4843_s18  ;;  %1331 = vrot.lane.b32.xlu1 %v5355_v47, %s4844_s19 }
 0x1dd   :  { %v5401_v60 = vpop.permute.xlu1 %792  ;;  %v5403_v61 = vpop.permute.xlu0 %599 }
 0x1de   :  { %9391 = vst [vmem:[#allocation25_spill] sm:$0xff] %v5401_v60 }
 0x1df   :  { %1266 = vrot.lane.b32.xlu0 %v5355_v47, %s4843_s18  ;;  %976 = vrot.lane.b32.xlu1 %v5355_v47, %s4830_s16 }
 0x1e1   :  { %v5416_v1 = vpop.permute.xlu1 %666  ;;  %v1385_v4 = vpop.permute.xlu0 %1384 }
 0x1e2   :  { %v1405_v10 = vsel %vm1398_vm2, %v5336_v42, %v1385_v4  ;;  %v1404_v13 = vsel %vm1398_vm2, %v1385_v4, %v5328_v40  ;;  %v5584_v42 = vld [vmem:[#allocation6 + $0x78] sm:$0xff] }
 0x1e3   :  { %727 = vrot.lane.b32.xlu0 %v5181_v5, %s4848_s22  ;;  %1041 = vrot.lane.b32.xlu1 %v5355_v47, %s4845_s20  ;;  %v1439_v18 = vmul.f32 %v1410_v8, %v1405_v10  ;;  %v1440_v22 = vmul.f32 %v1414_v9, %v1404_v13  ;;  %v5502_v9 = vsub.s32 5, %v5399_v59 }
 0x1e5   :  { %v5443_v15 = vpop.permute.xlu1 %662  ;;  %v1450_v16 = vpop.permute.xlu0 %1449  ;;  %9398 = vst [vmem:[#allocation32_spill] sm:$0xff] %v5502_v9  ;;  %v1353_v48 = vrot.slane %v5441_v14, %v5502_v9 }
 0x1e6   :  { %9394 = vst [vmem:[#allocation28_spill] sm:$0xff] %v5443_v15  ;;  %v1469_v19 = vsel %vm1463_vm3, %v1450_v16, %v5326_v39  ;;  %v1470_v20 = vsel %vm1463_vm3, %v5334_v41, %v1450_v16 }
 0x1e7   :  { %v1504_v23 = vmul.f32 %v1475_v11, %v1470_v20  ;;  %v1505_v24 = vmul.f32 %v1479_v12, %v1469_v19  ;;  %804 = vrot.lane.b32.xlu0 %v5301_v37, %s4847_s21  ;;  %871 = vrot.lane.b32.xlu1 %v5355_v47, %s4846_s1  ;;  %v5528_v19 = vsub.s32 0, %v5399_v59  ;;  %v5531_v20 = vsub.s32 1, %v5399_v59 }
 0x1e9   :  { %v1568_v25 = vpack.c.bf16 %v1504_v23, %v1439_v18  ;;  %v5459_v26 = vpop.permute.xlu1 %1388  ;;  %v5461_v27 = vpop.permute.xlu0 %1453  ;;  %v1569_v28 = vpack.c.bf16 %v1505_v24, %v1440_v22  ;;  %v1349_v18 = vrot.slane %v5420_v3, %v5502_v9  ;;  %9399 = vst [vmem:[#allocation33_spill] sm:$0xff] %v5528_v19  ;;  %9400 = vst [vmem:[#allocation34_spill] sm:$0xff] %v5531_v20 }
 0x1ea   :  { %v1403_v29 = vsel %vm1398_vm2, %v5328_v40, %v5459_v26  ;;  %v1468_v30 = vsel %vm1463_vm3, %v5326_v39, %v5461_v27  ;;  %v5484_v39 = vsub.s32 3, %v5399_v59  ;;  %v5487_v40 = vsub.s32 4, %v5399_v59 }
 0x1eb   :  { %v5471_v31 = vmul.f32 %v1418_v17, %v1403_v29  ;;  %v5473_v32 = vmul.f32 %v1483_v21, %v1468_v30  ;;  %1616 = vmatprep.subr.bf16.mxu0 %v1569_v28  ;;  %595 = vrot.lane.b32.xlu0 %v5181_v5, %s4849_s4  ;;  %v1345_v17 = vrot.slane %v5418_v2, %v5502_v9 }
 0x1ec   :  { %802 = vrot.lane.b32.xlu1 %v5312_v38, %s4847_s21  ;;  %1617 = vmatpush1.bf16.msra.mxu0 %v1568_v25  ;;  %9395 = vst [vmem:[#allocation29_spill] sm:$0xff] %v5484_v39  ;;  %9396 = vst [vmem:[#allocation30_spill] sm:$0xff] %v5487_v40  ;;  %v1280_v10 = vrot.slane %v5418_v2, %v5487_v40  ;;  %v1284_v11 = vrot.slane %v5420_v3, %v5487_v40 }
 0x1ed   :  { %v5481_v34 = vpop.permute.xlu1 %968  ;;  %v1255_v35 = vpop.permute.xlu0 %1254  ;;  %v1219_v12 = vrot.slane %v5420_v3, %v5484_v39  ;;  %v1179_v21 = vrot.slane %v5420_v3, %v5494_v55  ;;  %v1288_v25 = vrot.slane %v5441_v14, %v5487_v40 }
 0x1ee   :  { %v1274_v13 = vsel %vm1268_vm4, %v1255_v35, %v5342_v43  ;;  %v1275_v16 = vsel %vm1268_vm4, %v5344_v44, %v1255_v35  ;;  %v5554_v29 = vsel %vm978_vm5, %v5352_v46, %v5481_v34 }
 0x1ef   :  { %741 = vrot.lane.b32.xlu0 %v5355_v47, %s4848_s22  ;;  %9402 = vst [vmem:[#allocation36_spill] sm:$0xff] %v5554_v29  ;;  %v1309_v30 = vmul.f32 %v1280_v10, %v1275_v16  ;;  %v1310_v35 = vmul.f32 %v1284_v11, %v1274_v13  ;;  %v1215_v10 = vrot.slane %v5418_v2, %v5484_v39 }
 0x1f0   :  { %806 = vrot.lane.b32.xlu1 %v5355_v47, %s4847_s21  ;;  %v1099_v11 = vrot.slane %v5420_v3, %v5528_v19 }
 0x1f1   :  { %v5497_v4 = vpop.permute.xlu1 %1033  ;;  %v5499_v8 = vpop.permute.xlu0 %1258 }
 0x1f2   :  { %v5539_v22 = vsel %vm1043_vm6, %v5365_v50, %v5497_v4 }
 0x1f3   :  { %609 = vrot.lane.b32.xlu0 %v5355_v47, %s4849_s4  ;;  %9401 = vst [vmem:[#allocation35_spill] sm:$0xff] %v5539_v22  ;;  %v1245_v33 = vmul.f32 %v1219_v12, %v5539_v22  ;;  %v1139_v12 = vrot.slane %v5420_v3, %v5531_v20 }
 0x1f4   :  { %672 = vrot.lane.b32.xlu1 %v5312_v38, %s4837_s30 }
 0x1f5   :  { %v1030_v23 = vpop.permute.xlu1 %1029  ;;  %v1320_v24 = vpop.permute.xlu0 %1319 }
 0x1f6   :  { %v1339_v28 = vsel %vm1333_vm7, %v1320_v24, %v5350_v45  ;;  %v1340_v59 = vsel %vm1333_vm7, %v5363_v49, %v1320_v24  ;;  %v1273_v24 = vsel %vm1268_vm4, %v5342_v43, %v5499_v8  ;;  %v1205_v43 = vmul.f32 %v1179_v21, %v5554_v29  ;;  %v5596_v21 = vld [vmem:[#allocation6 + $0x8] sm:$0xff] }
 0x1f7   :  { %674 = vrot.lane.b32.xlu0 %v5301_v37, %s4837_s30  ;;  %v1374_v44 = vmul.f32 %v1345_v17, %v1340_v59  ;;  %v1375_v49 = vmul.f32 %v1349_v18, %v1339_v28  ;;  %v5582_v59 = vmul.f32 %v1288_v25, %v1273_v24  ;;  %v1050_v24 = vsel %vm1043_vm6, %v5383_v54, %v1030_v23 }
 0x1f8   :  { %676 = vrot.lane.b32.xlu1 %v5355_v47, %s4837_s30  ;;  %v1553_v25 = vpack.c.bf16 %v1245_v33, %v1205_v43  ;;  %v994_v43 = vrot.slane %v5596_v21, %v5406_v62  ;;  %v889_v37 = vrot.slane %v5596_v21, %v5487_v40 }
 0x1f9   :  { %v5571_v13 = vpop.permute.xlu1 %863  ;;  %v5573_v16 = vpop.permute.xlu0 %1323  ;;  %v1560_v17 = vpack.c.bf16 %v1374_v44, %v1309_v30  ;;  %v1561_v28 = vpack.c.bf16 %v1375_v49, %v1310_v35  ;;  %v1175_v44 = vrot.slane %v5418_v2, %v5494_v55  ;;  %v1049_v49 = vsel %vm1043_vm6, %v1030_v23, %v5365_v50  ;;  %v1581_v35 = vld [vmem:[%s9225_s3 + $0x8] sm:$0xff] }
 0x1fa   :  { %v1338_v18 = vsel %vm1333_vm7, %v5350_v45, %v5573_v16  ;;  %v5590_v41 = vsel %vm873_vm8, %v5375_v52, %v5571_v13  ;;  %v1243_v45 = vrot.slane %v5584_v42, %v5484_v39  ;;  %v1203_v30 = vrot.slane %v5584_v42, %v5494_v55 }
 0x1fb   :  { %9403 = vst [vmem:[#allocation37_spill] sm:$0xff] %v5590_v41  ;;  %v5592_v3 = vmul.f32 %v1353_v48, %v1338_v18  ;;  %1618 = vmatprep.subr.bf16.mxu0 %v1561_v28  ;;  %v1580_v48 = vld [vmem:[%s9225_s3] sm:$0xff]  ;;  %v1125_v28 = vmul.f32 %v1099_v11, %v5590_v41  ;;  %v1244_v50 = vmul.f32 %v1215_v10, %v1049_v49 }
 0x1fc   :  { %1619 = vmatpush1.bf16.msra.mxu0 %v1560_v17  ;;  %1586 = vperm.xlu0 %4515, %v1580_v48   ;;  %v1583_v17 = vld [vmem:[%s9225_s3 + $0x18] sm:$0xff]  ;;  %v1095_v48 = vrot.slane %v5418_v2, %v5528_v19  ;;  %v1135_v11 = vrot.slane %v5418_v2, %v5531_v20  ;;  %v1165_v10 = vmul.f32 %v1139_v12, %v5166_v0 }
 0x1fd   :  { %v5616_v33 = vpop.permute.xlu1 %733  ;;  %v965_v18 = vpop.permute.xlu0 %964  ;;  %1620 = vmatprep.subr.bf16.mxu0 %v1553_v25  ;;  %1591 = vperm.xlu1 %4516, %v1581_v35   ;;  %v5637_v25 = vld [vmem:[#allocation6] sm:$0xff]  ;;  %v1059_v35 = vrot.slane %v5596_v21, %v5413_v63 }
 0x1fe   :  { %v984_v47 = vsel %vm978_vm5, %v965_v18, %v5352_v46  ;;  %v985_v23 = vsel %vm978_vm5, %v5373_v51, %v965_v18  ;;  %v1582_v46 = vld [vmem:[%s9225_s3 + $0x10] sm:$0xff]  ;;  %v5641_v18 = vmul.f32 %v1243_v45, %v1050_v24  ;;  %v1164_v0 = vmul.f32 %v1135_v11, %v5216_v6  ;;  %s6617_s3 = smov 2139095040  }
 0x1ff   :  { %v1204_v54 = vmul.f32 %v1175_v44, %v984_v47  ;;  %v5643_v51 = vmul.f32 %v1203_v30, %v985_v23  ;;  %v990_v44 = vrot.slane %v5637_v25, %v5406_v62  ;;  %v1020_v29 = vmul.f32 %v994_v43, %v984_v47 }
 0x200   :  { %9404 = vst [vmem:[#allocation38_spill] sm:$0xff] %v5641_v18  ;;  %1601 = vperm.xlu0 %4515, %v1583_v17   ;;  %v1545_v30 = vpack.c.bf16 %v1165_v10, %v1125_v28  ;;  %v1085_v22 = vmul.f32 %v1059_v35, %v1049_v49  ;;  %v925_v47 = vrot.slane %v5637_v25, %v5502_v9  ;;  %v5677_v35 = vld [vmem:[#allocation6 + $0x58] sm:$0xff] }
 0x201   :  { %9405 = vst [vmem:[#allocation39_spill] sm:$0xff] %v5643_v51  ;;  %v1552_v38 = vpack.c.bf16 %v1244_v50, %v1204_v54  ;;  %v5648_v2 = vpop.permute.xlu1 %601  ;;  %v860_v41 = vpop.permute.xlu0 %859  ;;  %1596 = vperm.xlu1 %4516, %v1582_v46   ;;  %v1055_v54 = vrot.slane %v5637_v25, %v5413_v63  ;;  %v1019_v43 = vmul.f32 %v990_v44, %v985_v23  ;;  %v5856_v51 = vld [vmem:[#allocation6 + $0x60] sm:$0xff] }
 0x202   :  { %v879_v45 = vsel %vm873_vm8, %v860_v41, %v5375_v52  ;;  %v929_v52 = vrot.slane %v5596_v21, %v5502_v9  ;;  %v885_v28 = vrot.slane %v5637_v25, %v5487_v40  ;;  %v824_v46 = vrot.slane %v5596_v21, %v5484_v39 }
 0x203   :  { %v1124_v50 = vmul.f32 %v1095_v48, %v879_v45  ;;  %1621 = vmatpush1.bf16.msra.mxu0 %v1552_v38  ;;  %v5673_v38 = vsel %vm873_vm8, %v5381_v53, %v860_v41  ;;  %v915_v49 = vmul.f32 %v889_v37, %v879_v45  ;;  %v1537_v10 = vpack.c.bf16 %v1085_v22, %v1020_v29  ;;  %v5854_v53 = vld [vmem:[#allocation6 + $0x28] sm:$0xff] }
 0x204   :  { %1622 = vmatprep.subr.bf16.mxu0 %v1545_v30  ;;  %9406 = vst [vmem:[#allocation40_spill] sm:$0xff] %v5673_v38  ;;  %v1084_v23 = vmul.f32 %v1055_v54, %v1050_v24  ;;  %v1422_v44 = vrot.slane %v5677_v35, %v5406_v62  ;;  %v1487_v41 = vrot.slane %v5677_v35, %v5413_v63 }
 0x205   :  { %v1544_v17 = vpack.c.bf16 %v1164_v0, %v1124_v50  ;;  %v795_v48 = vpop.permute.xlu0 %794  ;;  %v5668_v11 = vpop.permute.xlu1 %1390  ;;  %v759_v37 = vrot.slane %v5596_v21, %v5494_v55  ;;  %v955_v29 = vmul.f32 %v929_v52, %v5216_v6  ;;  %v748_v24 = vsel %vm743_vm10, %v5391_v57, %v5616_v33 }
 0x206   :  { %v814_v0 = vsel %vm808_vm9, %v795_v48, %v5389_v56  ;;  %v1402_v22 = vsel %vm1398_vm2, %v5459_v26, %v5668_v11  ;;  %v1536_v45 = vpack.c.bf16 %v1084_v23, %v1019_v43  ;;  %v914_v30 = vmul.f32 %v885_v28, %v5673_v38  ;;  %v9423_v38 = vld [vmem:[#allocation35_spill] sm:$0xff] }
 0x207   :  { %1623 = vmatpush1.bf16.msra.mxu0 %v1544_v17  ;;  %v954_v17 = vmul.f32 %v925_v47, %v5181_v5  ;;  %v850_v12 = vmul.f32 %v824_v46, %v814_v0  ;;  %v1529_v26 = vpack.c.bf16 %v955_v29, %v915_v49  ;;  %v820_v52 = vrot.slane %v5637_v25, %v5484_v39 }
 0x208   :  { %1624 = vmatprep.subr.bf16.mxu0 %v1537_v10  ;;  %v1442_v10 = vmul.f32 %v1422_v44, %v1402_v22  ;;  %v755_v28 = vrot.slane %v5637_v25, %v5494_v55  ;;  %v785_v23 = vmul.f32 %v759_v37, %v748_v24  ;;  %v815_v47 = vsel %vm808_vm9, %v5401_v60, %v795_v48 }
 0x209   :  { %v5698_v54 = vpop.permute.xlu0 %798  ;;  %v5700_v50 = vpop.permute.xlu1 %1455  ;;  %v1528_v49 = vpack.c.bf16 %v954_v17, %v914_v30  ;;  %v1292_v48 = vrot.slane %v5677_v35, %v5487_v40  ;;  %v694_v22 = vrot.slane %v5596_v21, %v5531_v20  ;;  %v849_v29 = vmul.f32 %v820_v52, %v815_v47 }
 0x20a   :  { %v1467_v6 = vsel %vm1463_vm3, %v5461_v27, %v5700_v50  ;;  %v629_v27 = vrot.slane %v5596_v21, %v5528_v19  ;;  %v1521_v37 = vpack.c.bf16 %v850_v12, %v785_v23  ;;  %v9409_v21 = vpack.c.bf16 %v5473_v32, %v5471_v31 }
 0x20b   :  { %v1507_v43 = vmul.f32 %v1487_v41, %v1467_v6  ;;  %1625 = vmatpush1.bf16.msra.mxu0 %v1536_v45  ;;  %v1357_v45 = vrot.slane %v5677_v35, %v5502_v9 }
 0x20c   :  { %1626 = vmatprep.subr.bf16.mxu0 %v1529_v26 }
 0x20d   :  { %v5717_v46 = vpop.permute.xlu0 %729  ;;  %v5719_v0 = vpop.permute.xlu1 %1260  ;;  %v1571_v44 = vpack.c.bf16 %v1507_v43, %v1442_v10 }
 0x20e   :  { %9407 = vst [vmem:[#allocation41_spill] sm:$0xff] %v5717_v46  ;;  %9408 = vst [vmem:[#allocation42_spill] sm:$0xff] %v5719_v0  ;;  %v749_v41 = vsel %vm743_vm10, %v5717_v46, %v5391_v57  ;;  %v618_v57 = vsel %vm613_vm11, %v5403_v61, %v5648_v2  ;;  %v1272_v12 = vsel %vm1268_vm4, %v5499_v8, %v5719_v0 }
 0x20f   :  { %v784_v24 = vmul.f32 %v755_v28, %v749_v41  ;;  %1627 = vmatpush1.bf16.msra.mxu0 %v1528_v49  ;;  %1669 = vmatprep.subr.bf16.mxu1 %v1571_v44  ;;  %v655_v10 = vmul.f32 %v629_v27, %v618_v57  ;;  %v1312_v8 = vmul.f32 %v1292_v48, %v1272_v12  ;;  %v5776_v57 = vld [vmem:[#allocation4] sm:$0xff]   ;;  %v9414_v12 = vmov 0  }
 0x210   :  { %1628 = vmatprep.subr.bf16.mxu0 %v1521_v37  ;;  %1670 = vmatpush1.bf16.msra.mxu1 %v9409_v21  ;;  %v690_v49 = vrot.slane %v5637_v25, %v5531_v20  ;;  %v625_v44 = vrot.slane %v5637_v25, %v5528_v19  ;;  %v9411_v27 = vpack.c.bf16 %v5592_v3, %v5582_v59 }
 0x211   :  { %v1520_v30 = vpack.c.bf16 %v849_v29, %v784_v24  ;;  %v665_v17 = vpop.permute.xlu0 %664  ;;  %v5743_v6 = vpop.permute.xlu1 %1325 }
 0x212   :  { %9410 = vst [vmem:[#allocation43_spill] sm:$0xff] %v5743_v6  ;;  %v684_v26 = vsel %vm678_vm12, %v665_v17, %v5416_v1  ;;  %v1337_v52 = vsel %vm1333_vm7, %v5573_v16, %v5743_v6  ;;  %v685_v16 = vsel %vm678_vm12, %v5443_v15, %v665_v17  ;;  %v5786_v17 = vld [vmem:[#allocation4 + $0x8] sm:$0xff]  }
 0x213   :  { %v720_v43 = vmul.f32 %v694_v22, %v684_v26  ;;  %v1377_v28 = vmul.f32 %v1357_v45, %v1337_v52  ;;  %1629 = vmatpush1.bf16.msra.mxu0 %v1520_v30  ;;  %v719_v22 = vmul.f32 %v690_v49, %v685_v16  ;;  %9416 = vst [vmem:[#allocation47_spill] sm:$0xff] %v5786_v17  ;;  %v9424_v6 = vld [vmem:[#allocation36_spill] sm:$0xff] }
 0x214   :  { %v1187_v52 = vrot.slane %v5677_v35, %v5494_v55  ;;  %v1147_v49 = vrot.slane %v5677_v35, %v5531_v20 }
 0x215   :  { %v5752_v31 = vpop.permute.xlu0 %668  ;;  %v5754_v32 = vpop.permute.xlu1 %800  ;;  %v1513_v23 = vpack.c.bf16 %v720_v43, %v655_v10  ;;  %v1563_v47 = vpack.c.bf16 %v1377_v28, %v1312_v8  ;;  %v1227_v10 = vrot.slane %v5677_v35, %v5484_v39  ;;  %v1183_v8 = vrot.slane %v5441_v14, %v5494_v55  ;;  %v5802_v28 = vld [vmem:[#allocation6 + $0x18] sm:$0xff] }
 0x216   :  { %v1067_v16 = vrot.slane %v5802_v28, %v5413_v63 }
 0x217   :  { %1630 = vmatprep.subr.bf16.mxu0 %v1513_v23  ;;  %1671 = vmatprep.subr.bf16.mxu1 %v1563_v47 }
 0x218   :  { %1672 = vmatpush1.bf16.msra.mxu1 %v9411_v27 }
 0x219   :  { %v5766_v41 = vpop.permute.xlu0 %597  ;;  %v5768_v48 = vpop.permute.xlu1 %670 }
 0x21a   :  { %9412 = vst [vmem:[#allocation44_spill] sm:$0xff] %v5766_v41  ;;  %v619_v37 = vsel %vm613_vm11, %v5766_v41, %v5403_v61  ;;  %v1223_v61 = vrot.slane %v5441_v14, %v5484_v39  ;;  %v1002_v41 = vrot.slane %v5802_v28, %v5406_v62 }
 0x21b   :  { %v654_v29 = vmul.f32 %v625_v44, %v619_v37  ;;  %v5813_v44 = vld [vmem:[#allocation6 + $0x10] sm:$0xff]  ;;  %v1103_v37 = vrot.slane %v5441_v14, %v5528_v19 }
 0x21c   :  { %v933_v15 = vrot.slane %v5813_v44, %v5502_v9 }
 0x21d   :  { %v1512_v25 = vpack.c.bf16 %v719_v22, %v654_v29  ;;  %v971_v24 = vpop.permute.xlu0 %970  ;;  %v5774_v45 = vpop.permute.xlu1 %1394 }
 0x21f   :  { %1631 = vmatpush1.bf16.msra.mxu0 %v1512_v25 }
 0x221   :  { %v1036_v59 = vpop.permute.xlu0 %1035  ;;  %v5778_v3 = vpop.permute.xlu1 %1264 }
 0x222   :  { %9413 = vst [vmem:[#allocation45_spill] sm:$0xff] %v5778_v3  ;;  %1649 = vmatmul.mubr.bf16.vlgmr.msra.gmra.mxu0 %v5776_v57  ;;  %v1047_v26 = vsel %vm1043_vm6, %v5497_v4, %v1036_v59  ;;  %v982_v4 = vsel %vm978_vm5, %v5481_v34, %v971_v24 }
 0x223   :  { %1658 = vmatprep.mubr.bf16.mxu0 %v9414_v12  ;;  %v1246_v27 = vmul.f32 %v1223_v61, %v1047_v26  ;;  %v1206_v61 = vmul.f32 %v1183_v8, %v982_v4  ;;  %v1063_v8 = vrot.slane %v5813_v44, %v5413_v63  ;;  %v1087_v18 = vmul.f32 %v1067_v16, %v1047_v26  ;;  %v5871_v16 = vld [vmem:[#allocation6 + $0x70] sm:$0xff] }
 0x224   :  { %v937_v26 = vrot.slane %v5802_v28, %v5502_v9  ;;  %v1159_v3 = vrot.slane %v5871_v16, %v5531_v20 }
 0x225   :  { %v866_v21 = vpop.permute.xlu0 %865  ;;  %v5782_v30 = vpop.permute.xlu1 %972 }
 0x226   :  { %9415 = vst [vmem:[#allocation46_spill] sm:$0xff] %v5782_v30  ;;  %v5800_v43 = vsel %vm978_vm5, %v971_v24, %v5782_v30  ;;  %v877_v22 = vsel %vm873_vm8, %v5571_v13, %v866_v21  ;;  %v1107_v24 = vrot.slane %v5677_v35, %v5528_v19  ;;  %v5839_v13 = vld [vmem:[#allocation6 + $0x20] sm:$0xff]  ;;  %v1163_v35 = vrot.slane %v5584_v42, %v5531_v20  ;;  %v5881_v30 = vld [vmem:[#allocation6 + $0x38] sm:$0xff] }
 0x227   :  { %9417 = vst [vmem:[#allocation48_spill] sm:$0xff] %v5800_v43  ;;  %v1207_v29 = vmul.f32 %v1187_v52, %v5800_v43  ;;  %v1126_v46 = vmul.f32 %v1103_v37, %v877_v22  ;;  %v998_v37 = vrot.slane %v5813_v44, %v5406_v62 }
 0x229   :  { %v5807_v23 = vpop.permute.xlu0 %735  ;;  %v5809_v47 = vpop.permute.xlu1 %1037 }
 0x22a   :  { %9418 = vst [vmem:[#allocation49_spill] sm:$0xff] %v5809_v47  ;;  %v5822_v34 = vsel %vm1043_vm6, %v1036_v59, %v5809_v47  ;;  %1659 = vmatmul.mubr.bf16.gmra.mxu0 %v5786_v17  ;;  %v1143_v59 = vrot.slane %v5441_v14, %v5531_v20  ;;  %v1554_v14 = vpack.c.bf16 %v1246_v27, %v1206_v61  ;;  %v5862_v27 = vld [vmem:[#allocation6 + $0x30] sm:$0xff] }
 0x22b   :  { %9419 = vst [vmem:[#allocation50_spill] sm:$0xff] %v5822_v34  ;;  %v1247_v25 = vmul.f32 %v1227_v10, %v5822_v34  ;;  %1754 = vmatprep.mubr.bf16.mxu0 %v9414_v12  ;;  %v1167_v34 = vmul.f32 %v1147_v49, %v5274_v36  ;;  %v941_v61 = vrot.slane %v5839_v13, %v5502_v9 }
 0x22c   :  { %v1086_v47 = vmul.f32 %v1063_v8, %v9423_v38  ;;  %v949_v17 = vrot.slane %v5862_v27, %v5502_v9  ;;  %v1021_v12 = vmul.f32 %v998_v37, %v9424_v6  ;;  %v9425_v8 = vld [vmem:[#allocation13_spill] sm:$0xff]  ;;  %v957_v37 = vmul.f32 %v937_v26, %v5227_v7 }
 0x22d   :  { %v5841_v52 = vpop.permute.xlu0 %603  ;;  %v5843_v10 = vpop.permute.xlu1 %867  ;;  %v1555_v60 = vpack.c.bf16 %v1247_v25, %v1207_v29  ;;  %v897_v29 = vrot.slane %v5802_v28, %v5487_v40  ;;  %v5932_v26 = vmul.f32 %v941_v61, %v5274_v36  ;;  %v9427_v61 = vld [vmem:[#allocation14_spill] sm:$0xff] }
 0x22e   :  { %9420 = vst [vmem:[#allocation51_spill] sm:$0xff] %v5843_v10  ;;  %v5852_v43 = vsel %vm873_vm8, %v866_v21, %v5843_v10  ;;  %v1166_v21 = vmul.f32 %v1143_v59, %v5227_v7  ;;  %v5877_v10 = vld [vmem:[#allocation6 + $0x68] sm:$0xff]  ;;  %v1151_v59 = vrot.slane %v5856_v51, %v5531_v20 }
 0x22f   :  { %9421 = vst [vmem:[#allocation52_spill] sm:$0xff] %v5852_v43  ;;  %v1127_v25 = vmul.f32 %v1107_v24, %v5852_v43  ;;  %1673 = vmatprep.subr.bf16.mxu1 %v1555_v60  ;;  %v1022_v24 = vmul.f32 %v1002_v41, %v982_v4  ;;  %v893_v41 = vrot.slane %v5813_v44, %v5487_v40 }
 0x230   :  { %1674 = vmatpush1.bf16.msra.mxu1 %v1554_v14  ;;  %v945_v14 = vrot.slane %v5854_v53, %v5502_v9  ;;  %v1546_v4 = vpack.c.bf16 %v1166_v21, %v1126_v46  ;;  %v1155_v46 = vrot.slane %v5877_v10, %v5531_v20  ;;  %v5912_v21 = vmul.f32 %v1163_v35, %v5181_v5 }
 0x231   :  { %v5873_v60 = vpop.permute.xlu0 %1459  ;;  %v5875_v49 = vpop.permute.xlu1 %737  ;;  %v1547_v43 = vpack.c.bf16 %v1167_v34, %v1127_v25  ;;  %v917_v34 = vmul.f32 %v897_v29, %v877_v22  ;;  %v767_v25 = vrot.slane %v5802_v28, %v5494_v55  ;;  %v1539_v0 = vpack.c.bf16 %v1087_v18, %v1022_v24 }
 0x232   :  { %9422 = vst [vmem:[#allocation53_spill] sm:$0xff] %v5875_v49  ;;  %v746_v38 = vsel %vm743_vm10, %v5807_v23, %v5875_v49  ;;  %v953_v22 = vrot.slane %v5881_v30, %v5502_v9  ;;  %v832_v18 = vrot.slane %v5802_v28, %v5484_v39  ;;  %v1538_v24 = vpack.c.bf16 %v1086_v47, %v1021_v12 }
 0x233   :  { %1675 = vmatprep.subr.bf16.mxu1 %v1547_v43  ;;  %v956_v43 = vmul.f32 %v933_v15, %v9425_v8  ;;  %v812_v15 = vsel %vm808_vm9, %v5698_v54, %v5754_v32  ;;  %v763_v8 = vrot.slane %v5813_v44, %v5494_v55  ;;  %v787_v7 = vmul.f32 %v767_v25, %v746_v38 }
 0x234   :  { %1676 = vmatpush1.bf16.msra.mxu1 %v1546_v4  ;;  %v9426_v4 = vld [vmem:[#allocation37_spill] sm:$0xff]  ;;  %v637_v5 = vrot.slane %v5802_v28, %v5528_v19  ;;  %v1531_v12 = vpack.c.bf16 %v957_v37, %v917_v34  ;;  %v828_v35 = vrot.slane %v5813_v44, %v5484_v39  ;;  %v702_v34 = vrot.slane %v5802_v28, %v5531_v20 }
 0x235   :  { %v5906_v29 = vpop.permute.xlu0 %1329  ;;  %1677 = vmatprep.subr.bf16.mxu1 %v1539_v0  ;;  %v5908_v6 = vpop.permute.xlu1 %605  ;;  %v916_v49 = vmul.f32 %v893_v41, %v9426_v4  ;;  %v747_v0 = vsel %vm743_vm10, %v5616_v33, %v5807_v23  ;;  %v813_v33 = vsel %vm808_vm9, %v5389_v56, %v5698_v54  ;;  %v852_v23 = vmul.f32 %v832_v18, %v812_v15  ;;  %v9428_v15 = vld [vmem:[#allocation15_spill] sm:$0xff] }
 0x236   :  { %v616_v41 = vsel %vm613_vm11, %v5841_v52, %v5908_v6  ;;  %v5947_v38 = vmul.f32 %v949_v17, %v9427_v61  ;;  %v786_v4 = vmul.f32 %v763_v8, %v747_v0  ;;  %v633_v56 = vrot.slane %v5813_v44, %v5528_v19 }
 0x237   :  { %v1530_v37 = vpack.c.bf16 %v956_v43, %v916_v49  ;;  %v617_v54 = vsel %vm613_vm11, %v5648_v2, %v5841_v52  ;;  %v657_v28 = vmul.f32 %v637_v5, %v616_v41  ;;  %v1523_v18 = vpack.c.bf16 %v852_v23, %v787_v7  ;;  %v9429_v5 = vld [vmem:[#allocation19_spill] sm:$0xff] }
 0x238   :  { %1678 = vmatpush1.bf16.msra.mxu1 %v1538_v24  ;;  %v682_v24 = vsel %vm678_vm12, %v5752_v31, %v5768_v48  ;;  %v5960_v17 = vmul.f32 %v1151_v59, %v9428_v15  ;;  %v851_v49 = vmul.f32 %v828_v35, %v813_v33  ;;  %v698_v43 = vrot.slane %v5813_v44, %v5531_v20 }
 0x239   :  { %v5944_v25 = vpop.permute.xlu0 %974  ;;  %1679 = vmatprep.subr.bf16.mxu1 %v1531_v12  ;;  %v1458_v36 = vpop.permute.xlu1 %1457  ;;  %v5965_v8 = vmul.f32 %v1155_v46, %v9427_v61  ;;  %v5968_v0 = vmul.f32 %v945_v14, %v9428_v15  ;;  %v683_v2 = vsel %vm678_vm12, %v5416_v1, %v5752_v31  ;;  %v722_v52 = vmul.f32 %v702_v34, %v682_v24  ;;  %v9430_v1 = vld [vmem:[#allocation16_spill] sm:$0xff] }
 0x23a   :  { %v5977_v12 = vmul.f32 %v1159_v3, %v9429_v5  ;;  %v5980_v44 = vmul.f32 %v953_v22, %v9429_v5  ;;  %v1522_v46 = vpack.c.bf16 %v851_v49, %v786_v4  ;;  %v656_v41 = vmul.f32 %v633_v56, %v617_v54 }
 0x23b   :  { %v1515_v33 = vpack.c.bf16 %v722_v52, %v657_v28  ;;  %v721_v22 = vmul.f32 %v698_v43, %v683_v2  ;;  %v1491_v23 = vrot.slane %v5856_v51, %v5413_v63  ;;  %v1495_v34 = vrot.slane %v5877_v10, %v5413_v63 }
 0x23c   :  { %1680 = vmatpush1.bf16.msra.mxu1 %v1530_v37  ;;  %v1499_v24 = vrot.slane %v5871_v16, %v5413_v63  ;;  %v1503_v4 = vrot.slane %v5584_v42, %v5413_v63  ;;  %v1426_v43 = vrot.slane %v5856_v51, %v5406_v62  ;;  %v1430_v2 = vrot.slane %v5877_v10, %v5406_v62 }
 0x23d   :  { %v5974_v7 = vpop.permute.xlu0 %1039  ;;  %1681 = vmatprep.subr.bf16.mxu1 %v1523_v18  ;;  %v1462_v59 = vpop.permute.xlu1 %1461  ;;  %v1514_v18 = vpack.c.bf16 %v721_v22, %v656_v41  ;;  %v1434_v5 = vrot.slane %v5871_v16, %v5406_v62  ;;  %v1465_v41 = vsel %vm1463_vm3, %v1458_v36, %v5873_v60  ;;  %v1361_v22 = vrot.slane %v5856_v51, %v5502_v9 }
 0x23e   :  { %v1365_v52 = vrot.slane %v5877_v10, %v5502_v9  ;;  %v1296_v56 = vrot.slane %v5856_v51, %v5487_v40  ;;  %v1300_v31 = vrot.slane %v5877_v10, %v5487_v40  ;;  %v1304_v61 = vrot.slane %v5871_v16, %v5487_v40 }
 0x23f   :  { %v1509_v3 = vmul.f32 %v1495_v34, %v1465_v41 }
 0x240   :  { %1682 = vmatpush1.bf16.msra.mxu1 %v1522_v46  ;;  %v1438_v46 = vrot.slane %v5584_v42, %v5406_v62 }
 0x241   :  { %v6006_v54 = vpop.permute.xlu0 %869  ;;  %1683 = vmatprep.subr.bf16.mxu1 %v1515_v33  ;;  %v6008_v28 = vpop.permute.xlu1 %739  ;;  %v1466_v33 = vsel %vm1463_vm3, %v5700_v50, %v1458_v36  ;;  %v1464_v50 = vsel %vm1463_vm3, %v5873_v60, %v1462_v59 }
 0x242   :  { %v1508_v35 = vmul.f32 %v1491_v23, %v1466_v33  ;;  %v9431_v23 = vmov 0   ;;  %v1195_v33 = vrot.slane %v5877_v10, %v5494_v55 }
 0x244   :  { %1684 = vmatpush1.bf16.msra.mxu1 %v1514_v18 }
 0x245   :  { %v1393_v49 = vpop.permute.xlu0 %1392  ;;  %v6034_v14 = vpop.permute.xlu1 %607 }
 0x246   :  { %v1400_v36 = vsel %vm1398_vm2, %v1393_v49, %v5774_v45  ;;  %v1401_v18 = vsel %vm1398_vm2, %v5668_v11, %v1393_v49  ;;  %v1471_v11 = vsel %vm1463_vm3, %v1462_v59, %v9430_v1  ;;  %v9432_v1 = vld [vmem:[#allocation17_spill] sm:$0xff] }
 0x247   :  { %v1443_v37 = vmul.f32 %v1426_v43, %v1401_v18  ;;  %v1444_v47 = vmul.f32 %v1430_v2, %v1400_v36  ;;  %1702 = vmatmul.mubr.bf16.vlgmr.msra.gmra.mxu1 %v5776_v57 }
 0x248   :  { %1711 = vmatprep.mubr.bf16.mxu1 %v9431_v23 }
 0x249   :  { %v1572_v34 = vpack.c.bf16 %v1508_v35, %v1443_v37  ;;  %v1397_v43 = vpop.permute.xlu0 %1396  ;;  %v1328_v2 = vpop.permute.xlu1 %1327  ;;  %v1573_v41 = vpack.c.bf16 %v1509_v3, %v1444_v47  ;;  %v1510_v3 = vmul.f32 %v1499_v24, %v1464_v50  ;;  %v1511_v37 = vmul.f32 %v1503_v4, %v1471_v11  ;;  %v9436_v11 = vld [vmem:[#allocation20_spill] sm:$0xff] }
 0x24a   :  { %v1399_v59 = vsel %vm1398_vm2, %v5774_v45, %v1397_v43  ;;  %v1406_v36 = vsel %vm1398_vm2, %v1397_v43, %v9432_v1  ;;  %v1335_v15 = vsel %vm1333_vm7, %v1328_v2, %v5906_v29  ;;  %v9433_v45 = vld [vmem:[#allocation43_spill] sm:$0xff]  ;;  %v1083_v43 = vrot.slane %v5881_v30, %v5413_v63 }
 0x24b   :  { %v1445_v18 = vmul.f32 %v1434_v5, %v1399_v59  ;;  %v1446_v49 = vmul.f32 %v1438_v46, %v1406_v36  ;;  %1722 = vmatprep.subr.bf16.mxu0 %v1573_v41  ;;  %v1336_v60 = vsel %vm1333_vm7, %v9433_v45, %v1328_v2  ;;  %v1235_v1 = vrot.slane %v5877_v10, %v5484_v39  ;;  %v9434_v41 = vld [vmem:[#allocation45_spill] sm:$0xff]  ;;  %v9435_v2 = vld [vmem:[#allocation42_spill] sm:$0xff] }
 0x24c   :  { %1723 = vmatpush1.bf16.msra.mxu0 %v1572_v34  ;;  %v1239_v50 = vrot.slane %v5871_v16, %v5484_v39 }
 0x24d   :  { %v1574_v24 = vpack.c.bf16 %v1510_v3, %v1445_v18  ;;  %v1263_v4 = vpop.permute.xlu0 %1262  ;;  %v1332_v5 = vpop.permute.xlu1 %1331  ;;  %v1575_v46 = vpack.c.bf16 %v1511_v37, %v1446_v49  ;;  %v1378_v3 = vmul.f32 %v1361_v22, %v1336_v60  ;;  %v1379_v37 = vmul.f32 %v1365_v52, %v1335_v15  ;;  %v9437_v60 = vld [vmem:[#allocation47_spill] sm:$0xff] }
 0x24e   :  { %v1270_v34 = vsel %vm1268_vm4, %v1263_v4, %v9434_v41  ;;  %v1271_v59 = vsel %vm1268_vm4, %v9435_v2, %v1263_v4  ;;  %v1334_v35 = vsel %vm1333_vm7, %v5906_v29, %v1332_v5  ;;  %v1341_v47 = vsel %vm1333_vm7, %v1332_v5, %v9436_v11  ;;  %v9439_v11 = vld [vmem:[#allocation18_spill] sm:$0xff] }
 0x24f   :  { %v1313_v18 = vmul.f32 %v1296_v56, %v1271_v59  ;;  %v1314_v45 = vmul.f32 %v1300_v31, %v1270_v34  ;;  %1775 = vmatprep.subr.bf16.mxu1 %v1575_v46  ;;  %v1119_v4 = vrot.slane %v5871_v16, %v5528_v19  ;;  %1712 = vmatmul.mubr.bf16.gmra.mxu1 %v9437_v60  ;;  %v9452_v29 = vld [vmem:[#allocation50_spill] sm:$0xff]  ;;  %v9455_v59 = vld [vmem:[#allocation39_spill] sm:$0xff] }
 0x250   :  { %1776 = vmatpush1.bf16.msra.mxu1 %v1574_v24  ;;  %v9438_v24 = vld [vmem:[#allocation49_spill] sm:$0xff]  ;;  %1807 = vmatprep.mubr.bf16.mxu1 %v9431_v23  ;;  %v9444_v2 = vrot.slane %v5584_v42, %v5528_v19 }
 0x251   :  { %v1564_v22 = vpack.c.bf16 %v1378_v3, %v1313_v18  ;;  %v1267_v15 = vpop.permute.xlu0 %1266  ;;  %v977_v56 = vpop.permute.xlu1 %976  ;;  %v1565_v31 = vpack.c.bf16 %v1379_v37, %v1314_v45  ;;  %v1045_v5 = vsel %vm1043_vm6, %v9438_v24, %v5974_v7  ;;  %v9440_v3 = vrot.slane %v5871_v16, %v5502_v9 }
 0x252   :  { %v1269_v46 = vsel %vm1268_vm4, %v9434_v41, %v1267_v15  ;;  %v1276_v34 = vsel %vm1268_vm4, %v1267_v15, %v9439_v11  ;;  %v9441_v18 = vrot.slane %v5584_v42, %v5502_v9  ;;  %v9442_v15 = vrot.slane %v5584_v42, %v5487_v40  ;;  %v9443_v11 = vld [vmem:[#allocation40_spill] sm:$0xff]  ;;  %v9447_v42 = vld [vmem:[#allocation21_spill] sm:$0xff] }
 0x253   :  { %v1380_v37 = vmul.f32 %v9440_v3, %v1334_v35  ;;  %v1315_v41 = vmul.f32 %v1304_v61, %v1269_v46  ;;  %1724 = vmatprep.subr.bf16.mxu0 %v1565_v31  ;;  %v1131_v52 = vmul.f32 %v9444_v2, %v9443_v11  ;;  %v9445_v35 = vld [vmem:[#allocation46_spill] sm:$0xff]  ;;  %v9446_v31 = vrot.slane %v5856_v51, %v5484_v39 }
 0x254   :  { %v1381_v45 = vmul.f32 %v9441_v18, %v1341_v47  ;;  %v1316_v24 = vmul.f32 %v9442_v15, %v1276_v34  ;;  %v980_v3 = vsel %vm978_vm5, %v9445_v35, %v5944_v25  ;;  %v979_v47 = vsel %vm978_vm5, %v5944_v25, %v977_v56  ;;  %1725 = vmatpush1.bf16.msra.mxu0 %v1564_v22  ;;  %v9448_v22 = vld [vmem:[#allocation23_spill] sm:$0xff] }
 0x255   :  { %v1248_v46 = vmul.f32 %v9446_v31, %v1045_v5  ;;  %v1566_v34 = vpack.c.bf16 %v1380_v37, %v1315_v41  ;;  %v986_v2 = vsel %vm978_vm5, %v977_v56, %v9447_v42  ;;  %v6163_v18 = vpop.permute.xlu0 %727  ;;  %v1042_v15 = vpop.permute.xlu1 %1041  ;;  %v9449_v56 = vrot.slane %v5856_v51, %v5494_v55 }
 0x256   :  { %v1567_v11 = vpack.c.bf16 %v1381_v45, %v1316_v24  ;;  %v1044_v25 = vsel %vm1043_vm6, %v5974_v7, %v1042_v15  ;;  %v1051_v35 = vsel %vm1043_vm6, %v1042_v15, %v9448_v22  ;;  %v9450_v45 = vld [vmem:[#allocation51_spill] sm:$0xff]  ;;  %v1209_v7 = vmul.f32 %v1195_v33, %v979_v47 }
 0x257   :  { %v1208_v41 = vmul.f32 %v9449_v56, %v980_v3  ;;  %v875_v24 = vsel %vm873_vm8, %v9450_v45, %v6006_v54  ;;  %v1249_v42 = vmul.f32 %v1235_v1, %v1044_v25  ;;  %v9451_v15 = vrot.slane %v5871_v16, %v5494_v55 }
 0x258   :  { %1777 = vmatprep.subr.bf16.mxu1 %v1567_v11  ;;  %v1250_v31 = vmul.f32 %v1239_v50, %v1051_v35  ;;  %v9453_v45 = vrot.slane %v5839_v13, %v5413_v63  ;;  %v9454_v11 = vld [vmem:[#allocation38_spill] sm:$0xff] }
 0x259   :  { %v1210_v22 = vmul.f32 %v9451_v15, %v986_v2  ;;  %1778 = vmatpush1.bf16.msra.mxu1 %v1566_v34  ;;  %v1556_v33 = vpack.c.bf16 %v1248_v46, %v1208_v41  ;;  %v805_v1 = vpop.permute.xlu0 %804  ;;  %v9456_v36 = vpack.c.bf16 %v9454_v11, %v9455_v59  ;;  %v872_v16 = vpop.permute.xlu1 %871  ;;  %v1557_v50 = vpack.c.bf16 %v1249_v42, %v1209_v7  ;;  %v9461_v41 = vld [vmem:[#allocation52_spill] sm:$0xff] }
 0x25a   :  { %v1088_v37 = vmul.f32 %v9453_v45, %v9452_v29  ;;  %v1551_v34 = vpack.c.bf16 %v5912_v21, %v1131_v52  ;;  %v9457_v15 = vrot.slane %v5856_v51, %v5528_v19  ;;  %v874_v49 = vsel %vm873_vm8, %v6006_v54, %v872_v16  ;;  %v9458_v29 = vld [vmem:[#allocation22_spill] sm:$0xff] }
 0x25b   :  { %1779 = vmatprep.subr.bf16.mxu1 %v9456_v36  ;;  %v1558_v61 = vpack.c.bf16 %v1250_v31, %v1210_v22  ;;  %v881_v46 = vsel %vm873_vm8, %v872_v16, %v9458_v29  ;;  %v9459_v36 = vrot.slane %v5854_v53, %v5413_v63  ;;  %v1091_v21 = vmul.f32 %v1083_v43, %v1051_v35 }
 0x25c   :  { %v1128_v56 = vmul.f32 %v9457_v15, %v875_v24  ;;  %v9460_v51 = vrot.slane %v5877_v10, %v5528_v19  ;;  %v1130_v31 = vmul.f32 %v1119_v4, %v881_v46  ;;  %1726 = vmatprep.subr.bf16.mxu0 %v1557_v50  ;;  %v9462_v54 = vrot.slane %v5839_v13, %v5487_v40  ;;  %v9467_v50 = vld [vmem:[#allocation48_spill] sm:$0xff] }
 0x25d   :  { %v1089_v59 = vmul.f32 %v9459_v36, %v1045_v5  ;;  %v9463_v42 = vrot.slane %v5854_v53, %v5406_v62  ;;  %v9464_v22 = vrot.slane %v5854_v53, %v5487_v40  ;;  %1727 = vmatpush1.bf16.msra.mxu0 %v1556_v33  ;;  %1780 = vmatpush1.bf16.msra.mxu1 %v1558_v61  ;;  %v596_v16 = vpop.permute.xlu0 %595 }
 0x25e   :  { %v1129_v52 = vmul.f32 %v9460_v51, %v874_v49  ;;  %v6222_v7 = vmul.f32 %v9462_v54, %v9461_v41  ;;  %v9465_v10 = vrot.slane %v5881_v30, %v5406_v62  ;;  %v9466_v35 = vrot.slane %v5862_v27, %v5413_v63  ;;  %1781 = vmatprep.subr.bf16.mxu1 %v1551_v34  ;;  %v803_v29 = vpop.permute.xlu1 %802 }
 0x25f   :  { %v1024_v5 = vmul.f32 %v9463_v42, %v980_v3  ;;  %v919_v43 = vmul.f32 %v9464_v22, %v875_v24  ;;  %v1550_v11 = vpack.c.bf16 %v5977_v12, %v1130_v31  ;;  %v9468_v24 = vrot.slane %v5839_v13, %v5406_v62 }
 0x260   :  { %v1026_v4 = vmul.f32 %v9465_v10, %v986_v2  ;;  %v1090_v45 = vmul.f32 %v9466_v35, %v1044_v25  ;;  %v1549_v3 = vpack.c.bf16 %v5965_v8, %v1129_v52  ;;  %v1548_v61 = vpack.c.bf16 %v5960_v17, %v1128_v56  ;;  %v9475_v10 = vld [vmem:[#allocation53_spill] sm:$0xff] }
 0x261   :  { %v1023_v33 = vmul.f32 %v9468_v24, %v9467_v50  ;;  %v9469_v2 = vrot.slane %v5881_v30, %v5487_v40  ;;  %v706_v25 = vrot.slane %v5839_v13, %v5531_v20  ;;  %v9470_v12 = vrot.slane %v5862_v27, %v5406_v62  ;;  %1782 = vmatpush1.bf16.msra.mxu1 %v1550_v11  ;;  %v742_v41 = vpop.permute.xlu0 %741 }
 0x262   :  { %1728 = vmatprep.subr.bf16.mxu0 %v1549_v3  ;;  %v1543_v8 = vpack.c.bf16 %v1091_v21, %v1026_v4  ;;  %v1541_v36 = vpack.c.bf16 %v1089_v59, %v1024_v5  ;;  %v710_v51 = vrot.slane %v5854_v53, %v5531_v20  ;;  %v1532_v17 = vpack.c.bf16 %v5932_v26, %v6222_v7  ;;  %v807_v54 = vpop.permute.xlu1 %806 }
 0x263   :  { %v921_v15 = vmul.f32 %v9469_v2, %v881_v46  ;;  %v1025_v34 = vmul.f32 %v9470_v12, %v979_v47  ;;  %v1540_v52 = vpack.c.bf16 %v1088_v37, %v1023_v33  ;;  %1729 = vmatpush1.bf16.msra.mxu0 %v1548_v61  ;;  %v1533_v56 = vpack.c.bf16 %v5968_v0, %v919_v43  ;;  %v9471_v46 = vld [vmem:[#allocation41_spill] sm:$0xff] }
 0x264   :  { %v750_v31 = vsel %vm743_vm10, %v6163_v18, %v9471_v46  ;;  %v9472_v59 = vrot.slane %v5862_v27, %v5487_v40  ;;  %1783 = vmatprep.subr.bf16.mxu1 %v1543_v8  ;;  %1730 = vmatprep.subr.bf16.mxu0 %v1541_v36  ;;  %v810_v26 = vsel %vm808_vm9, %v803_v29, %v805_v1  ;;  %v9474_v43 = vld [vmem:[#allocation25_spill] sm:$0xff] }
 0x265   :  { %v1542_v47 = vpack.c.bf16 %v1090_v45, %v1025_v34  ;;  %v811_v0 = vsel %vm808_vm9, %v5754_v32, %v803_v29  ;;  %v744_v37 = vsel %vm743_vm10, %v6008_v28, %v742_v41  ;;  %v1535_v7 = vpack.c.bf16 %v5980_v44, %v921_v15  ;;  %v610_v50 = vpop.permute.xlu0 %609 }
 0x266   :  { %v920_v21 = vmul.f32 %v9472_v59, %v874_v49  ;;  %v751_v49 = vsel %vm743_vm10, %v742_v41, %v6163_v18  ;;  %v9473_v42 = vrot.slane %v5854_v53, %v5494_v55  ;;  %v809_v22 = vsel %vm808_vm9, %v805_v1, %v807_v54  ;;  %v673_v12 = vpop.permute.xlu1 %672 }
 0x267   :  { %v816_v32 = vsel %vm808_vm9, %v807_v54, %v9474_v43  ;;  %v745_v44 = vsel %vm743_vm10, %v9475_v10, %v6008_v28  ;;  %v615_v18 = vsel %vm613_vm11, %v5908_v6, %v6034_v14  ;;  %v9476_v4 = vrot.slane %v5881_v30, %v5484_v39  ;;  %1731 = vmatpush1.bf16.msra.mxu0 %v1540_v52  ;;  %v9479_v6 = vld [vmem:[#allocation44_spill] sm:$0xff] }
 0x268   :  { %v789_v5 = vmul.f32 %v9473_v42, %v744_v37  ;;  %1784 = vmatpush1.bf16.msra.mxu1 %v1542_v47  ;;  %v9477_v1 = vrot.slane %v5881_v30, %v5494_v55  ;;  %v1534_v11 = vpack.c.bf16 %v5947_v38, %v920_v21  ;;  %v9478_v28 = vrot.slane %v5854_v53, %v5484_v39 }
 0x269   :  { %v856_v35 = vmul.f32 %v9476_v4, %v816_v32  ;;  %1785 = vmatprep.subr.bf16.mxu1 %v1535_v7  ;;  %1732 = vmatprep.subr.bf16.mxu0 %v1533_v56  ;;  %v620_v24 = vsel %vm613_vm11, %v596_v16, %v9479_v6  ;;  %v9480_v33 = vrot.slane %v5839_v13, %v5484_v39 }
 0x26a   :  { %v791_v45 = vmul.f32 %v9477_v1, %v750_v31  ;;  %v854_v3 = vmul.f32 %v9478_v28, %v810_v26  ;;  %v9481_v2 = vrot.slane %v5862_v27, %v5494_v55  ;;  %v9482_v38 = vrot.slane %v5862_v27, %v5484_v39  ;;  %v677_v7 = vpop.permute.xlu1 %676 }
 0x26b   :  { %v853_v61 = vmul.f32 %v9480_v33, %v811_v0  ;;  %v681_v34 = vsel %vm678_vm12, %v5768_v48, %v673_v12  ;;  %v714_v36 = vrot.slane %v5862_v27, %v5531_v20  ;;  %v9483_v56 = vrot.slane %v5839_v13, %v5494_v55  ;;  %1733 = vmatpush1.bf16.msra.mxu0 %v1532_v17  ;;  %v675_v0 = vpop.permute.xlu0 %674 }
 0x26c   :  { %v790_v15 = vmul.f32 %v9481_v2, %v751_v49  ;;  %v855_v29 = vmul.f32 %v9482_v38, %v809_v22  ;;  %v1527_v8 = vpack.c.bf16 %v856_v35, %v791_v45  ;;  %v1525_v52 = vpack.c.bf16 %v854_v3, %v789_v5  ;;  %1786 = vmatpush1.bf16.msra.mxu1 %v1534_v11  ;;  %v9487_v5 = vld [vmem:[#allocation28_spill] sm:$0xff] }
 0x26d   :  { %v788_v46 = vmul.f32 %v9483_v56, %v745_v44  ;;  %v614_v31 = vsel %vm613_vm11, %v6034_v14, %v610_v50  ;;  %v718_v47 = vrot.slane %v5881_v30, %v5531_v20  ;;  %v9484_v48 = vrot.slane %v5839_v13, %v5528_v19 }
 0x26e   :  { %v9485_v21 = vrot.slane %v5881_v30, %v5528_v19  ;;  %v621_v26 = vsel %vm613_vm11, %v610_v50, %v596_v16  ;;  %1787 = vmatprep.subr.bf16.mxu1 %v1527_v8  ;;  %1734 = vmatprep.subr.bf16.mxu0 %v1525_v52  ;;  %v1526_v17 = vpack.c.bf16 %v855_v29, %v790_v15 }
 0x26f   :  { %v658_v59 = vmul.f32 %v9484_v48, %v615_v18  ;;  %v1524_v14 = vpack.c.bf16 %v853_v61, %v788_v46  ;;  %v723_v37 = vmul.f32 %v706_v25, %v681_v34  ;;  %v680_v54 = vsel %vm678_vm12, %v673_v12, %v675_v0 }
 0x270   :  { %v661_v41 = vmul.f32 %v9485_v21, %v620_v24  ;;  %v9486_v13 = vrot.slane %v5854_v53, %v5528_v19  ;;  %v724_v42 = vmul.f32 %v710_v51, %v680_v54  ;;  %v679_v30 = vsel %vm678_vm12, %v675_v0, %v677_v7  ;;  %1788 = vmatpush1.bf16.msra.mxu1 %v1526_v17 }
 0x271   :  { %v686_v16 = vsel %vm678_vm12, %v677_v7, %v9487_v5  ;;  %v9488_v22 = vrot.slane %v5862_v27, %v5528_v19  ;;  %v725_v43 = vmul.f32 %v714_v36, %v679_v30  ;;  %1735 = vmatpush1.bf16.msra.mxu0 %v1524_v14  ;;  %v1516_v44 = vpack.c.bf16 %v723_v37, %v658_v59 }
 0x272   :  { %v659_v49 = vmul.f32 %v9486_v13, %v614_v31  ;;  %v726_v32 = vmul.f32 %v718_v47, %v686_v16 }
 0x273   :  { %v660_v25 = vmul.f32 %v9488_v22, %v621_v26 }
 0x274   :  { %v1517_v10 = vpack.c.bf16 %v724_v42, %v659_v49  ;;  %v1519_v18 = vpack.c.bf16 %v726_v32, %v661_v41 }
 0x275   :  { %v1518_v53 = vpack.c.bf16 %v725_v43, %v660_v25 }
 0x276   :  { %1736 = vmatprep.subr.bf16.mxu0 %v1517_v10  ;;  %1789 = vmatprep.subr.bf16.mxu1 %v1519_v18 }
 0x277   :  { %1737 = vmatpush1.bf16.msra.mxu0 %v1516_v44  ;;  %1790 = vmatpush1.bf16.msra.mxu1 %v1518_v53  ;;  %v6353_v27 = vpop.permute.xlu0 %1586 }
 0x278   :  { %v6358_v1 = vpop.permute.xlu1 %1591 }
 0x27a   :  { %1755 = vmatmul.mubr.bf16.vlgmr.msra.gmra.mxu0 %v5776_v57  ;;  %1808 = vmatmul.mubr.bf16.vlgmr.msra.gmra.mxu1 %v5776_v57 }
 0x27b   :  { %1764 = vmatprep.mubr.bf16.mxu0 %v9431_v23  ;;  %1817 = vmatprep.mubr.bf16.mxu1 %v9431_v23  ;;  %v6391_v12 = vpop.permute.xlu0 %1601 }
 0x27c   :  { %v6373_v50 = vpop.permute.xlu1 %1596 }
 0x282   :  { %1765 = vmatmul.mubr.bf16.gmra.mxu0 %v9437_v60  ;;  %1818 = vmatmul.mubr.bf16.gmra.mxu1 %v9437_v60 }
 0x2e2   :  { %v1650_v51 = vpop.f32.mrf.mxu0 }
 0x2e3   :  { %v6356_v4 = vadd.f32 %v1650_v51, %v6353_v27 }
 0x2e4   :  { %v1652_v35 = vpop.f32.mrf.mxu0 }
 0x2e5   :  { %v6361_v45 = vadd.f32 %v1652_v35, %v6353_v27  ;;  %vm1860_vm13 = vcmp.ge.s32.totalorder %v6356_v4, 0  ;;  %v1892_v57 = vsub.s32 2147483648, %v6356_v4 }
 0x2e6   :  { %v1654_v23 = vpop.f32.mrf.mxu0 }
 0x2e7   :  { %vm1861_vm14 = vcmp.ge.s32.totalorder %v6361_v45, 0  ;;  %v1893_v60 = vsub.s32 2147483648, %v6361_v45  ;;  %v6368_v11 = vsel %vm1860_vm13, %v6356_v4, %v1892_v57  ;;  %v6371_v28 = vadd.f32 %v1654_v23, %v6358_v1 }
 0x2e8   :  { %v1656_v3 = vpop.f32.mrf.mxu0 }
 0x2e9   :  { %v6376_v6 = vsel %vm1861_vm14, %v6361_v45, %v1893_v60  ;;  %vm1868_vm15 = vcmp.ge.s32.totalorder %v6371_v28, 0  ;;  %v1900_v24 = vsub.s32 2147483648, %v6371_v28  ;;  %v6381_v33 = vadd.f32 %v1656_v3, %v6358_v1 }
 0x2ea   :  { %v1660_v61 = vpop.f32.mrf.mxu0 }
 0x2eb   :  { %v6384_v2 = vsel %vm1868_vm15, %v6371_v28, %v1900_v24  ;;  %vm1869_vm0 = vcmp.ge.s32.totalorder %v6381_v33, 0  ;;  %v1901_v15 = vsub.s32 2147483648, %v6381_v33  ;;  %v6389_v38 = vadd.f32 %v1660_v61, %v6373_v50 }
 0x2ec   :  { %v1662_v29 = vpop.f32.mrf.mxu0 }
 0x2ed   :  { %v6394_v34 = vsel %vm1869_vm0, %v6381_v33, %v1901_v15  ;;  %v6397_v8 = vadd.f32 %v1662_v29, %v6373_v50  ;;  %vm1876_vm1 = vcmp.ge.s32.totalorder %v6389_v38, 0  ;;  %v1908_v36 = vsub.s32 2147483648, %v6389_v38 }
 0x2ee   :  { %v1664_v52 = vpop.f32.mrf.mxu0 }
 0x2ef   :  { %v6402_v56 = vadd.f32 %v1664_v52, %v6391_v12  ;;  %vm1877_vm2 = vcmp.ge.s32.totalorder %v6397_v8, 0  ;;  %v1909_v46 = vsub.s32 2147483648, %v6397_v8  ;;  %v6407_v31 = vsel %vm1876_vm1, %v6389_v38, %v1908_v36 }
 0x2f0   :  { %v1666_v47 = vpop.f32.mrf.mxu0 }
 0x2f1   :  { %vm1884_vm4 = vcmp.ge.s32.totalorder %v6402_v56, 0  ;;  %v1916_v48 = vsub.s32 2147483648, %v6402_v56  ;;  %v6412_v59 = vsel %vm1877_vm2, %v6397_v8, %v1909_v46  ;;  %v6415_v21 = vadd.f32 %v1666_v47, %v6391_v12 }
 0x2f3   :  { %v6418_v41 = vsel %vm1884_vm4, %v6402_v56, %v1916_v48  ;;  %vm1885_vm5 = vcmp.ge.s32.totalorder %v6415_v21, 0  ;;  %v1917_v26 = vsub.s32 2147483648, %v6415_v21 }
 0x2f5   :  { %v6423_v0 = vsel %vm1885_vm5, %v6415_v21, %v1917_v26 }
 0x307   :  { %v1703_v14 = vpop.f32.mrf.mxu1 }
 0x308   :  { %v6426_v17 = vadd.f32 %v1703_v14, %v6353_v27 }
 0x309   :  { %v1705_v37 = vpop.f32.mrf.mxu1 }
 0x30a   :  { %v6429_v54 = vadd.f32 %v1705_v37, %v6353_v27  ;;  %vm1862_vm8 = vcmp.ge.s32.totalorder %v6426_v17, 0  ;;  %v1894_v7 = vsub.s32 2147483648, %v6426_v17 }
 0x30b   :  { %v1707_v13 = vpop.f32.mrf.mxu1 }
 0x30c   :  { %vm1863_vm10 = vcmp.ge.s32.totalorder %v6429_v54, 0  ;;  %v1895_v49 = vsub.s32 2147483648, %v6429_v54  ;;  %v6436_v42 = vsel %vm1862_vm8, %v6426_v17, %v1894_v7  ;;  %v6439_v30 = vadd.f32 %v1707_v13, %v6358_v1 }
 0x30d   :  { %v1709_v5 = vpop.f32.mrf.mxu1 }
 0x30e   :  { %v6442_v16 = vsel %vm1863_vm10, %v6429_v54, %v1895_v49  ;;  %v6445_v22 = vadd.f32 %v1709_v5, %v6358_v1  ;;  %vm1870_vm11 = vcmp.ge.s32.totalorder %v6439_v30, 0  ;;  %v1902_v25 = vsub.s32 2147483648, %v6439_v30 }
 0x30f   :  { %v1713_v10 = vpop.f32.mrf.mxu1 }
 0x310   :  { %vm1871_vm13 = vcmp.ge.s32.totalorder %v6445_v22, 0  ;;  %v1903_v43 = vsub.s32 2147483648, %v6445_v22  ;;  %v6452_v32 = vsel %vm1870_vm11, %v6439_v30, %v1902_v25  ;;  %v6458_v53 = vadd.f32 %v1713_v10, %v6373_v50 }
 0x311   :  { %v1715_v18 = vpop.f32.mrf.mxu1 }
 0x312   :  { %v6455_v44 = vsel %vm1871_vm13, %v6445_v22, %v1903_v43  ;;  %v6461_v51 = vadd.f32 %v1715_v18, %v6373_v50  ;;  %vm1878_vm14 = vcmp.ge.s32.totalorder %v6458_v53, 0  ;;  %v1910_v35 = vsub.s32 2147483648, %v6458_v53 }
 0x313   :  { %v1717_v57 = vpop.f32.mrf.mxu1 }
 0x314   :  { %v6466_v23 = vadd.f32 %v1717_v57, %v6391_v12  ;;  %vm1879_vm15 = vcmp.ge.s32.totalorder %v6461_v51, 0  ;;  %v1911_v60 = vsub.s32 2147483648, %v6461_v51  ;;  %v6471_v3 = vsel %vm1878_vm14, %v6458_v53, %v1910_v35 }
 0x315   :  { %v1719_v24 = vpop.f32.mrf.mxu1 }
 0x316   :  { %vm1886_vm0 = vcmp.ge.s32.totalorder %v6466_v23, 0  ;;  %v1918_v61 = vsub.s32 2147483648, %v6466_v23  ;;  %v6476_v15 = vadd.f32 %v1719_v24, %v6391_v12  ;;  %v6479_v29 = vsel %vm1879_vm15, %v6461_v51, %v1911_v60 }
 0x318   :  { %v6482_v36 = vsel %vm1886_vm0, %v6466_v23, %v1918_v61  ;;  %vm1887_vm1 = vcmp.ge.s32.totalorder %v6476_v15, 0  ;;  %v1919_v52 = vsub.s32 2147483648, %v6476_v15 }
 0x31a   :  { %v6487_v46 = vsel %vm1887_vm1, %v6476_v15, %v1919_v52 }
 0x33a   :  { %v1756_v47 = vpop.f32.mrf.mxu0  ;;  %v1809_v26 = vpop.f32.mrf.mxu1 }
 0x33b   :  { %v6490_v48 = vadd.f32 %v1756_v47, %v6353_v27  ;;  %v6493_v14 = vadd.f32 %v1809_v26, %v6353_v27 }
 0x33c   :  { %v1758_v37 = vpop.f32.mrf.mxu0  ;;  %v1811_v49 = vpop.f32.mrf.mxu1 }
 0x33d   :  { %9489 = vst [vmem:[#allocation35_spill] sm:$0xff] %v6493_v14  ;;  %vm1864_vm2 = vcmp.ge.s32.totalorder %v6490_v48, 0  ;;  %v1896_v7 = vsub.s32 2147483648, %v6490_v48  ;;  %v6498_v13 = vadd.f32 %v1758_v37, %v6353_v27  ;;  %vm1866_vm4 = vcmp.ge.s32.totalorder %v6493_v14, 0 }
 0x33e   :  { %v1898_v5 = vsub.s32 2147483648, %v6493_v14  ;;  %v6503_v25 = vadd.f32 %v1811_v49, %v6353_v27  ;;  %v1760_v43 = vpop.f32.mrf.mxu0  ;;  %v1813_v57 = vpop.f32.mrf.mxu1 }
 0x33f   :  { %v6506_v10 = vsel %vm1864_vm2, %v6490_v48, %v1896_v7  ;;  %vm1865_vm5 = vcmp.ge.s32.totalorder %v6498_v13, 0  ;;  %v1897_v18 = vsub.s32 2147483648, %v6498_v13  ;;  %v6511_v35 = vadd.f32 %v1760_v43, %v6358_v1 }
 0x340   :  { %9490 = vst [vmem:[#allocation36_spill] sm:$0xff] %v6503_v25  ;;  %v6514_v60 = vsel %vm1866_vm4, %v6493_v14, %v1898_v5  ;;  %vm1867_vm8 = vcmp.ge.s32.totalorder %v6503_v25, 0  ;;  %v1899_v27 = vsub.s32 2147483648, %v6503_v25  ;;  %v6519_v24 = vadd.f32 %v1813_v57, %v6358_v1  ;;  %v1762_v61 = vpop.f32.mrf.mxu0  ;;  %v1815_v37 = vpop.f32.mrf.mxu1 }
 0x341   :  { %9491 = vst [vmem:[#allocation13_spill] sm:$0xff] %v6514_v60  ;;  %v6522_v52 = vsel %vm1865_vm5, %v6498_v13, %v1897_v18  ;;  %vm1872_vm10 = vcmp.ge.s32.totalorder %v6511_v35, 0  ;;  %v1904_v47 = vsub.s32 2147483648, %v6511_v35  ;;  %v6527_v26 = vadd.f32 %v1762_v61, %v6358_v1 }
 0x342   :  { %9492 = vst [vmem:[#allocation37_spill] sm:$0xff] %v6519_v24  ;;  %v6530_v7 = vsel %vm1867_vm8, %v6503_v25, %v1899_v27  ;;  %vm1874_vm11 = vcmp.ge.s32.totalorder %v6519_v24, 0  ;;  %v1906_v49 = vsub.s32 2147483648, %v6519_v24  ;;  %v6535_v5 = vadd.f32 %v1815_v37, %v6358_v1  ;;  %v1766_v43 = vpop.f32.mrf.mxu0  ;;  %v1819_v27 = vpop.f32.mrf.mxu1 }
 0x343   :  { %9493 = vst [vmem:[#allocation14_spill] sm:$0xff] %v6530_v7  ;;  %v6538_v18 = vsel %vm1872_vm10, %v6511_v35, %v1904_v47  ;;  %vm1873_vm13 = vcmp.ge.s32.totalorder %v6527_v26, 0  ;;  %v1905_v57 = vsub.s32 2147483648, %v6527_v26  ;;  %v6543_v61 = vadd.f32 %v1766_v43, %v6373_v50 }
 0x344   :  { %9494 = vst [vmem:[#allocation15_spill] sm:$0xff] %v6535_v5  ;;  %v6546_v40 = vsel %vm1874_vm11, %v6519_v24, %v1906_v49  ;;  %vm1875_vm14 = vcmp.ge.s32.totalorder %v6535_v5, 0  ;;  %v1907_v1 = vsub.s32 2147483648, %v6535_v5  ;;  %v6551_v37 = vadd.f32 %v1819_v27, %v6373_v50  ;;  %v1768_v47 = vpop.f32.mrf.mxu0  ;;  %v1821_v49 = vpop.f32.mrf.mxu1 }
 0x345   :  { %9495 = vst [vmem:[#allocation19_spill] sm:$0xff] %v6546_v40  ;;  %v6554_v9 = vsel %vm1873_vm13, %v6527_v26, %v1905_v57  ;;  %vm1880_vm15 = vcmp.ge.s32.totalorder %v6543_v61, 0  ;;  %v1912_v43 = vsub.s32 2147483648, %v6543_v61  ;;  %v6559_v62 = vadd.f32 %v1768_v47, %v6373_v50 }
 0x346   :  { %9496 = vst [vmem:[#allocation16_spill] sm:$0xff] %v6551_v37  ;;  %v6562_v63 = vsel %vm1875_vm14, %v6535_v5, %v1907_v1  ;;  %vm1882_vm0 = vcmp.ge.s32.totalorder %v6551_v37, 0  ;;  %v1914_v27 = vsub.s32 2147483648, %v6551_v37  ;;  %v6567_v19 = vadd.f32 %v1821_v49, %v6373_v50  ;;  %v1770_v57 = vpop.f32.mrf.mxu0  ;;  %v1823_v1 = vpop.f32.mrf.mxu1 }
 0x347   :  { %9497 = vst [vmem:[#allocation17_spill] sm:$0xff] %v6562_v63  ;;  %v6570_v20 = vsel %vm1880_vm15, %v6543_v61, %v1912_v43  ;;  %vm1881_vm1 = vcmp.ge.s32.totalorder %v6559_v62, 0  ;;  %v1913_v47 = vsub.s32 2147483648, %v6559_v62  ;;  %v6575_v55 = vadd.f32 %v1770_v57, %v6391_v12 }
 0x348   :  { %9498 = vst [vmem:[#allocation43_spill] sm:$0xff] %v6567_v19  ;;  %v6578_v39 = vsel %vm1882_vm0, %v6551_v37, %v1914_v27  ;;  %vm1883_vm2 = vcmp.ge.s32.totalorder %v6567_v19, 0  ;;  %v1915_v50 = vsub.s32 2147483648, %v6567_v19  ;;  %v6583_v49 = vadd.f32 %v1823_v1, %v6391_v12  ;;  %v1772_v43 = vpop.f32.mrf.mxu0  ;;  %v1825_v27 = vpop.f32.mrf.mxu1 }
 0x349   :  { %9499 = vst [vmem:[#allocation45_spill] sm:$0xff] %v6575_v55  ;;  %9500 = vst [vmem:[#allocation42_spill] sm:$0xff] %v6578_v39  ;;  %v6586_v58 = vsel %vm1881_vm1, %v6559_v62, %v1913_v47  ;;  %vm1888_vm4 = vcmp.ge.s32.totalorder %v6575_v55, 0  ;;  %v1920_v57 = vsub.s32 2147483648, %v6575_v55  ;;  %v6591_v25 = vadd.f32 %v1772_v43, %v6391_v12 }
 0x34a   :  { %9501 = vst [vmem:[#allocation20_spill] sm:$0xff] %v6583_v49  ;;  %v6594_v5 = vsel %vm1883_vm2, %v6567_v19, %v1915_v50  ;;  %vm1890_vm5 = vcmp.ge.s32.totalorder %v6583_v49, 0  ;;  %v1922_v1 = vsub.s32 2147483648, %v6583_v49  ;;  %v6599_v7 = vadd.f32 %v1825_v27, %v6391_v12 }
 0x34b   :  { %9502 = vst [vmem:[#allocation47_spill] sm:$0xff] %v6591_v25  ;;  %9503 = vst [vmem:[#allocation49_spill] sm:$0xff] %v6594_v5  ;;  %v6602_v47 = vsel %vm1888_vm4, %v6575_v55, %v1920_v57  ;;  %vm1889_vm8 = vcmp.ge.s32.totalorder %v6591_v25, 0  ;;  %v1921_v63 = vsub.s32 2147483648, %v6591_v25 }
 0x34c   :  { %9504 = vst [vmem:[#allocation18_spill] sm:$0xff] %v6599_v7  ;;  %v6607_v43 = vsel %vm1890_vm5, %v6583_v49, %v1922_v1  ;;  %vm1891_vm10 = vcmp.ge.s32.totalorder %v6599_v7, 0  ;;  %v1923_v50 = vsub.s32 2147483648, %v6599_v7 }
 0x34d   :  { %9505 = vst [vmem:[#allocation40_spill] sm:$0xff] %v6607_v43  ;;  %v6612_v19 = vsel %vm1889_vm8, %v6591_v25, %v1921_v63 }
 0x34e   :  { %v6615_v12 = vsel %vm1891_vm10, %v6599_v7, %v1923_v50 }
 0x34f   :  { %9506 = vst [vmem:[#allocation46_spill] sm:$0xff] %v6615_v12 }
 0x350 LB: > { %s1964_s18 = sshra.s32 %s4787_s15, 1  ;;  %s1965_s1 = sshra.s32 %s4783_s3, 1  ;;  %vm1979_vm11 = vcmask 523264   ;;  %v4851_v57 = vmov 0   ;;  %s4791_s17 = sphi %s6621_s17, %s1961_s17   ;;  %s4787_s15 = sphi %s6619_s15, %s9507_s15   ;;  %s4783_s3 = sphi %s6617_s3, %s9707_s3  }
 0x351   : > { %s1966_s22 = sadd.s32 %s1965_s1, %s1964_s18  ;;  %s1967_s4 = sand.u32 %s4783_s3, %s4787_s15 }
 0x352   : > { %s1968_s7 = sand.u32 1, %s1967_s4  ;;  %s1961_s17 = sadd.s32 1, %s4791_s17  }
 0x353   : > { %s6636_s23 = sadd.s32 %s1968_s7, %s1966_s22  ;;  %p1958_p12 = scmp.ge.s32.totalorder %s1961_s17, 34  }
 0x354   : > { %v1970_v63 = vstv %s6636_s23  ;;  %s6690_s26 = smov (%p1958_p12), 2139095040   ;;  %s6692_s27 = smov (%p1958_p12), 2155872256  }
 0x355   : > { %vm1971_vm13 = vcmp.ge.s32.totalorder %v6368_v11, %v1970_v63  ;;  %vm1972_vm14 = vcmp.ge.s32.totalorder %v6384_v2, %v1970_v63  ;;  %vm1973_vm15 = vcmp.ge.s32.totalorder %v6407_v31, %v1970_v63  ;;  %vm1974_vm0 = vcmp.ge.s32.totalorder %v6418_v41, %v1970_v63  ;;  %s6694_s28 = smov (%p1958_p12), 0  }
 0x356   : > { %v1975_v27 = vsel %vm1971_vm13, 1, %v4851_v57  ;;  %v1976_v1 = vsel %vm1972_vm14, 1, %v4851_v57  ;;  %v1977_v50 = vsel %vm1973_vm15, 1, %v4851_v57  ;;  %v1978_v5 = vsel %vm1974_vm0, 1, %v4851_v57 }
 0x357   : > { %v1980_v7 = vsel %vm1979_vm11, %v1975_v27, 0  ;;  %v1981_v12 = vsel %vm1979_vm11, %v1976_v1, 0  ;;  %v1982_v37 = vsel %vm1979_vm11, %v1977_v50, 0  ;;  %v1983_v49 = vsel %vm1979_vm11, %v1978_v5, 0 }
 0x358   : > { %v1984_v14 = vadd.s32 %v1981_v12, %v1980_v7  ;;  %v1985_v24 = vadd.s32 %v1983_v49, %v1982_v37 }
 0x35a   : > { %v1986_v43 = vadd.s32 %v1985_v24, %v1984_v14 }
 0x35c   : > { %v1988_v39 = vshrl.u32 %v1986_v43, 16  ;;  %v1987_v40 = vand.u32 65535, %v1986_v43 }
 0x35e   : > { %v1990_v60 = vcvt.s32.f32 %v1988_v39  ;;  %v1989_v63 = vcvt.s32.f32 %v1987_v40 }
 0x360   : > { %1993 = vadd.xlane.f32.xlu0 %v1990_v60 }
 0x364   : > { %1991 = vadd.xlane.f32.xlu0 %v1989_v63 }
 0x3e9   : > { %v1994_v57 = vpop.xlane.xlu0 %1993 }
 0x3ea   : > { %v1996_v27 = vcvt.f32.s32 %v1994_v57 }
 0x3ec   : > { %v1997_v25 = vshll.u32 %v1996_v27, 16 }
 0x3ed   : > { %v1992_v1 = vpop.xlane.xlu0 %1991 }
 0x3ee   : > { %v1995_v50 = vcvt.f32.s32 %v1992_v1 }
 0x3f0   : > { %v1998_v55 = vadd.s32 %v1997_v25, %v1995_v50 }
 0x3f2   : > { %v1999_v5 = vrot.slane %v1998_v55, 4 }
 0x3f4   : > { %v2000_v7 = vadd.s32 %v1999_v5, %v1998_v55 }
 0x3f6   : > { %v2001_v37 = vrot.slane %v2000_v7, 2 }
 0x3f8   : > { %v2002_v14 = vadd.s32 %v2001_v37, %v2000_v7 }
 0x3fa   : > { %v2003_v24 = vrot.slane %v2002_v14, 1 }
 0x3fc   : > { %v2004_v49 = vadd.s32 %v2003_v24, %v2002_v14 }
 0x3fe   : > { %4382 = vpush %v2004_v49 }
 0x42f   : > { %s4383_s24 = spop %4382 }
 0x430   : > { %p2006_p11 = scmp.ge.s32.totalorder %s4383_s24, 25  ;;  %1960 = sbr.rel (!%p1958_p12) target bundleno = 848 (0x350), region = 116 }
 0x432   : > { %s2007_s25 = scalar_select %p2006_p11, %s6636_s23, %s4787_s15  }
 0x433   : > { %s9707_s3 = smov (!%p2006_p11, %s4783_s3), %s6636_s23 }
 0x434   : > { %s9507_s15 = smov %s2007_s25  ;;  %v2009_v39 = vstv (%p1958_p12), %s2007_s25 }
 0x435   :  { %vm2010_vm1 = vcmp.ge.s32.totalorder %v6368_v11, %v2009_v39  ;;  %vm2011_vm2 = vcmp.ge.s32.totalorder %v6376_v6, %v2009_v39  ;;  %vm2012_vm4 = vcmp.ge.s32.totalorder %v6384_v2, %v2009_v39  ;;  %vm2013_vm5 = vcmp.ge.s32.totalorder %v6394_v34, %v2009_v39 }
 0x436   :  { %vm2014_vm8 = vcmp.ge.s32.totalorder %v6407_v31, %v2009_v39  ;;  %vm2015_vm10 = vcmp.ge.s32.totalorder %v6412_v59, %v2009_v39  ;;  %vm2016_vm13 = vcmp.ge.s32.totalorder %v6418_v41, %v2009_v39  ;;  %vm2017_vm14 = vcmp.ge.s32.totalorder %v6423_v0, %v2009_v39 }
 0x437   :  { %v6667_v40 = vsel %vm2010_vm1, %v6356_v4, 0.0  ;;  %v6670_v55 = vsel %vm2011_vm2, %v6361_v45, 0.0  ;;  %v6673_v11 = vsel %vm2012_vm4, %v6371_v28, 0.0  ;;  %v6676_v6 = vsel %vm2013_vm5, %v6381_v33, 0.0 }
 0x438   :  { %v6679_v2 = vsel %vm2014_vm8, %v6389_v38, 0.0  ;;  %v6682_v34 = vsel %vm2015_vm10, %v6397_v8, 0.0  ;;  %v6685_v31 = vsel %vm2016_vm13, %v6402_v56, 0.0  ;;  %v6688_v4 = vsel %vm2017_vm14, %v6415_v21, 0.0 }
 0x439 LB: > { %s2034_s0 = sshra.s32 %s4799_s27, 1  ;;  %s2035_s8 = sshra.s32 %s4795_s26, 1  ;;  %v4852_v28 = vmov 0   ;;  %s4803_s28 = sphi %s6694_s28, %s2031_s28   ;;  %s4799_s27 = sphi %s6692_s27, %s9508_s27   ;;  %s4795_s26 = sphi %s6690_s26, %s9709_s26  }
 0x43a   : > { %s2036_s16 = sadd.s32 %s2035_s8, %s2034_s0  ;;  %s2037_s2 = sand.u32 %s4795_s26, %s4799_s27 }
 0x43b   : > { %s2038_s29 = sand.u32 1, %s2037_s2  ;;  %s2031_s28 = sadd.s32 1, %s4803_s28  }
 0x43c   : > { %s6709_s11 = sadd.s32 %s2038_s29, %s2036_s16  ;;  %p2028_p0 = scmp.ge.s32.totalorder %s2031_s28, 34  }
 0x43d   : > { %v2040_v45 = vstv %s6709_s11  ;;  %s6763_s5 = smov (%p2028_p0), 2139095040   ;;  %s6765_s3 = smov (%p2028_p0), 2155872256  }
 0x43e   : > { %vm2041_vm15 = vcmp.ge.s32.totalorder %v6436_v42, %v2040_v45  ;;  %vm2042_vm0 = vcmp.ge.s32.totalorder %v6452_v32, %v2040_v45  ;;  %vm2043_vm1 = vcmp.ge.s32.totalorder %v6471_v3, %v2040_v45  ;;  %vm2044_vm2 = vcmp.ge.s32.totalorder %v6482_v36, %v2040_v45  ;;  %s6767_s15 = smov (%p2028_p0), 0  }
 0x43f   : > { %v2045_v33 = vsel %vm2041_vm15, 1, %v4852_v28  ;;  %v2046_v38 = vsel %vm2042_vm0, 1, %v4852_v28  ;;  %v2047_v8 = vsel %vm2043_vm1, 1, %v4852_v28  ;;  %v2048_v56 = vsel %vm2044_vm2, 1, %v4852_v28 }
 0x440   : > { %v2050_v59 = vsel %vm1979_vm11, %v2045_v33, 0  ;;  %v2051_v21 = vsel %vm1979_vm11, %v2046_v38, 0  ;;  %v2052_v41 = vsel %vm1979_vm11, %v2047_v8, 0  ;;  %v2053_v0 = vsel %vm1979_vm11, %v2048_v56, 0 }
 0x441   : > { %v2054_v25 = vadd.s32 %v2051_v21, %v2050_v59  ;;  %v2055_v60 = vadd.s32 %v2053_v0, %v2052_v41 }
 0x443   : > { %v2056_v43 = vadd.s32 %v2055_v60, %v2054_v25 }
 0x445   : > { %v2058_v12 = vshrl.u32 %v2056_v43, 16  ;;  %v2057_v63 = vand.u32 65535, %v2056_v43 }
 0x447   : > { %v2060_v57 = vcvt.s32.f32 %v2058_v12  ;;  %v2059_v27 = vcvt.s32.f32 %v2057_v63 }
 0x449   : > { %2063 = vadd.xlane.f32.xlu0 %v2060_v57 }
 0x44d   : > { %2061 = vadd.xlane.f32.xlu0 %v2059_v27 }
 0x4d2   : > { %v2064_v1 = vpop.xlane.xlu0 %2063 }
 0x4d3   : > { %v2066_v50 = vcvt.f32.s32 %v2064_v1 }
 0x4d5   : > { %v2067_v7 = vshll.u32 %v2066_v50, 16 }
 0x4d6   : > { %v2062_v5 = vpop.xlane.xlu0 %2061 }
 0x4d7   : > { %v2065_v37 = vcvt.f32.s32 %v2062_v5 }
 0x4d9   : > { %v2068_v14 = vadd.s32 %v2067_v7, %v2065_v37 }
 0x4db   : > { %v2069_v24 = vrot.slane %v2068_v14, 4 }
 0x4dd   : > { %v2070_v49 = vadd.s32 %v2069_v24, %v2068_v14 }
 0x4df   : > { %v2071_v39 = vrot.slane %v2070_v49, 2 }
 0x4e1   : > { %v2072_v45 = vadd.s32 %v2071_v39, %v2070_v49 }
 0x4e3   : > { %v2073_v28 = vrot.slane %v2072_v45, 1 }
 0x4e5   : > { %v2074_v33 = vadd.s32 %v2073_v28, %v2072_v45 }
 0x4e7   : > { %4384 = vpush %v2074_v33 }
 0x518   : > { %s4385_s13 = spop %4384 }
 0x519   : > { %p2076_p13 = scmp.ge.s32.totalorder %s4385_s13, 25  ;;  %2030 = sbr.rel (!%p2028_p0) target bundleno = 1081 (0x439), region = 127 }
 0x51b   : > { %s2077_s14 = scalar_select %p2076_p13, %s6709_s11, %s4799_s27  }
 0x51c   : > { %s9709_s26 = smov (!%p2076_p13, %s4795_s26), %s6709_s11 }
 0x51d   : > { %s9508_s27 = smov %s2077_s14  ;;  %v2079_v38 = vstv (%p2028_p0), %s2077_s14 }
 0x51e   :  { %vm2080_vm4 = vcmp.ge.s32.totalorder %v6436_v42, %v2079_v38  ;;  %vm2081_vm5 = vcmp.ge.s32.totalorder %v6442_v16, %v2079_v38  ;;  %vm2082_vm8 = vcmp.ge.s32.totalorder %v6452_v32, %v2079_v38  ;;  %vm2083_vm10 = vcmp.ge.s32.totalorder %v6455_v44, %v2079_v38 }
 0x51f   :  { %vm2084_vm13 = vcmp.ge.s32.totalorder %v6471_v3, %v2079_v38  ;;  %vm2085_vm14 = vcmp.ge.s32.totalorder %v6479_v29, %v2079_v38  ;;  %vm2086_vm15 = vcmp.ge.s32.totalorder %v6482_v36, %v2079_v38  ;;  %vm2087_vm0 = vcmp.ge.s32.totalorder %v6487_v46, %v2079_v38 }
 0x520   :  { %v6740_v8 = vsel %vm2080_vm4, %v6426_v17, 0.0  ;;  %v6743_v56 = vsel %vm2081_vm5, %v6429_v54, 0.0  ;;  %v6746_v42 = vsel %vm2082_vm8, %v6439_v30, 0.0  ;;  %v6749_v16 = vsel %vm2083_vm10, %v6445_v22, 0.0 }
 0x521   :  { %v6752_v32 = vsel %vm2084_vm13, %v6458_v53, 0.0  ;;  %v6755_v44 = vsel %vm2085_vm14, %v6461_v51, 0.0  ;;  %v6758_v3 = vsel %vm2086_vm15, %v6466_v23, 0.0  ;;  %v6761_v17 = vsel %vm2087_vm0, %v6476_v15, 0.0 }
 0x522 LB: > { %s2104_s17 = sshra.s32 %s4811_s3, 1  ;;  %s2105_s18 = sshra.s32 %s4807_s5, 1  ;;  %v4853_v30 = vmov 0   ;;  %s4815_s15 = sphi %s6767_s15, %s2101_s15   ;;  %s4811_s3 = sphi %s6765_s3, %s9509_s3   ;;  %s4807_s5 = sphi %s6763_s5, %s9711_s5  }
 0x523   : > { %s2106_s1 = sadd.s32 %s2105_s18, %s2104_s17  ;;  %s2107_s22 = sand.u32 %s4807_s5, %s4811_s3 }
 0x524   : > { %s2108_s4 = sand.u32 1, %s2107_s22  ;;  %s2101_s15 = sadd.s32 1, %s4815_s15  }
 0x525   : > { %s6782_s7 = sadd.s32 %s2108_s4, %s2106_s1  ;;  %p2098_p2 = scmp.ge.s32.totalorder %s2101_s15, 34  }
 0x526   : > { %v2110_v54 = vstv %s6782_s7  ;;  %s6836_s25 = smov (%p2098_p2), 2139095040   ;;  %s6838_s26 = smov (%p2098_p2), 2155872256  }
 0x527   : > { %vm2111_vm1 = vcmp.ge.s32.totalorder %v6506_v10, %v2110_v54  ;;  %vm2112_vm2 = vcmp.ge.s32.totalorder %v6538_v18, %v2110_v54  ;;  %vm2113_vm4 = vcmp.ge.s32.totalorder %v6570_v20, %v2110_v54  ;;  %vm2114_vm5 = vcmp.ge.s32.totalorder %v6602_v47, %v2110_v54  ;;  %s6840_s27 = smov (%p2098_p2), 0  }
 0x528   : > { %v2115_v22 = vsel %vm2111_vm1, 1, %v4853_v30  ;;  %v2116_v53 = vsel %vm2112_vm2, 1, %v4853_v30  ;;  %v2117_v51 = vsel %vm2113_vm4, 1, %v4853_v30  ;;  %v2118_v23 = vsel %vm2114_vm5, 1, %v4853_v30 }
 0x529   : > { %v2120_v15 = vsel %vm1979_vm11, %v2115_v22, 0  ;;  %v2121_v29 = vsel %vm1979_vm11, %v2116_v53, 0  ;;  %v2122_v36 = vsel %vm1979_vm11, %v2117_v51, 0  ;;  %v2123_v46 = vsel %vm1979_vm11, %v2118_v23, 0 }
 0x52a   : > { %v2124_v59 = vadd.s32 %v2121_v29, %v2120_v15  ;;  %v2125_v21 = vadd.s32 %v2123_v46, %v2122_v36 }
 0x52c   : > { %v2126_v41 = vadd.s32 %v2125_v21, %v2124_v59 }
 0x52e   : > { %v2128_v0 = vshrl.u32 %v2126_v41, 16  ;;  %v2127_v25 = vand.u32 65535, %v2126_v41 }
 0x530   : > { %v2130_v60 = vcvt.s32.f32 %v2128_v0  ;;  %v2129_v43 = vcvt.s32.f32 %v2127_v25 }
 0x532   : > { %2133 = vadd.xlane.f32.xlu0 %v2130_v60 }
 0x536   : > { %2131 = vadd.xlane.f32.xlu0 %v2129_v43 }
 0x5bb   : > { %v2134_v12 = vpop.xlane.xlu0 %2133 }
 0x5bc   : > { %v2136_v63 = vcvt.f32.s32 %v2134_v12 }
 0x5be   : > { %v2137_v27 = vshll.u32 %v2136_v63, 16 }
 0x5bf   : > { %v2132_v57 = vpop.xlane.xlu0 %2131 }
 0x5c0   : > { %v2135_v1 = vcvt.f32.s32 %v2132_v57 }
 0x5c2   : > { %v2138_v50 = vadd.s32 %v2137_v27, %v2135_v1 }
 0x5c4   : > { %v2139_v5 = vrot.slane %v2138_v50, 4 }
 0x5c6   : > { %v2140_v7 = vadd.s32 %v2139_v5, %v2138_v50 }
 0x5c8   : > { %v2141_v37 = vrot.slane %v2140_v7, 2 }
 0x5ca   : > { %v2142_v14 = vadd.s32 %v2141_v37, %v2140_v7 }
 0x5cc   : > { %v2143_v24 = vrot.slane %v2142_v14, 1 }
 0x5ce   : > { %v2144_v49 = vadd.s32 %v2143_v24, %v2142_v14 }
 0x5d0   : > { %4386 = vpush %v2144_v49 }
 0x601   : > { %s4387_s23 = spop %4386 }
 0x602   : > { %p2146_p1 = scmp.ge.s32.totalorder %s4387_s23, 25  ;;  %2100 = sbr.rel (!%p2098_p2) target bundleno = 1314 (0x522), region = 138 }
 0x604   : > { %s2147_s24 = scalar_select %p2146_p1, %s6782_s7, %s4811_s3  }
 0x605   : > { %s9711_s5 = smov (!%p2146_p1, %s4807_s5), %s6782_s7 }
 0x606   : > { %s9509_s3 = smov %s2147_s24  ;;  %v2149_v39 = vstv (%p2098_p2), %s2147_s24 }
 0x607   :  { %vm2150_vm8 = vcmp.ge.s32.totalorder %v6506_v10, %v2149_v39  ;;  %vm2151_vm10 = vcmp.ge.s32.totalorder %v6522_v52, %v2149_v39  ;;  %vm2152_vm13 = vcmp.ge.s32.totalorder %v6538_v18, %v2149_v39  ;;  %vm2153_vm14 = vcmp.ge.s32.totalorder %v6554_v9, %v2149_v39 }
 0x608   :  { %vm2154_vm15 = vcmp.ge.s32.totalorder %v6570_v20, %v2149_v39  ;;  %vm2155_vm0 = vcmp.ge.s32.totalorder %v6586_v58, %v2149_v39  ;;  %vm2156_vm1 = vcmp.ge.s32.totalorder %v6602_v47, %v2149_v39  ;;  %vm2157_vm2 = vcmp.ge.s32.totalorder %v6612_v19, %v2149_v39  ;;  %v9510_v20 = vld [vmem:[#allocation45_spill] sm:$0xff] }
 0x609   :  { %v6813_v45 = vsel %vm2150_vm8, %v6490_v48, 0.0  ;;  %v6816_v28 = vsel %vm2151_vm10, %v6498_v13, 0.0  ;;  %v6819_v10 = vsel %vm2152_vm13, %v6511_v35, 0.0  ;;  %v6822_v52 = vsel %vm2153_vm14, %v6527_v26, 0.0  ;;  %v9511_v48 = vld [vmem:[#allocation47_spill] sm:$0xff] }
 0x60a   :  { %v6825_v9 = vsel %vm2154_vm15, %v6543_v61, 0.0  ;;  %v6828_v58 = vsel %vm2155_vm0, %v6559_v62, 0.0  ;;  %v6831_v19 = vsel %vm2156_vm1, %v9510_v20, 0.0  ;;  %v6834_v18 = vsel %vm2157_vm2, %v9511_v48, 0.0 }
 0x60b LB: > { %s2174_s28 = sshra.s32 %s4823_s26, 1  ;;  %s2175_s0 = sshra.s32 %s4819_s25, 1  ;;  %v9512_v13 = vld [vmem:[#allocation13_spill] sm:$0xff]  ;;  %v9513_v35 = vld [vmem:[#allocation19_spill] sm:$0xff]  ;;  %v9514_v26 = vld [vmem:[#allocation42_spill] sm:$0xff]  ;;  %v4854_v47 = vmov 0   ;;  %s4827_s27 = sphi %s6840_s27, %s2171_s27   ;;  %s4823_s26 = sphi %s6838_s26, %s9516_s26   ;;  %s4819_s25 = sphi %s6836_s25, %s9713_s25  }
 0x60c   : > { %s2176_s8 = sadd.s32 %s2175_s0, %s2174_s28  ;;  %s2177_s16 = sand.u32 %s4819_s25, %s4823_s26  ;;  %v9515_v61 = vld [vmem:[#allocation40_spill] sm:$0xff] }
 0x60d   : > { %s2178_s2 = sand.u32 1, %s2177_s16  ;;  %s2171_s27 = sadd.s32 1, %s4827_s27  }
 0x60e   : > { %s6855_s29 = sadd.s32 %s2178_s2, %s2176_s8  ;;  %p2168_p4 = scmp.ge.s32.totalorder %s2171_s27, 34  }
 0x60f   : > { %v2180_v62 = vstv %s6855_s29  ;;  %2236 = vst [vmem:[%s9231_s9] sm:$0xff] (%p2168_p4), %v6667_v40  ;;  %2237 = vst [vmem:[%s9231_s9 + $0x8] sm:$0xff] (%p2168_p4), %v6670_v55  ;;  %v9517_v14 = vmov (%p2168_p4), 0   ;;  %s4855_s3 = smov (%p2168_p4), 9   ;;  %v9518_v24 = vld [vmem:[#allocation19_spill] sm:$0xff] (%p2168_p4)  ;;  %v9519_v49 = vld [vmem:[#allocation13_spill] sm:$0xff] (%p2168_p4)  ;;  %s4856_s2 = smov (%p2168_p4), 1  }
 0x610   : > { %vm2181_vm4 = vcmp.ge.s32.totalorder %v9512_v13, %v2180_v62  ;;  %vm2182_vm5 = vcmp.ge.s32.totalorder %v9513_v35, %v2180_v62  ;;  %vm2183_vm8 = vcmp.ge.s32.totalorder %v9514_v26, %v2180_v62  ;;  %vm2184_vm10 = vcmp.ge.s32.totalorder %v9515_v61, %v2180_v62  ;;  %2238 = vst [vmem:[%s9231_s9 + $0x10] sm:$0xff] (%p2168_p4), %v6740_v8  ;;  %v9520_v39 = vld [vmem:[#allocation40_spill] sm:$0xff] (%p2168_p4)  ;;  %v9521_v20 = vld [vmem:[#allocation37_spill] sm:$0xff] (%p2168_p4)  ;;  %v9522_v62 = vld [vmem:[#allocation35_spill] sm:$0xff] (%p2168_p4) }
 0x611   : > { %v2185_v33 = vsel %vm2181_vm4, 1, %v4854_v47  ;;  %v2186_v38 = vsel %vm2182_vm5, 1, %v4854_v47  ;;  %v2187_v54 = vsel %vm2183_vm8, 1, %v4854_v47  ;;  %v2188_v30 = vsel %vm2184_vm10, 1, %v4854_v47  ;;  %2239 = vst [vmem:[%s9231_s9 + $0x18] sm:$0xff] (%p2168_p4), %v6743_v56  ;;  %2240 = vst [vmem:[%s9231_s9 + $0x20] sm:$0xff] (%p2168_p4), %v6813_v45  ;;  %3914 = vmatprep.mubr.bf16.mxu1 (%p2168_p4), %v9517_v14  ;;  %4568 = vset.pattern.permute.xlu1 (%p2168_p4), %v9517_v14 }
 0x612   : > { %v2190_v22 = vsel %vm1979_vm11, %v2185_v33, 0  ;;  %v2191_v53 = vsel %vm1979_vm11, %v2186_v38, 0  ;;  %v2192_v51 = vsel %vm1979_vm11, %v2187_v54, 0  ;;  %v2193_v23 = vsel %vm1979_vm11, %v2188_v30, 0  ;;  %2241 = vst [vmem:[%s9231_s9 + $0x28] sm:$0xff] (%p2168_p4), %v6816_v28  ;;  %2244 = vst [vmem:[%s9231_s9 + $0x40] sm:$0xff] (%p2168_p4), %v6673_v11  ;;  %2288 = vrot.lane.b32.xlu1 (%p2168_p4), %v6679_v2, %s4855_s3  ;;  %4567 = vset.pattern.permute.xlu0 (%p2168_p4), %v9517_v14 }
 0x613   : > { %v2194_v15 = vadd.s32 %v2191_v53, %v2190_v22  ;;  %v2195_v29 = vadd.s32 %v2193_v23, %v2192_v51  ;;  %2245 = vst [vmem:[%s9231_s9 + $0x48] sm:$0xff] (%p2168_p4), %v6676_v6  ;;  %2246 = vst [vmem:[%s9231_s9 + $0x50] sm:$0xff] (%p2168_p4), %v6746_v42  ;;  %v9523_v35 = vld [vmem:[#allocation20_spill] sm:$0xff] (%p2168_p4)  ;;  %v9524_v61 = vld [vmem:[#allocation42_spill] sm:$0xff] (%p2168_p4)  ;;  %vm3824_vm8 = vcmask (%p2168_p4), 261120  }
 0x614   :  { %2247 = vst [vmem:[%s9231_s9 + $0x58] sm:$0xff] (%p2168_p4), %v6749_v16  ;;  %2248 = vst [vmem:[%s9231_s9 + $0x60] sm:$0xff] (%p2168_p4), %v6819_v10  ;;  %v9525_v47 = vld [vmem:[#allocation16_spill] sm:$0xff] (%p2168_p4)  ;;  %v9526_v38 = vld [vmem:[#allocation17_spill] sm:$0xff] (%p2168_p4) }
 0x615   : > { %v2196_v36 = vadd.s32 %v2195_v29, %v2194_v15  ;;  %2249 = vst [vmem:[%s9231_s9 + $0x68] sm:$0xff] (%p2168_p4), %v6822_v52  ;;  %2252 = vst [vmem:[%s9231_s9 + $0x80] sm:$0xff] (%p2168_p4), %v6679_v2  ;;  %v9527_v54 = vld [vmem:[#allocation14_spill] sm:$0xff] (%p2168_p4)  ;;  %v9529_v22 = vld [vmem:[#allocation15_spill] sm:$0xff] (%p2168_p4) }
 0x616   :  { %2253 = vst [vmem:[%s9231_s9 + $0x88] sm:$0xff] (%p2168_p4), %v6682_v34  ;;  %2254 = vst [vmem:[%s9231_s9 + $0x90] sm:$0xff] (%p2168_p4), %v6752_v32  ;;  %v9528_v30 = vld [vmem:[#allocation46_spill] sm:$0xff] (%p2168_p4)  ;;  %v9530_v51 = vld [vmem:[#allocation36_spill] sm:$0xff] (%p2168_p4)  ;;  %2290 = vrot.lane.b32.xlu1 (%p2168_p4), %v6685_v31, %s4855_s3 }
 0x617   : > { %v2198_v46 = vshrl.u32 %v2196_v36, 16  ;;  %v2197_v59 = vand.u32 65535, %v2196_v36  ;;  %2255 = vst [vmem:[%s9231_s9 + $0x98] sm:$0xff] (%p2168_p4), %v6755_v44  ;;  %2256 = vst [vmem:[%s9231_s9 + $0xa0] sm:$0xff] (%p2168_p4), %v6825_v9  ;;  %v9531_v15 = vld [vmem:[#allocation18_spill] sm:$0xff] (%p2168_p4)  ;;  %v9532_v36 = vld [vmem:[#allocation49_spill] sm:$0xff] (%p2168_p4) }
 0x618   :  { %2257 = vst [vmem:[%s9231_s9 + $0xa8] sm:$0xff] (%p2168_p4), %v6828_v58  ;;  %2260 = vst [vmem:[%s9231_s9 + $0xc0] sm:$0xff] (%p2168_p4), %v6685_v31 }
 0x619   : > { %v2200_v21 = vcvt.s32.f32 %v2198_v46  ;;  %v2199_v41 = vcvt.s32.f32 %v2197_v59  ;;  %2261 = vst [vmem:[%s9231_s9 + $0xc8] sm:$0xff] (%p2168_p4), %v6688_v4  ;;  %2262 = vst [vmem:[%s9231_s9 + $0xd0] sm:$0xff] (%p2168_p4), %v6758_v3  ;;  %v9533_v46 = vld [vmem:[#allocation43_spill] sm:$0xff] (%p2168_p4) }
 0x61a   :  { %2263 = vst [vmem:[%s9231_s9 + $0xd8] sm:$0xff] (%p2168_p4), %v6761_v17  ;;  %2264 = vst [vmem:[%s9231_s9 + $0xe0] sm:$0xff] (%p2168_p4), %v6831_v19  ;;  %2294 = vrot.lane.b32.xlu1 (%p2168_p4), %v6676_v6, %s4855_s3 }
 0x61b   : > { %2203 = vadd.xlane.f32.xlu0 %v2200_v21  ;;  %2265 = vst [vmem:[%s9231_s9 + $0xe8] sm:$0xff] (%p2168_p4), %v6834_v18 }
 0x61e   :  { %2298 = vrot.lane.b32.xlu1 (%p2168_p4), %v6688_v4, %s4855_s3 }
 0x61f   : > { %2201 = vadd.xlane.f32.xlu0 %v2199_v41 }
 0x622   :  { %2302 = vrot.lane.b32.xlu1 (%p2168_p4), %v6746_v42, %s4855_s3 }
 0x626   :  { %2306 = vrot.lane.b32.xlu1 (%p2168_p4), %v6758_v3, %s4855_s3 }
 0x62a   :  { %2310 = vrot.lane.b32.xlu1 (%p2168_p4), %v6749_v16, %s4855_s3 }
 0x62e   :  { %2314 = vrot.lane.b32.xlu1 (%p2168_p4), %v6761_v17, %s4855_s3 }
 0x632   :  { %2318 = vrot.lane.b32.xlu1 (%p2168_p4), %v6819_v10, %s4855_s3 }
 0x635   :  { %2284 = vrot.lane.b32.xlu0 (%p2168_p4), %v6667_v40, %s4855_s3 }
 0x636   :  { %2322 = vrot.lane.b32.xlu1 (%p2168_p4), %v6831_v19, %s4855_s3 }
 0x639   :  { %2286 = vrot.lane.b32.xlu0 (%p2168_p4), %v6673_v11, %s4855_s3 }
 0x63a   :  { %2326 = vrot.lane.b32.xlu1 (%p2168_p4), %v6822_v52, %s4855_s3 }
 0x63d   :  { %2292 = vrot.lane.b32.xlu0 (%p2168_p4), %v6670_v55, %s4855_s3 }
 0x63e   :  { %2330 = vrot.lane.b32.xlu1 (%p2168_p4), %v6834_v18, %s4855_s3 }
 0x641   :  { %2296 = vrot.lane.b32.xlu0 (%p2168_p4), %v6682_v34, %s4855_s3 }
 0x645   :  { %2300 = vrot.lane.b32.xlu0 (%p2168_p4), %v6740_v8, %s4855_s3 }
 0x649   :  { %2304 = vrot.lane.b32.xlu0 (%p2168_p4), %v6752_v32, %s4855_s3 }
 0x64d   :  { %2308 = vrot.lane.b32.xlu0 (%p2168_p4), %v6743_v56, %s4855_s3 }
 0x651   :  { %2312 = vrot.lane.b32.xlu0 (%p2168_p4), %v6755_v44, %s4855_s3 }
 0x655   :  { %2316 = vrot.lane.b32.xlu0 (%p2168_p4), %v6813_v45, %s4855_s3 }
 0x659   :  { %2320 = vrot.lane.b32.xlu0 (%p2168_p4), %v6825_v9, %s4855_s3 }
 0x65d   :  { %2324 = vrot.lane.b32.xlu0 (%p2168_p4), %v6816_v28, %s4855_s3 }
 0x661   :  { %2328 = vrot.lane.b32.xlu0 (%p2168_p4), %v6828_v58, %s4855_s3 }
 0x684   :  { %v7140_v28 = vpop.permute.xlu1 (%p2168_p4), %2288 }
 0x688   :  { %v7148_v58 = vpop.permute.xlu1 (%p2168_p4), %2290 }
 0x68c   :  { %v7156_v21 = vpop.permute.xlu1 (%p2168_p4), %2294 }
 0x6a4   : > { %v2204_v0 = vpop.xlane.xlu0 %2203 }
 0x6a5   : > { %v2206_v25 = vcvt.f32.s32 %v2204_v0  ;;  %v7164_v0 = vpop.permute.xlu1 (%p2168_p4), %2298 }
 0x6a7   : > { %v2207_v43 = vshll.u32 %v2206_v25, 16 }
 0x6a8   : > { %v2202_v60 = vpop.xlane.xlu0 %2201 }
 0x6a9   : > { %v2205_v12 = vcvt.f32.s32 %v2202_v60  ;;  %v7172_v60 = vpop.permute.xlu1 (%p2168_p4), %2302 }
 0x6aa   :  { %9534 = vst [vmem:[#allocation21_spill] sm:$0xff] (%p2168_p4), %v7172_v60 }
 0x6ab   : > { %v2208_v63 = vadd.s32 %v2207_v43, %v2205_v12 }
 0x6ac   :  { %v7142_v52 = vpop.permute.xlu0 (%p2168_p4), %2284 }
 0x6ad   : > { %v2209_v57 = vrot.slane %v2208_v63, 4  ;;  %v7180_v12 = vpop.permute.xlu1 (%p2168_p4), %2306 }
 0x6ae   :  { %9536 = vst [vmem:[#allocation51_spill] sm:$0xff] (%p2168_p4), %v7180_v12 }
 0x6af   : > { %v2210_v27 = vadd.s32 %v2209_v57, %v2208_v63 }
 0x6b0   :  { %v7150_v18 = vpop.permute.xlu0 (%p2168_p4), %2286 }
 0x6b1   : > { %v2211_v1 = vrot.slane %v2210_v27, 2  ;;  %v7188_v57 = vpop.permute.xlu1 (%p2168_p4), %2310 }
 0x6b2   :  { %9538 = vst [vmem:[#allocation38_spill] sm:$0xff] (%p2168_p4), %v7188_v57 }
 0x6b3   : > { %v2212_v50 = vadd.s32 %v2211_v1, %v2210_v27 }
 0x6b4   :  { %v7158_v41 = vpop.permute.xlu0 (%p2168_p4), %2292 }
 0x6b5   : > { %v2213_v5 = vrot.slane %v2212_v50, 1  ;;  %v7196_v1 = vpop.permute.xlu1 (%p2168_p4), %2314 }
 0x6b6   :  { %9540 = vst [vmem:[#allocation22_spill] sm:$0xff] (%p2168_p4), %v7196_v1 }
 0x6b7   : > { %v2214_v7 = vadd.s32 %v2213_v5, %v2212_v50 }
 0x6b8   :  { %v7166_v25 = vpop.permute.xlu0 (%p2168_p4), %2296 }
 0x6b9   : > { %4388 = vpush %v2214_v7  ;;  %v7204_v5 = vpop.permute.xlu1 (%p2168_p4), %2318 }
 0x6ba   :  { %9542 = vst [vmem:[#allocation48_spill] sm:$0xff] (%p2168_p4), %v7204_v5 }
 0x6bc   :  { %v7174_v43 = vpop.permute.xlu0 (%p2168_p4), %2300 }
 0x6bd   :  { %9535 = vst [vmem:[#allocation23_spill] sm:$0xff] (%p2168_p4), %v7174_v43  ;;  %v7345_v43 = vld [vmem:[#allocation9] sm:$0xff] (%p2168_p4) }
 0x6c0   :  { %v7182_v63 = vpop.permute.xlu0 (%p2168_p4), %2304 }
 0x6c1   :  { %9537 = vst [vmem:[#allocation50_spill] sm:$0xff] (%p2168_p4), %v7182_v63 }
 0x6c4   :  { %v7190_v27 = vpop.permute.xlu0 (%p2168_p4), %2308 }
 0x6c5   :  { %9539 = vst [vmem:[#allocation39_spill] sm:$0xff] (%p2168_p4), %v7190_v27 }
 0x6c8   :  { %v7198_v50 = vpop.permute.xlu0 (%p2168_p4), %2312 }
 0x6c9   :  { %9541 = vst [vmem:[#allocation52_spill] sm:$0xff] (%p2168_p4), %v7198_v50 }
 0x6cc   :  { %v7206_v7 = vpop.permute.xlu0 (%p2168_p4), %2316 }
 0x6cd   :  { %9543 = vst [vmem:[#allocation41_spill] sm:$0xff] (%p2168_p4), %v7206_v7 }
 0x6ea   : > { %s4389_s11 = spop %4388 }
 0x6eb   : > { %p2216_p3 = scmp.ge.s32.totalorder %s4389_s11, 25  ;;  %2170 = sbr.rel (!%p2168_p4) target bundleno = 1547 (0x60b), region = 149 }
 0x6ed   : > { %s2217_s13 = scalar_select %p2216_p3, %s6855_s29, %s4823_s26  }
 0x6ee   : > { %s9713_s25 = smov (!%p2216_p3, %s4819_s25), %s6855_s29  ;;  %s4857_s29 = smov (%p2168_p4), 121  }
 0x6ef   : > { %s9516_s26 = smov %s2217_s13  ;;  %v2219_v37 = vstv (%p2168_p4), %s2217_s13 }
 0x6f0   :  { %vm2222_vm11 = vcmp.ge.s32.totalorder %v9518_v24, %v2219_v37  ;;  %vm2220_vm13 = vcmp.ge.s32.totalorder %v9519_v49, %v2219_v37  ;;  %vm2226_vm14 = vcmp.ge.s32.totalorder %v9520_v39, %v2219_v37  ;;  %vm2224_vm15 = vcmp.ge.s32.totalorder %v9524_v61, %v2219_v37  ;;  %v7214_v24 = vpop.permute.xlu0 %2320 }
 0x6f1   :  { %v2230_v48 = vsel %vm2222_vm11, %v9521_v20, 0.0  ;;  %v2228_v13 = vsel %vm2220_vm13, %v9522_v62, 0.0  ;;  %v2234_v26 = vsel %vm2226_vm14, %v9523_v35, 0.0  ;;  %v2232_v33 = vsel %vm2224_vm15, %v9525_v47, 0.0  ;;  %9545 = vst [vmem:[#allocation53_spill] sm:$0xff] %v7214_v24  ;;  %v9566_v24 = vld [vmem:[#allocation24_spill] sm:$0xff] }
 0x6f2   :  { %2250 = vst [vmem:[%s9231_s9 + $0x70] sm:$0xff] %v2230_v48  ;;  %2242 = vst [vmem:[%s9231_s9 + $0x30] sm:$0xff] %v2228_v13  ;;  %vm2223_vm0 = vcmp.ge.s32.totalorder %v9526_v38, %v2219_v37  ;;  %vm2221_vm1 = vcmp.ge.s32.totalorder %v9527_v54, %v2219_v37  ;;  %vm2227_vm2 = vcmp.ge.s32.totalorder %v9528_v30, %v2219_v37  ;;  %2334 = vrot.lane.b32.xlu1 %v2230_v48, %s4855_s3 }
 0x6f3   :  { %2266 = vst [vmem:[%s9231_s9 + $0xf0] sm:$0xff] %v2234_v26  ;;  %2258 = vst [vmem:[%s9231_s9 + $0xb0] sm:$0xff] %v2232_v33  ;;  %v7004_v53 = vsel %vm2223_vm0, %v9529_v22, 0.0  ;;  %v7007_v23 = vsel %vm2221_vm1, %v9530_v51, 0.0  ;;  %v7010_v29 = vsel %vm2227_vm2, %v9531_v15, 0.0  ;;  %vm2225_vm4 = vcmp.ge.s32.totalorder %v9532_v36, %v2219_v37  ;;  %2332 = vrot.lane.b32.xlu0 %v2228_v13, %s4855_s3  ;;  %v7212_v37 = vpop.permute.xlu1 %2322 }
 0x6f4   :  { %2251 = vst [vmem:[%s9231_s9 + $0x78] sm:$0xff] %v7004_v53  ;;  %2243 = vst [vmem:[%s9231_s9 + $0x38] sm:$0xff] %v7007_v23  ;;  %v7030_v59 = vsel %vm2225_vm4, %v9533_v46, 0.0  ;;  %v7222_v39 = vpop.permute.xlu0 %2324  ;;  %vm2829_vm5 = vcmp.lt.s32.totalorder %v9566_v24, 1  ;;  %vm2348_vm10 = vcmp.lt.s32.totalorder %v9566_v24, 9  ;;  %vm3214_vm11 = vcmp.lt.s32.totalorder %v9566_v24, 121 }
 0x6f5   :  { %2267 = vst [vmem:[%s9231_s9 + $0xf8] sm:$0xff] %v7010_v29  ;;  %2259 = vst [vmem:[%s9231_s9 + $0xb8] sm:$0xff] %v7030_v59 }
 0x6f6   :  { %2338 = vrot.lane.b32.xlu1 %v2234_v26, %s4855_s3  ;;  %9544 = vst [vmem:[#allocation25_spill] sm:$0xff] %v7212_v37  ;;  %9547 = vst [vmem:[#allocation28_spill] sm:$0xff] %v7222_v39  ;;  %v9567_v37 = vld [vmem:[#allocation29_spill] sm:$0xff] }
 0x6f7   :  { %2336 = vrot.lane.b32.xlu0 %v2232_v33, %s4855_s3  ;;  %v7220_v49 = vpop.permute.xlu1 %2326  ;;  %v2865_v63 = vrot.slane %v7345_v43, %v9567_v37 }
 0x6f8   :  { %9546 = vst [vmem:[#allocation44_spill] sm:$0xff] %v7220_v49  ;;  %v7230_v48 = vpop.permute.xlu0 %2328 }
 0x6f9   :  { %9549 = vst [vmem:[#allocation47_spill] sm:$0xff] %v7230_v48 }
 0x6fa   :  { %2342 = vrot.lane.b32.xlu1 %v7004_v53, %s4855_s3 }
 0x6fb   :  { %2340 = vrot.lane.b32.xlu0 %v7007_v23, %s4855_s3  ;;  %v7228_v20 = vpop.permute.xlu1 %2330 }
 0x6fc   :  { %9548 = vst [vmem:[#allocation45_spill] sm:$0xff] %v7228_v20  ;;  %v7332_v20 = vld [vmem:[#allocation9 + $0x8] sm:$0xff] }
 0x6fd   :  { %v2869_v7 = vrot.slane %v7332_v20, %v9567_v37 }
 0x6fe   :  { %2346 = vrot.lane.b32.xlu1 %v7010_v29, %s4855_s3 }
 0x6ff   :  { %2344 = vrot.lane.b32.xlu0 %v7030_v59, %s4855_s3 }
 0x702   :  { %2447 = vrot.lane.b32.xlu1 %v6673_v11, %s4837_s30 }
 0x703   :  { %2445 = vrot.lane.b32.xlu0 %v6667_v40, %s4837_s30 }
 0x706   :  { %2451 = vrot.lane.b32.xlu1 %v6685_v31, %s4837_s30 }
 0x707   :  { %2449 = vrot.lane.b32.xlu0 %v6679_v2, %s4837_s30 }
 0x70a   :  { %2455 = vrot.lane.b32.xlu1 %v6676_v6, %s4837_s30 }
 0x70b   :  { %2453 = vrot.lane.b32.xlu0 %v6670_v55, %s4837_s30 }
 0x70e   :  { %2459 = vrot.lane.b32.xlu1 %v6688_v4, %s4837_s30 }
 0x70f   :  { %2457 = vrot.lane.b32.xlu0 %v6682_v34, %s4837_s30 }
 0x712   :  { %2463 = vrot.lane.b32.xlu1 %v6746_v42, %s4837_s30 }
 0x713   :  { %2461 = vrot.lane.b32.xlu0 %v6740_v8, %s4837_s30 }
 0x716   :  { %2467 = vrot.lane.b32.xlu1 %v6758_v3, %s4837_s30 }
 0x717   :  { %2465 = vrot.lane.b32.xlu0 %v6752_v32, %s4837_s30 }
 0x71a   :  { %2471 = vrot.lane.b32.xlu1 %v6749_v16, %s4837_s30 }
 0x71b   :  { %2469 = vrot.lane.b32.xlu0 %v6743_v56, %s4837_s30 }
 0x71e   :  { %2475 = vrot.lane.b32.xlu1 %v6761_v17, %s4837_s30 }
 0x71f   :  { %2473 = vrot.lane.b32.xlu0 %v6755_v44, %s4837_s30 }
 0x722   :  { %2771 = vrot.lane.b32.xlu1 %v6685_v31, %s4856_s2 }
 0x723   :  { %2769 = vrot.lane.b32.xlu0 %v6679_v2, %s4856_s2 }
 0x726   :  { %2779 = vrot.lane.b32.xlu1 %v6688_v4, %s4856_s2 }
 0x727   :  { %2777 = vrot.lane.b32.xlu0 %v6682_v34, %s4856_s2 }
 0x72a   :  { %2827 = vrot.lane.b32.xlu1 %v7010_v29, %s4856_s2 }
 0x72b   :  { %2825 = vrot.lane.b32.xlu0 %v7030_v59, %s4856_s2 }
 0x72e   :  { %2767 = vrot.lane.b32.xlu1 %v6673_v11, %s4856_s2 }
 0x72f   :  { %2765 = vrot.lane.b32.xlu0 %v6667_v40, %s4856_s2 }
 0x732   :  { %2775 = vrot.lane.b32.xlu1 %v6676_v6, %s4856_s2 }
 0x733   :  { %2773 = vrot.lane.b32.xlu0 %v6670_v55, %s4856_s2 }
 0x736   :  { %2823 = vrot.lane.b32.xlu1 %v7004_v53, %s4856_s2 }
 0x737   :  { %2821 = vrot.lane.b32.xlu0 %v7007_v23, %s4856_s2 }
 0x73a   :  { %3485 = vrot.lane.b32.xlu1 %v6688_v4, %s4841_s12 }
 0x73b   :  { %3483 = vrot.lane.b32.xlu0 %v6682_v34, %s4841_s12 }
 0x73e   :  { %3493 = vrot.lane.b32.xlu1 %v6758_v3, %s4841_s12 }
 0x73f   :  { %3491 = vrot.lane.b32.xlu0 %v6752_v32, %s4841_s12 }
 0x742   :  { %2611 = vrot.lane.b32.xlu1 %v6685_v31, %s4847_s21 }
 0x743   :  { %2609 = vrot.lane.b32.xlu0 %v6679_v2, %s4847_s21 }
 0x746   :  { %2619 = vrot.lane.b32.xlu1 %v6688_v4, %s4847_s21 }
 0x747   :  { %2617 = vrot.lane.b32.xlu0 %v6682_v34, %s4847_s21 }
 0x74a   :  { %3477 = vrot.lane.b32.xlu1 %v6685_v31, %s4841_s12 }
 0x74b   :  { %3475 = vrot.lane.b32.xlu0 %v6679_v2, %s4841_s12 }
 0x74e   :  { %2667 = vrot.lane.b32.xlu1 %v7010_v29, %s4847_s21 }
 0x74f   :  { %2665 = vrot.lane.b32.xlu0 %v7030_v59, %s4847_s21 }
 0x752   :  { %3481 = vrot.lane.b32.xlu1 %v6676_v6, %s4841_s12 }
 0x753   :  { %3479 = vrot.lane.b32.xlu0 %v6670_v55, %s4841_s12 }
 0x756   :  { %3489 = vrot.lane.b32.xlu1 %v6746_v42, %s4841_s12 }
 0x757   :  { %3487 = vrot.lane.b32.xlu0 %v6740_v8, %s4841_s12 }
 0x75a   :  { %2607 = vrot.lane.b32.xlu1 %v6673_v11, %s4847_s21 }
 0x75b   :  { %2605 = vrot.lane.b32.xlu0 %v6667_v40, %s4847_s21 }
 0x75e   :  { %2615 = vrot.lane.b32.xlu1 %v6676_v6, %s4847_s21 }
 0x75f   :  { %2613 = vrot.lane.b32.xlu0 %v6670_v55, %s4847_s21 }
 0x762   :  { %3473 = vrot.lane.b32.xlu1 %v6673_v11, %s4841_s12 }
 0x763   :  { %3471 = vrot.lane.b32.xlu0 %v6667_v40, %s4841_s12 }
 0x764   :  { %v7236_v62 = vpop.permute.xlu1 %2334 }
 0x765   :  { %9550 = vst [vmem:[#allocation19_spill] sm:$0xff] %v7236_v62  ;;  %v7238_v13 = vpop.permute.xlu0 %2332 }
 0x766   :  { %9551 = vst [vmem:[#allocation13_spill] sm:$0xff] %v7238_v13  ;;  %2663 = vrot.lane.b32.xlu1 %v7004_v53, %s4847_s21 }
 0x767   :  { %2661 = vrot.lane.b32.xlu0 %v7007_v23, %s4847_s21 }
 0x768   :  { %v7244_v35 = vpop.permute.xlu1 %2338 }
 0x769   :  { %9552 = vst [vmem:[#allocation40_spill] sm:$0xff] %v7244_v35  ;;  %v7246_v26 = vpop.permute.xlu0 %2336 }
 0x76a   :  { %9553 = vst [vmem:[#allocation37_spill] sm:$0xff] %v7246_v26  ;;  %2787 = vrot.lane.b32.xlu1 %v6758_v3, %s4856_s2 }
 0x76b   :  { %2785 = vrot.lane.b32.xlu0 %v6752_v32, %s4856_s2 }
 0x76c   :  { %v7252_v61 = vpop.permute.xlu1 %2342 }
 0x76d   :  { %9554 = vst [vmem:[#allocation35_spill] sm:$0xff] %v7252_v61  ;;  %v7254_v47 = vpop.permute.xlu0 %2340 }
 0x76e   :  { %9555 = vst [vmem:[#allocation20_spill] sm:$0xff] %v7254_v47  ;;  %2795 = vrot.lane.b32.xlu1 %v6761_v17, %s4856_s2 }
 0x76f   :  { %2793 = vrot.lane.b32.xlu0 %v6755_v44, %s4856_s2 }
 0x770   :  { %v7260_v33 = vpop.permute.xlu1 %2346 }
 0x771   :  { %9556 = vst [vmem:[#allocation42_spill] sm:$0xff] %v7260_v33  ;;  %v7262_v38 = vpop.permute.xlu0 %2344 }
 0x772   :  { %9557 = vst [vmem:[#allocation16_spill] sm:$0xff] %v7262_v38  ;;  %2507 = vrot.lane.b32.xlu1 %v7010_v29, %s4837_s30 }
 0x773   :  { %2505 = vrot.lane.b32.xlu0 %v7030_v59, %s4837_s30 }
 0x774   :  { %v7268_v54 = vpop.permute.xlu1 %2447 }
 0x775   :  { %v7270_v30 = vpop.permute.xlu0 %2445 }
 0x776   :  { %2783 = vrot.lane.b32.xlu1 %v6746_v42, %s4856_s2 }
 0x777   :  { %2781 = vrot.lane.b32.xlu0 %v6740_v8, %s4856_s2 }
 0x778   :  { %v7276_v22 = vpop.permute.xlu1 %2451 }
 0x779   :  { %v7278_v51 = vpop.permute.xlu0 %2449 }
 0x77a   :  { %2791 = vrot.lane.b32.xlu1 %v6749_v16, %s4856_s2 }
 0x77b   :  { %2789 = vrot.lane.b32.xlu0 %v6743_v56, %s4856_s2 }
 0x77c   :  { %v7284_v15 = vpop.permute.xlu1 %2455 }
 0x77d   :  { %v7286_v29 = vpop.permute.xlu0 %2453 }
 0x77e   :  { %2503 = vrot.lane.b32.xlu1 %v7004_v53, %s4837_s30 }
 0x77f   :  { %2501 = vrot.lane.b32.xlu0 %v7007_v23, %s4837_s30 }
 0x780   :  { %v7292_v36 = vpop.permute.xlu1 %2459 }
 0x781   :  { %v7294_v46 = vpop.permute.xlu0 %2457 }
 0x782   :  { %2627 = vrot.lane.b32.xlu1 %v6758_v3, %s4847_s21 }
 0x783   :  { %2625 = vrot.lane.b32.xlu0 %v6752_v32, %s4847_s21 }
 0x784   :  { %v7300_v59 = vpop.permute.xlu1 %2463 }
 0x785   :  { %9558 = vst [vmem:[#allocation17_spill] sm:$0xff] %v7300_v59  ;;  %v7302_v13 = vpop.permute.xlu0 %2461 }
 0x786   :  { %9559 = vst [vmem:[#allocation14_spill] sm:$0xff] %v7302_v13  ;;  %2635 = vrot.lane.b32.xlu1 %v6761_v17, %s4847_s21 }
 0x787   :  { %2633 = vrot.lane.b32.xlu0 %v6755_v44, %s4847_s21 }
 0x788   :  { %v7308_v53 = vpop.permute.xlu1 %2467 }
 0x789   :  { %9560 = vst [vmem:[#allocation46_spill] sm:$0xff] %v7308_v53  ;;  %v7310_v23 = vpop.permute.xlu0 %2465  ;;  %v4360_v53 = vld [vmem:[#allocation9 + $0x40] ss:$0 sm:$0xff] }
 0x78a   :  { %9561 = vst [vmem:[#allocation15_spill] sm:$0xff] %v7310_v23  ;;  %2623 = vrot.lane.b32.xlu1 %v6746_v42, %s4847_s21 }
 0x78b   :  { %2621 = vrot.lane.b32.xlu0 %v6740_v8, %s4847_s21 }
 0x78c   :  { %v7316_v62 = vpop.permute.xlu1 %2471 }
 0x78d   :  { %9562 = vst [vmem:[#allocation36_spill] sm:$0xff] %v7316_v62  ;;  %v7318_v26 = vpop.permute.xlu0 %2469 }
 0x78e   :  { %9563 = vst [vmem:[#allocation18_spill] sm:$0xff] %v7318_v26  ;;  %2631 = vrot.lane.b32.xlu1 %v6749_v16, %s4847_s21 }
 0x78f   :  { %2629 = vrot.lane.b32.xlu0 %v6743_v56, %s4847_s21 }
 0x790   :  { %v7324_v35 = vpop.permute.xlu1 %2475 }
 0x791   :  { %9564 = vst [vmem:[#allocation49_spill] sm:$0xff] %v7324_v35  ;;  %v7326_v39 = vpop.permute.xlu0 %2473 }
 0x792   :  { %9565 = vst [vmem:[#allocation43_spill] sm:$0xff] %v7326_v39  ;;  %3325 = vrot.lane.b32.xlu1 %v6688_v4, %s4844_s19 }
 0x793   :  { %3323 = vrot.lane.b32.xlu0 %v6682_v34, %s4844_s19 }
 0x794   :  { %v2772_v49 = vpop.permute.xlu1 %2771 }
 0x795   :  { %v2770_v48 = vpop.permute.xlu0 %2769 }
 0x796   :  { %3333 = vrot.lane.b32.xlu1 %v6758_v3, %s4844_s19 }
 0x797   :  { %3331 = vrot.lane.b32.xlu0 %v6752_v32, %s4844_s19 }
 0x798   :  { %v7341_v5 = vpop.permute.xlu1 %2779 }
 0x799   :  { %v7343_v27 = vpop.permute.xlu0 %2777  ;;  %v2857_v57 = vsel %vm2829_vm5, %v2772_v49, %v7341_v5 }
 0x79a   :  { %v2856_v60 = vsel %vm2829_vm5, %v2770_v48, %v7343_v27  ;;  %3317 = vrot.lane.b32.xlu1 %v6685_v31, %s4844_s19  ;;  %v2919_v1 = vmul.f32 %v2869_v7, %v2857_v57 }
 0x79b   :  { %v2911_v50 = vmul.f32 %v2869_v7, %v2856_v60  ;;  %3315 = vrot.lane.b32.xlu0 %v6679_v2, %s4844_s19 }
 0x79c   :  { %v7359_v12 = vpop.permute.xlu1 %2827 }
 0x79d   :  { %9568 = vst [vmem:[#allocation24_spill] sm:$0xff] %v7359_v12  ;;  %v7361_v13 = vpop.permute.xlu0 %2825  ;;  %v3688_v26 = vpack.c.bf16 %v2919_v1, %v2911_v50  ;;  %v2861_v59 = vsel %vm2829_vm5, %v7359_v12, %v2772_v49 }
 0x79e   :  { %9569 = vst [vmem:[#allocation29_spill] sm:$0xff] %v7361_v13  ;;  %v2860_v60 = vsel %vm2829_vm5, %v7361_v13, %v2770_v48  ;;  %3321 = vrot.lane.b32.xlu1 %v6676_v6, %s4844_s19  ;;  %v2918_v62 = vmul.f32 %v2865_v63, %v2861_v59 }
 0x79f   :  { %3831 = vmatprep.subr.bf16.mxu0 %v3688_v26  ;;  %v2910_v57 = vmul.f32 %v2865_v63, %v2860_v60  ;;  %3319 = vrot.lane.b32.xlu0 %v6670_v55, %s4844_s19 }
 0x7a0   :  { %v2768_v23 = vpop.permute.xlu1 %2767 }
 0x7a1   :  { %v2766_v39 = vpop.permute.xlu0 %2765  ;;  %v3687_v1 = vpack.c.bf16 %v2918_v62, %v2910_v57 }
 0x7a2   :  { %3329 = vrot.lane.b32.xlu1 %v6746_v42, %s4844_s19 }
 0x7a3   :  { %3832 = vmatpush1.bf16.msra.mxu0 %v3687_v1  ;;  %3327 = vrot.lane.b32.xlu0 %v6740_v8, %s4844_s19 }
 0x7a4   :  { %v7377_v50 = vpop.permute.xlu1 %2775 }
 0x7a5   :  { %v7379_v49 = vpop.permute.xlu0 %2773  ;;  %v2855_v48 = vsel %vm2829_vm5, %v2768_v23, %v7377_v50 }
 0x7a6   :  { %v2854_v26 = vsel %vm2829_vm5, %v2766_v39, %v7379_v49  ;;  %v2903_v62 = vmul.f32 %v2869_v7, %v2855_v48  ;;  %3313 = vrot.lane.b32.xlu1 %v6673_v11, %s4844_s19 }
 0x7a7   :  { %v2895_v59 = vmul.f32 %v2869_v7, %v2854_v26  ;;  %3311 = vrot.lane.b32.xlu0 %v6667_v40, %s4844_s19 }
 0x7a8   :  { %v7391_v60 = vpop.permute.xlu1 %2823 }
 0x7a9   :  { %9570 = vst [vmem:[#allocation54_spill] sm:$0xff] %v7391_v60  ;;  %v7393_v57 = vpop.permute.xlu0 %2821  ;;  %v3680_v1 = vpack.c.bf16 %v2903_v62, %v2895_v59  ;;  %v2859_v13 = vsel %vm2829_vm5, %v7391_v60, %v2768_v23  ;;  %v9574_v60 = vld [vmem:[#allocation31_spill] sm:$0xff] }
 0x7aa   :  { %9571 = vst [vmem:[#allocation55_spill] sm:$0xff] %v7393_v57  ;;  %v2858_v48 = vsel %vm2829_vm5, %v7393_v57, %v2766_v39  ;;  %v2902_v7 = vmul.f32 %v2865_v63, %v2859_v13  ;;  %3164 = vrot.lane.b32.xlu1 %v6688_v4, %s4857_s29  ;;  %v4361_v39 = vld [vmem:[#allocation9 + $0x48] ss:$0 sm:$0xff] }
 0x7ab   :  { %v2894_v26 = vmul.f32 %v2865_v63, %v2858_v48  ;;  %3833 = vmatprep.subr.bf16.mxu0 %v3680_v1  ;;  %3162 = vrot.lane.b32.xlu0 %v6682_v34, %s4857_s29 }
 0x7ac   :  { %v3486_v12 = vpop.permute.xlu1 %3485 }
 0x7ad   :  { %v3484_v62 = vpop.permute.xlu0 %3483  ;;  %v3679_v59 = vpack.c.bf16 %v2902_v7, %v2894_v26 }
 0x7ae   :  { %3172 = vrot.lane.b32.xlu1 %v6758_v3, %s4857_s29 }
 0x7af   :  { %3834 = vmatpush1.bf16.msra.mxu0 %v3679_v59  ;;  %3170 = vrot.lane.b32.xlu0 %v6752_v32, %s4857_s29 }
 0x7b0   :  { %v7409_v63 = vpop.permute.xlu1 %3493 }
 0x7b1   :  { %9572 = vst [vmem:[#allocation56_spill] sm:$0xff] %v7409_v63  ;;  %v7411_v13 = vpop.permute.xlu0 %3491  ;;  %v3558_v1 = vsel %vm1463_vm3, %v3486_v12, %v7409_v63 }
 0x7b2   :  { %9573 = vst [vmem:[#allocation57_spill] sm:$0xff] %v7411_v13  ;;  %v3557_v23 = vsel %vm1463_vm3, %v3484_v62, %v7411_v13  ;;  %3156 = vrot.lane.b32.xlu1 %v6685_v31, %s4857_s29  ;;  %v3624_v7 = vmul.f32 %v4361_v39, %v3558_v1  ;;  %v2708_v13 = vrot.slane %v7332_v20, %v9574_v60 }
 0x7b3   :  { %v3616_v48 = vmul.f32 %v4361_v39, %v3557_v23  ;;  %3154 = vrot.lane.b32.xlu0 %v6679_v2, %s4857_s29 }
 0x7b4   :  { %v2612_v26 = vpop.permute.xlu1 %2611 }
 0x7b5   :  { %v2610_v59 = vpop.permute.xlu0 %2609  ;;  %v3768_v57 = vpack.c.bf16 %v3624_v7, %v3616_v48 }
 0x7b6   :  { %3160 = vrot.lane.b32.xlu1 %v6676_v6, %s4857_s29 }
 0x7b7   :  { %3894 = vmatprep.subr.bf16.mxu1 %v3768_v57  ;;  %3158 = vrot.lane.b32.xlu0 %v6670_v55, %s4857_s29 }
 0x7b8   :  { %v7429_v63 = vpop.permute.xlu1 %2619 }
 0x7b9   :  { %9575 = vst [vmem:[#allocation31_spill] sm:$0xff] %v7429_v63  ;;  %v7431_v23 = vpop.permute.xlu0 %2617  ;;  %v2696_v1 = vsel %vm808_vm9, %v2612_v26, %v7429_v63 }
 0x7ba   :  { %9576 = vst [vmem:[#allocation58_spill] sm:$0xff] %v7431_v23  ;;  %v2695_v48 = vsel %vm808_vm9, %v2610_v59, %v7431_v23  ;;  %v2758_v7 = vmul.f32 %v2708_v13, %v2696_v1  ;;  %3168 = vrot.lane.b32.xlu1 %v6746_v42, %s4857_s29 }
 0x7bb   :  { %v2750_v57 = vmul.f32 %v2708_v13, %v2695_v48  ;;  %3166 = vrot.lane.b32.xlu0 %v6740_v8, %s4857_s29  ;;  %v7457_v48 = vrot.slane %v7345_v43, %v9574_v60 }
 0x7bc   :  { %v7443_v35 = vpop.permute.xlu1 %3477 }
 0x7bd   :  { %9577 = vst [vmem:[#allocation59_spill] sm:$0xff] %v7443_v35  ;;  %v7445_v47 = vpop.permute.xlu0 %3475  ;;  %v3672_v61 = vpack.c.bf16 %v2758_v7, %v2750_v57  ;;  %v3562_v63 = vsel %vm1463_vm3, %v7443_v35, %v3486_v12 }
 0x7be   :  { %9578 = vst [vmem:[#allocation60_spill] sm:$0xff] %v7445_v47  ;;  %v3561_v1 = vsel %vm1463_vm3, %v7445_v47, %v3484_v62  ;;  %3152 = vrot.lane.b32.xlu1 %v6673_v11, %s4857_s29  ;;  %v3623_v38 = vmul.f32 %v4360_v53, %v3562_v63 }
 0x7bf   :  { %3835 = vmatprep.subr.bf16.mxu0 %v3672_v61  ;;  %v3615_v23 = vmul.f32 %v4360_v53, %v3561_v1  ;;  %3150 = vrot.lane.b32.xlu0 %v6667_v40, %s4857_s29 }
 0x7c0   :  { %v7461_v7 = vpop.permute.xlu1 %2667 }
 0x7c1   :  { %9579 = vst [vmem:[#allocation61_spill] sm:$0xff] %v7461_v7  ;;  %v7463_v12 = vpop.permute.xlu0 %2665  ;;  %v3767_v57 = vpack.c.bf16 %v3623_v38, %v3615_v23  ;;  %v2700_v62 = vsel %vm808_vm9, %v7461_v7, %v2612_v26 }
 0x7c2   :  { %9580 = vst [vmem:[#allocation62_spill] sm:$0xff] %v7463_v12  ;;  %v2699_v61 = vsel %vm808_vm9, %v7463_v12, %v2610_v59  ;;  %v2757_v47 = vmul.f32 %v7457_v48, %v2700_v62  ;;  %3341 = vrot.lane.b32.xlu1 %v6761_v17, %s4844_s19 }
 0x7c3   :  { %v2749_v63 = vmul.f32 %v7457_v48, %v2699_v61  ;;  %3895 = vmatpush1.bf16.msra.mxu1 %v3767_v57  ;;  %3339 = vrot.lane.b32.xlu0 %v6755_v44, %s4844_s19 }
 0x7c4   :  { %v3482_v38 = vpop.permute.xlu1 %3481 }
 0x7c5   :  { %v3480_v23 = vpop.permute.xlu0 %3479  ;;  %v3671_v1 = vpack.c.bf16 %v2757_v47, %v2749_v63 }
 0x7c6   :  { %3349 = vrot.lane.b32.xlu1 %v6831_v19, %s4844_s19 }
 0x7c7   :  { %3836 = vmatpush1.bf16.msra.mxu0 %v3671_v1  ;;  %3347 = vrot.lane.b32.xlu0 %v6825_v9, %s4844_s19 }
 0x7c8   :  { %v7481_v26 = vpop.permute.xlu1 %3489 }
 0x7c9   :  { %v7483_v59 = vpop.permute.xlu0 %3487  ;;  %v3556_v57 = vsel %vm1463_vm3, %v3482_v38, %v7481_v26 }
 0x7ca   :  { %v3555_v62 = vsel %vm1463_vm3, %v3480_v23, %v7483_v59  ;;  %v3608_v47 = vmul.f32 %v4361_v39, %v3556_v57  ;;  %3004 = vrot.lane.b32.xlu1 %v6688_v4, %s4845_s20 }
 0x7cb   :  { %v3600_v61 = vmul.f32 %v4361_v39, %v3555_v62  ;;  %3002 = vrot.lane.b32.xlu0 %v6682_v34, %s4845_s20 }
 0x7cc   :  { %v2608_v63 = vpop.permute.xlu1 %2607 }
 0x7cd   :  { %v2606_v1 = vpop.permute.xlu0 %2605  ;;  %v3760_v35 = vpack.c.bf16 %v3608_v47, %v3600_v61  ;;  %v2536_v47 = vsel %vm678_vm12, %v7276_v22, %v7292_v36 }
 0x7ce   :  { %3012 = vrot.lane.b32.xlu1 %v6758_v3, %s4845_s20 }
 0x7cf   :  { %3896 = vmatprep.subr.bf16.mxu1 %v3760_v35  ;;  %3010 = vrot.lane.b32.xlu0 %v6752_v32, %s4845_s20 }
 0x7d0   :  { %v7499_v12 = vpop.permute.xlu1 %2615 }
 0x7d1   :  { %v7501_v57 = vpop.permute.xlu0 %2613  ;;  %v2694_v4 = vsel %vm808_vm9, %v2608_v63, %v7499_v12 }
 0x7d2   :  { %v2693_v34 = vsel %vm808_vm9, %v2606_v1, %v7501_v57  ;;  %v2742_v39 = vmul.f32 %v2708_v13, %v2694_v4  ;;  %2996 = vrot.lane.b32.xlu1 %v6685_v31, %s4845_s20 }
 0x7d3   :  { %v2734_v62 = vmul.f32 %v2708_v13, %v2693_v34  ;;  %2994 = vrot.lane.b32.xlu0 %v6679_v2, %s4845_s20  ;;  %v2535_v2 = vsel %vm678_vm12, %v7278_v51, %v7294_v46  ;;  %v9583_v34 = vld [vmem:[#allocation34_spill] sm:$0xff] }
 0x7d4   :  { %v7513_v32 = vpop.permute.xlu1 %3473 }
 0x7d5   :  { %9581 = vst [vmem:[#allocation63_spill] sm:$0xff] %v7513_v32  ;;  %v7515_v3 = vpop.permute.xlu0 %3471  ;;  %v3664_v35 = vpack.c.bf16 %v2742_v39, %v2734_v62  ;;  %v3560_v13 = vsel %vm1463_vm3, %v7513_v32, %v3482_v38  ;;  %v2548_v39 = vrot.slane %v7332_v20, %v9583_v34 }
 0x7d6   :  { %9582 = vst [vmem:[#allocation64_spill] sm:$0xff] %v7515_v3  ;;  %v3559_v31 = vsel %vm1463_vm3, %v7515_v3, %v3480_v23  ;;  %v3607_v61 = vmul.f32 %v4360_v53, %v3560_v13  ;;  %3337 = vrot.lane.b32.xlu1 %v6749_v16, %s4844_s19  ;;  %v4569_v13 = vld [vmem:[#allocation7 + $0x8] ss:$12 sps:$4 sm:$0xff]  }
 0x7d7   :  { %v3599_v4 = vmul.f32 %v4360_v53, %v3559_v31  ;;  %3837 = vmatprep.subr.bf16.mxu0 %v3664_v35  ;;  %3335 = vrot.lane.b32.xlu0 %v6743_v56, %s4844_s19  ;;  %v2598_v3 = vmul.f32 %v2548_v39, %v2536_v47  ;;  %v2590_v32 = vmul.f32 %v2548_v39, %v2535_v2 }
 0x7d8   :  { %v7537_v38 = vpop.permute.xlu1 %2663 }
 0x7d9   :  { %9584 = vst [vmem:[#allocation34_spill] sm:$0xff] %v7537_v38  ;;  %v7539_v23 = vpop.permute.xlu0 %2661  ;;  %v3759_v62 = vpack.c.bf16 %v3607_v61, %v3599_v4  ;;  %v2698_v53 = vsel %vm808_vm9, %v7537_v38, %v2608_v63  ;;  %v7553_v61 = vld [vmem:[#allocation9 + $0x10] sm:$0xff]  ;;  %v7555_v4 = vld [vmem:[#allocation9 + $0x18] sm:$0xff] }
 0x7da   :  { %9585 = vst [vmem:[#allocation65_spill] sm:$0xff] %v7539_v23  ;;  %v2697_v35 = vsel %vm808_vm9, %v7539_v23, %v2606_v1  ;;  %v2741_v31 = vmul.f32 %v7457_v48, %v2698_v53  ;;  %3345 = vrot.lane.b32.xlu1 %v6819_v10, %s4844_s19  ;;  %v3656_v1 = vpack.c.bf16 %v2598_v3, %v2590_v32 }
 0x7db   :  { %v2733_v7 = vmul.f32 %v7457_v48, %v2697_v35  ;;  %3897 = vmatpush1.bf16.msra.mxu1 %v3759_v62  ;;  %3343 = vrot.lane.b32.xlu0 %v6813_v45, %s4844_s19  ;;  %v2873_v48 = vrot.slane %v7553_v61, %v9567_v37  ;;  %v2877_v62 = vrot.slane %v7555_v4, %v9567_v37 }
 0x7dc   :  { %v2788_v47 = vpop.permute.xlu1 %2787 }
 0x7dd   :  { %v2786_v2 = vpop.permute.xlu0 %2785  ;;  %v3663_v63 = vpack.c.bf16 %v2741_v31, %v2733_v7  ;;  %v2853_v7 = vsel %vm2829_vm5, %v7341_v5, %v2788_v47 }
 0x7de   :  { %4374 = vmatmul.mubr.msk.bf16.vlgmr.msra.gmra.mxu1 %vm3824_vm8, %v4569_v13  ;;  %3000 = vrot.lane.b32.xlu1 %v6676_v6, %s4845_s20  ;;  %v2852_v32 = vsel %vm2829_vm5, %v7343_v27, %v2786_v2  ;;  %v2534_v6 = vsel %vm678_vm12, %v7268_v54, %v7284_v15  ;;  %v2544_v27 = vrot.slane %v7345_v43, %v9583_v34 }
 0x7df   :  { %3838 = vmatpush1.bf16.msra.mxu0 %v3663_v63  ;;  %2998 = vrot.lane.b32.xlu0 %v6670_v55, %s4845_s20  ;;  %v2920_v55 = vmul.f32 %v2873_v48, %v2853_v7  ;;  %v2912_v35 = vmul.f32 %v2873_v48, %v2852_v32  ;;  %v2582_v7 = vmul.f32 %v2548_v39, %v2534_v6 }
 0x7e0   :  { %3839 = vmatprep.subr.bf16.mxu0 %v3656_v1  ;;  %v7572_v3 = vpop.permute.xlu1 %2795  ;;  %3924 = vmatprep.mubr.bf16.mxu1 %v9517_v14 }
 0x7e1   :  { %v2849_v5 = vsel %vm2829_vm5, %v2788_v47, %v7572_v3  ;;  %v7582_v53 = vpop.permute.xlu0 %2793  ;;  %v2533_v47 = vsel %vm678_vm12, %v7270_v30, %v7286_v29  ;;  %v3689_v23 = vpack.c.bf16 %v2920_v55, %v2912_v35 }
 0x7e2   :  { %v2921_v13 = vmul.f32 %v2877_v62, %v2849_v5  ;;  %v2848_v31 = vsel %vm2829_vm5, %v2786_v2, %v7582_v53  ;;  %3008 = vrot.lane.b32.xlu1 %v6746_v42, %s4845_s20  ;;  %v2574_v5 = vmul.f32 %v2548_v39, %v2533_v47 }
 0x7e3   :  { %v2913_v63 = vmul.f32 %v2877_v62, %v2848_v31  ;;  %3006 = vrot.lane.b32.xlu0 %v6740_v8, %s4845_s20 }
 0x7e4   :  { %v7597_v1 = vpop.permute.xlu1 %2507  ;;  %v3648_v39 = vpack.c.bf16 %v2582_v7, %v2574_v5  ;;  %v2374_v5 = vsel %vm2348_vm10, %v7150_v18, %v7156_v21 }
 0x7e5   :  { %9586 = vst [vmem:[#allocation66_spill] sm:$0xff] %v7597_v1  ;;  %v2540_v2 = vsel %vm678_vm12, %v7597_v1, %v7276_v22  ;;  %v7603_v32 = vpop.permute.xlu0 %2505  ;;  %v3690_v42 = vpack.c.bf16 %v2921_v13, %v2913_v63 }
 0x7e6   :  { %9587 = vst [vmem:[#allocation67_spill] sm:$0xff] %v7603_v32  ;;  %v2597_v38 = vmul.f32 %v2544_v27, %v2540_v2  ;;  %v2539_v31 = vsel %vm678_vm12, %v7603_v32, %v7278_v51  ;;  %2992 = vrot.lane.b32.xlu1 %v6673_v11, %s4845_s20  ;;  %v9611_v32 = vld [vmem:[#allocation23_spill] sm:$0xff] }
 0x7e7   :  { %v2589_v8 = vmul.f32 %v2544_v27, %v2539_v31  ;;  %2990 = vrot.lane.b32.xlu0 %v6667_v40, %s4845_s20  ;;  %3933 = vmatprep.subr.bf16.mxu1 %v3690_v42 }
 0x7e8   :  { %3934 = vmatpush1.bf16.msra.mxu1 %v3689_v23  ;;  %v2784_v22 = vpop.permute.xlu1 %2783 }
 0x7e9   :  { %v2782_v6 = vpop.permute.xlu0 %2781  ;;  %v3655_v13 = vpack.c.bf16 %v2597_v38, %v2589_v8  ;;  %v2851_v51 = vsel %vm2829_vm5, %v7377_v50, %v2784_v22  ;;  %v9588_v38 = vld [vmem:[#allocation33_spill] sm:$0xff]  ;;  %v2376_v50 = vsel %vm2348_vm10, %v7148_v58, %v7164_v0 }
 0x7ea   :  { %3180 = vrot.lane.b32.xlu1 %v6761_v17, %s4857_s29  ;;  %v2850_v11 = vsel %vm2829_vm5, %v7379_v49, %v2782_v6  ;;  %v2388_v23 = vrot.slane %v7332_v20, %v9588_v38  ;;  %v2375_v49 = vsel %vm2348_vm10, %v7140_v28, %v7166_v25  ;;  %v2904_v47 = vmul.f32 %v2873_v48, %v2851_v51  ;;  %v9591_v51 = vld [vmem:[#allocation16_spill] sm:$0xff] }
 0x7eb   :  { %3178 = vrot.lane.b32.xlu0 %v6755_v44, %s4857_s29  ;;  %3840 = vmatpush1.bf16.msra.mxu0 %v3655_v13  ;;  %v2896_v63 = vmul.f32 %v2873_v48, %v2850_v11  ;;  %v2373_v48 = vsel %vm2348_vm10, %v7142_v52, %v7158_v41  ;;  %v2379_v11 = vsel %vm2348_vm10, %v9591_v51, %v7140_v28 }
 0x7ec   :  { %3841 = vmatprep.subr.bf16.mxu0 %v3648_v39  ;;  %v7624_v40 = vpop.permute.xlu1 %2791  ;;  %v2438_v31 = vmul.f32 %v2388_v23, %v2376_v50 }
 0x7ed   :  { %v2847_v55 = vsel %vm2829_vm5, %v2784_v22, %v7624_v40  ;;  %v7639_v35 = vpop.permute.xlu0 %2789  ;;  %v2430_v22 = vmul.f32 %v2388_v23, %v2375_v49  ;;  %v3681_v50 = vpack.c.bf16 %v2904_v47, %v2896_v63  ;;  %v2414_v47 = vmul.f32 %v2388_v23, %v2373_v48 }
 0x7ee   :  { %v2905_v7 = vmul.f32 %v2877_v62, %v2847_v55  ;;  %v2846_v2 = vsel %vm2829_vm5, %v2782_v6, %v7639_v35  ;;  %3188 = vrot.lane.b32.xlu1 %v6831_v19, %s4857_s29 }
 0x7ef   :  { %v2897_v42 = vmul.f32 %v2877_v62, %v2846_v2  ;;  %3186 = vrot.lane.b32.xlu0 %v6825_v9, %s4857_s29  ;;  %v2380_v62 = vsel %vm2348_vm10, %v7260_v33, %v7148_v58 }
 0x7f0   :  { %v7656_v8 = vpop.permute.xlu1 %2503 }
 0x7f1   :  { %9589 = vst [vmem:[#allocation68_spill] sm:$0xff] %v7656_v8  ;;  %v2538_v6 = vsel %vm678_vm12, %v7656_v8, %v7268_v54  ;;  %v7666_v13 = vpop.permute.xlu0 %2501  ;;  %v3682_v39 = vpack.c.bf16 %v2905_v7, %v2897_v42  ;;  %v2384_v54 = vrot.slane %v7345_v43, %v9588_v38  ;;  %v2422_v7 = vmul.f32 %v2388_v23, %v2374_v5  ;;  %v9593_v8 = vld [vmem:[#allocation20_spill] sm:$0xff] }
 0x7f2   :  { %9590 = vst [vmem:[#allocation69_spill] sm:$0xff] %v7666_v13  ;;  %v2581_v49 = vmul.f32 %v2544_v27, %v2538_v6  ;;  %v2537_v58 = vsel %vm678_vm12, %v7666_v13, %v7270_v30  ;;  %3176 = vrot.lane.b32.xlu1 %v6749_v16, %s4857_s29  ;;  %v9592_v30 = vld [vmem:[#allocation35_spill] sm:$0xff]  ;;  %v2716_v23 = vrot.slane %v7555_v4, %v9574_v60 }
 0x7f3   :  { %v2573_v55 = vmul.f32 %v2544_v27, %v2537_v58  ;;  %3174 = vrot.lane.b32.xlu0 %v6743_v56, %s4857_s29  ;;  %3935 = vmatprep.subr.bf16.mxu1 %v3682_v39  ;;  %v2437_v63 = vmul.f32 %v2384_v54, %v2380_v62  ;;  %v2429_v2 = vmul.f32 %v2384_v54, %v2379_v11  ;;  %v9595_v62 = vld [vmem:[#allocation58_spill] sm:$0xff] }
 0x7f4   :  { %3936 = vmatpush1.bf16.msra.mxu1 %v3681_v50  ;;  %v2628_v28 = vpop.permute.xlu1 %2627  ;;  %v2378_v13 = vsel %vm2348_vm10, %v9592_v30, %v7150_v18  ;;  %v2377_v27 = vsel %vm2348_vm10, %v9593_v8, %v7142_v52  ;;  %v3640_v56 = vpack.c.bf16 %v2438_v31, %v2430_v22  ;;  %v2712_v5 = vrot.slane %v7553_v61, %v9574_v60  ;;  %v9594_v18 = vld [vmem:[#allocation31_spill] sm:$0xff]  ;;  %v7846_v30 = vld [vmem:[%s9231_s9 + $0xd8] sm:$0xff] }
 0x7f5   :  { %v2626_v42 = vpop.permute.xlu0 %2625  ;;  %v3647_v6 = vpack.c.bf16 %v2581_v49, %v2573_v55  ;;  %v2692_v48 = vsel %vm808_vm9, %v9594_v18, %v2628_v28  ;;  %v2421_v31 = vmul.f32 %v2384_v54, %v2378_v13  ;;  %v2413_v22 = vmul.f32 %v2384_v54, %v2377_v27 }
 0x7f6   :  { %3184 = vrot.lane.b32.xlu1 %v6819_v10, %s4857_s29  ;;  %v2691_v52 = vsel %vm808_vm9, %v9595_v62, %v2626_v42  ;;  %v3632_v58 = vpack.c.bf16 %v2422_v7, %v2414_v47  ;;  %v2759_v55 = vmul.f32 %v2712_v5, %v2692_v48  ;;  %v9597_v47 = vld [vmem:[#allocation46_spill] sm:$0xff]  ;;  %v2556_v48 = vrot.slane %v7555_v4, %v9583_v34 }
 0x7f7   :  { %3182 = vrot.lane.b32.xlu0 %v6813_v45, %s4857_s29  ;;  %3842 = vmatpush1.bf16.msra.mxu0 %v3647_v6  ;;  %v3639_v45 = vpack.c.bf16 %v2437_v63, %v2429_v2  ;;  %v2751_v6 = vmul.f32 %v2712_v5, %v2691_v52  ;;  %v3631_v63 = vpack.c.bf16 %v2421_v31, %v2413_v22 }
 0x7f8   :  { %3843 = vmatprep.subr.bf16.mxu0 %v3640_v56  ;;  %v7704_v10 = vpop.permute.xlu1 %2635  ;;  %v9598_v56 = vld [vmem:[#allocation43_spill] sm:$0xff] }
 0x7f9   :  { %v2688_v39 = vsel %vm808_vm9, %v2628_v28, %v7704_v10  ;;  %v7709_v11 = vpop.permute.xlu0 %2633 }
 0x7fa   :  { %v2760_v50 = vmul.f32 %v2716_v23, %v2688_v39  ;;  %v2687_v49 = vsel %vm808_vm9, %v2626_v42, %v7709_v11  ;;  %3020 = vrot.lane.b32.xlu1 %v6761_v17, %s4845_s20  ;;  %v3673_v42 = vpack.c.bf16 %v2759_v55, %v2751_v6  ;;  %v7771_v55 = vrot.slane %v7555_v4, %v9588_v38  ;;  %v9600_v6 = vld [vmem:[#allocation36_spill] sm:$0xff] }
 0x7fb   :  { %v2752_v13 = vmul.f32 %v2716_v23, %v2687_v49  ;;  %3018 = vrot.lane.b32.xlu0 %v6755_v44, %s4845_s20  ;;  %3844 = vmatpush1.bf16.msra.mxu0 %v3639_v45  ;;  %v9596_v44 = vld [vmem:[#allocation49_spill] sm:$0xff] }
 0x7fc   :  { %3845 = vmatprep.subr.bf16.mxu0 %v3632_v58  ;;  %v2624_v54 = vpop.permute.xlu1 %2623  ;;  %v2528_v27 = vsel %vm678_vm12, %v9597_v47, %v9596_v44 }
 0x7fd   :  { %v2622_v28 = vpop.permute.xlu0 %2621  ;;  %v3674_v2 = vpack.c.bf16 %v2760_v50, %v2752_v13  ;;  %v2690_v17 = vsel %vm808_vm9, %v7499_v12, %v2624_v54  ;;  %v2600_v50 = vmul.f32 %v2556_v48, %v2528_v27  ;;  %v9602_v13 = vld [vmem:[#allocation18_spill] sm:$0xff] }
 0x7fe   :  { %3028 = vrot.lane.b32.xlu1 %v6831_v19, %s4845_s20  ;;  %v2689_v7 = vsel %vm808_vm9, %v7501_v57, %v2622_v28  ;;  %v9599_v19 = vld [vmem:[#allocation15_spill] sm:$0xff]  ;;  %v7740_v57 = vrot.slane %v7553_v61, %v9588_v38  ;;  %v2743_v31 = vmul.f32 %v2712_v5, %v2690_v17 }
 0x7ff   :  { %3026 = vrot.lane.b32.xlu0 %v6825_v9, %s4845_s20  ;;  %3846 = vmatpush1.bf16.msra.mxu0 %v3631_v63  ;;  %v2527_v18 = vsel %vm678_vm12, %v9599_v19, %v9598_v56  ;;  %v2532_v9 = vsel %vm678_vm12, %v7292_v36, %v9597_v47  ;;  %v2735_v22 = vmul.f32 %v2712_v5, %v2689_v7  ;;  %v7765_v5 = vld [vmem:[%s9231_s9 + $0x18] sm:$0xff] }
 0x800   :  { %3937 = vmatprep.subr.bf16.mxu1 %v3674_v2  ;;  %v7736_v12 = vpop.permute.xlu1 %2631  ;;  %v2531_v36 = vsel %vm678_vm12, %v7294_v46, %v9599_v19  ;;  %v2592_v49 = vmul.f32 %v2556_v48, %v2527_v18  ;;  %v9601_v46 = vld [vmem:[#allocation17_spill] sm:$0xff]  ;;  %v9604_v2 = vld [vmem:[#allocation51_spill] sm:$0xff] }
 0x801   :  { %3938 = vmatpush1.bf16.msra.mxu1 %v3673_v42  ;;  %v2686_v62 = vsel %vm808_vm9, %v2624_v54, %v7736_v12  ;;  %v7751_v52 = vpop.permute.xlu0 %2629  ;;  %v9603_v54 = vld [vmem:[#allocation14_spill] sm:$0xff]  ;;  %v2372_v42 = vsel %vm2348_vm10, %v7164_v0, %v9604_v2  ;;  %v2530_v17 = vsel %vm678_vm12, %v7284_v15, %v9601_v46  ;;  %v9605_v0 = vld [vmem:[#allocation27_spill] sm:$0xff] }
 0x802   :  { %v2744_v39 = vmul.f32 %v2716_v23, %v2686_v62  ;;  %v2685_v45 = vsel %vm808_vm9, %v2622_v28, %v7751_v52  ;;  %3016 = vrot.lane.b32.xlu1 %v6749_v16, %s4845_s20  ;;  %v2552_v16 = vrot.slane %v7553_v61, %v9583_v34  ;;  %v2525_v28 = vsel %vm678_vm12, %v9603_v54, %v9602_v13 }
 0x803   :  { %v2736_v58 = vmul.f32 %v2716_v23, %v2685_v45  ;;  %3014 = vrot.lane.b32.xlu0 %v7765_v5, %s4845_s20  ;;  %v2526_v23 = vsel %vm678_vm12, %v9601_v46, %v9600_v6  ;;  %v2529_v7 = vsel %vm678_vm12, %v7286_v29, %v9603_v54  ;;  %v3665_v62 = vpack.c.bf16 %v2743_v31, %v2735_v22  ;;  %v7798_v45 = vld [vmem:[%s9231_s9 + $0x60] sm:$0xff] }
 0x804   :  { %v3326_v63 = vpop.permute.xlu1 %3325  ;;  %v2599_v19 = vmul.f32 %v2552_v16, %v2532_v9  ;;  %v2591_v18 = vmul.f32 %v2552_v16, %v2531_v36  ;;  %v7804_v15 = vrot.slane %v7332_v20, %v9605_v0  ;;  %v7806_v46 = vld [vmem:[#allocation7 + $0x4] ss:$12 sps:$4 sm:$0xff]   ;;  %v2584_v29 = vmul.f32 %v2556_v48, %v2526_v23 }
 0x805   :  { %v3324_v47 = vpop.permute.xlu0 %3323  ;;  %v3666_v27 = vpack.c.bf16 %v2744_v39, %v2736_v58  ;;  %v2576_v54 = vmul.f32 %v2556_v48, %v2525_v28  ;;  %v7811_v9 = vld [vmem:[%s9231_s9 + $0x20] sm:$0xff]  ;;  %v3658_v31 = vpack.c.bf16 %v2600_v50, %v2592_v49  ;;  %v9608_v58 = vld [vmem:[#allocation52_spill] sm:$0xff]  ;;  %3863 = vmatprep.mubr.bf16.mxu0 %v7806_v46  ;;  %v9610_v49 = vld [vmem:[#allocation21_spill] sm:$0xff]  ;;  %v2575_v8 = vmul.f32 %v2552_v16, %v2529_v7 }
 0x806   :  { %3024 = vrot.lane.b32.xlu1 %v7798_v45, %s4845_s20  ;;  %v9606_v22 = vld [vmem:[#allocation50_spill] sm:$0xff] }
 0x807   :  { %3022 = vrot.lane.b32.xlu0 %v7811_v9, %s4845_s20  ;;  %3939 = vmatprep.subr.bf16.mxu1 %v3666_v27  ;;  %v2371_v39 = vsel %vm2348_vm10, %v7166_v25, %v9606_v22  ;;  %v9607_v36 = vld [vmem:[#allocation22_spill] sm:$0xff]  ;;  %v2367_v23 = vsel %vm2348_vm10, %v9606_v22, %v9608_v58  ;;  %v2583_v27 = vmul.f32 %v2552_v16, %v2530_v17 }
 0x808   :  { %v2368_v48 = vsel %vm2348_vm10, %v9604_v2, %v9607_v36  ;;  %3940 = vmatpush1.bf16.msra.mxu1 %v3665_v62  ;;  %v7827_v28 = vpop.permute.xlu1 %3333  ;;  %v9609_v50 = vld [vmem:[#allocation38_spill] sm:$0xff]  ;;  %v3657_v22 = vpack.c.bf16 %v2599_v19, %v2591_v18  ;;  %v3410_v16 = vrot.slane %v7345_v43, %v9605_v0  ;;  %v2432_v7 = vmul.f32 %v7771_v55, %v2367_v23 }
 0x809   :  { %v2366_v25 = vsel %vm2348_vm10, %v9610_v49, %v9609_v50  ;;  %v3398_v2 = vsel %vm1333_vm7, %v3326_v63, %v7827_v28  ;;  %3941 = vmatprep.subr.bf16.mxu1 %v3658_v31  ;;  %v7837_v51 = vpop.permute.xlu0 %3331  ;;  %v2440_v17 = vmul.f32 %v7771_v55, %v2368_v48  ;;  %v7858_v18 = vld [vmem:[%s9231_s9 + $0x98] sm:$0xff]  ;;  %v3650_v31 = vpack.c.bf16 %v2584_v29, %v2576_v54 }
 0x80a   :  { %v3464_v62 = vmul.f32 %v7804_v15, %v3398_v2  ;;  %v3397_v33 = vsel %vm1333_vm7, %v3324_v47, %v7837_v51  ;;  %3501 = vrot.lane.b32.xlu1 %v7846_v30, %s4841_s12  ;;  %v2370_v2 = vsel %vm2348_vm10, %v7156_v21, %v9610_v49  ;;  %v2369_v48 = vsel %vm2348_vm10, %v7158_v41, %v9611_v32 }
 0x80b   :  { %v3456_v19 = vmul.f32 %v7804_v15, %v3397_v33  ;;  %3499 = vrot.lane.b32.xlu0 %v7858_v18, %s4841_s12  ;;  %v9612_v33 = vld [vmem:[#allocation39_spill] sm:$0xff]  ;;  %v2439_v29 = vmul.f32 %v7740_v57, %v2372_v42  ;;  %v2431_v54 = vmul.f32 %v7740_v57, %v2371_v39  ;;  %v2424_v58 = vmul.f32 %v7771_v55, %v2366_v25 }
 0x80c   :  { %v2365_v23 = vsel %vm2348_vm10, %v9611_v32, %v9612_v33  ;;  %3942 = vmatpush1.bf16.msra.mxu1 %v3657_v22  ;;  %v7874_v1 = vpop.permute.xlu1 %3317  ;;  %v3649_v36 = vpack.c.bf16 %v2583_v27, %v2575_v8  ;;  %v7890_v42 = vld [vmem:[%s9231_s9 + $0xe0] sm:$0xff] }
 0x80d   :  { %9613 = vst [vmem:[#allocation31_spill] sm:$0xff] %v7874_v1  ;;  %v3402_v21 = vsel %vm1333_vm7, %v7874_v1, %v3326_v63  ;;  %3943 = vmatprep.subr.bf16.mxu1 %v3650_v31  ;;  %v7881_v49 = vpop.permute.xlu0 %3315  ;;  %v3752_v41 = vpack.c.bf16 %v3464_v62, %v3456_v19  ;;  %v2416_v63 = vmul.f32 %v7771_v55, %v2365_v23  ;;  %v7898_v8 = vld [vmem:[%s9231_s9 + $0xa0] sm:$0xff]  ;;  %v7907_v31 = vld [vmem:[%s9231_s9 + $0x58] sm:$0xff] }
 0x80e   :  { %9614 = vst [vmem:[#allocation58_spill] sm:$0xff] %v7881_v49  ;;  %v3463_v38 = vmul.f32 %v3410_v16, %v3402_v21  ;;  %v3401_v32 = vsel %vm1333_vm7, %v7881_v49, %v3324_v47  ;;  %3509 = vrot.lane.b32.xlu1 %v7890_v42, %s4841_s12  ;;  %v3642_v47 = vpack.c.bf16 %v2440_v17, %v2432_v7 }
 0x80f   :  { %v3455_v39 = vmul.f32 %v3410_v16, %v3401_v32  ;;  %3507 = vrot.lane.b32.xlu0 %v7898_v8, %s4841_s12  ;;  %3847 = vmatprep.subr.bf16.mxu0 %v3752_v41  ;;  %v2423_v62 = vmul.f32 %v7740_v57, %v2370_v2  ;;  %v2415_v55 = vmul.f32 %v7740_v57, %v2369_v48 }
 0x810   :  { %3944 = vmatpush1.bf16.msra.mxu1 %v3649_v36  ;;  %v3322_v25 = vpop.permute.xlu1 %3321  ;;  %v3641_v19 = vpack.c.bf16 %v2439_v29, %v2431_v54  ;;  %v3634_v36 = vpack.c.bf16 %v2424_v58, %v2416_v63 }
 0x811   :  { %3945 = vmatprep.subr.bf16.mxu1 %v3642_v47  ;;  %v3320_v27 = vpop.permute.xlu0 %3319  ;;  %v3751_v22 = vpack.c.bf16 %v3463_v38, %v3455_v39  ;;  %v3633_v7 = vpack.c.bf16 %v2423_v62, %v2415_v55  ;;  %v7960_v62 = vld [vmem:[#allocation7 + $0x20] ss:$0 sps:$4 sm:$0xff]  }
 0x812   :  { %3497 = vrot.lane.b32.xlu1 %v7907_v31, %s4841_s12  ;;  %4375 = vmatmul.mubr.msk.bf16.gmra.mxu1 %vm3824_vm8, %v7960_v62 }
 0x813   :  { %3495 = vrot.lane.b32.xlu0 %v7765_v5, %s4841_s12  ;;  %3848 = vmatpush2.bf16.msra.mxu0 %v3751_v22  ;;  %v7956_v22 = vld [vmem:[%s9231_s9 + $0xa8] sm:$0xff] }
 0x814   :  { %3946 = vmatpush1.bf16.msra.mxu1 %v3641_v19  ;;  %v7913_v38 = vpop.permute.xlu1 %3329  ;;  %3965 = vmatprep.mubr.bf16.mxu1 %v7806_v46 }
 0x815   :  { %v3396_v57 = vsel %vm1333_vm7, %v3322_v25, %v7913_v38  ;;  %3947 = vmatprep.subr.bf16.mxu1 %v3634_v36  ;;  %v7918_v17 = vpop.permute.xlu0 %3327 }
 0x816   :  { %v3448_v2 = vmul.f32 %v7804_v15, %v3396_v57  ;;  %v3395_v48 = vsel %vm1333_vm7, %v3320_v27, %v7918_v17  ;;  %3505 = vrot.lane.b32.xlu1 %v7798_v45, %s4841_s12 }
 0x817   :  { %v3440_v58 = vmul.f32 %v7804_v15, %v3395_v48  ;;  %3503 = vrot.lane.b32.xlu0 %v7811_v9, %s4841_s12 }
 0x818   :  { %3948 = vmatpush1.bf16.msra.mxu1 %v3633_v7  ;;  %v7929_v23 = vpop.permute.xlu1 %3313 }
 0x819   :  { %9615 = vst [vmem:[#allocation49_spill] sm:$0xff] %v7929_v23  ;;  %v3400_v29 = vsel %vm1333_vm7, %v7929_v23, %v3322_v25  ;;  %v7934_v54 = vpop.permute.xlu0 %3311  ;;  %v3744_v21 = vpack.c.bf16 %v3448_v2, %v3440_v58  ;;  %v7946_v25 = vld [vmem:[%s9231_s9 + $0xe8] sm:$0xff] }
 0x81a   :  { %9616 = vst [vmem:[#allocation46_spill] sm:$0xff] %v7934_v54  ;;  %v3447_v41 = vmul.f32 %v3410_v16, %v3400_v29  ;;  %v3399_v32 = vsel %vm1333_vm7, %v7934_v54, %v3320_v27  ;;  %2803 = vrot.lane.b32.xlu1 %v7890_v42, %s4856_s2  ;;  %v9617_v27 = vld [vmem:[#allocation26_spill] sm:$0xff] }
 0x81b   :  { %v3439_v15 = vmul.f32 %v3410_v16, %v3399_v32  ;;  %2801 = vrot.lane.b32.xlu0 %v7898_v8, %s4856_s2  ;;  %3849 = vmatprep.subr.bf16.mxu0 %v3744_v21  ;;  %v3254_v16 = vrot.slane %v7332_v20, %v9617_v27  ;;  %v3250_v2 = vrot.slane %v7345_v43, %v9617_v27 }
 0x81c   :  { %v3165_v63 = vpop.permute.xlu1 %3164 }
 0x81d   :  { %v3163_v39 = vpop.permute.xlu0 %3162  ;;  %v3743_v47 = vpack.c.bf16 %v3447_v41, %v3439_v15 }
 0x81e   :  { %2811 = vrot.lane.b32.xlu1 %v7946_v25, %s4856_s2 }
 0x81f   :  { %2809 = vrot.lane.b32.xlu0 %v7956_v22, %s4856_s2  ;;  %3850 = vmatpush2.bf16.msra.mxu0 %v3743_v47  ;;  %v7994_v47 = vld [vmem:[%s9231_s9 + $0x68] sm:$0xff] }
 0x820   :  { %v7962_v55 = vpop.permute.xlu1 %3172 }
 0x821   :  { %v3238_v19 = vsel %vm3214_vm11, %v3165_v63, %v7962_v55  ;;  %v7967_v36 = vpop.permute.xlu0 %3170 }
 0x822   :  { %v3304_v57 = vmul.f32 %v3254_v16, %v3238_v19  ;;  %v3237_v7 = vsel %vm3214_vm11, %v3163_v39, %v7967_v36  ;;  %2799 = vrot.lane.b32.xlu1 %v7798_v45, %s4856_s2 }
 0x823   :  { %v3296_v48 = vmul.f32 %v3254_v16, %v3237_v7  ;;  %2797 = vrot.lane.b32.xlu0 %v7811_v9, %s4856_s2 }
 0x824   :  { %v7981_v58 = vpop.permute.xlu1 %3156 }
 0x825   :  { %9618 = vst [vmem:[#allocation15_spill] sm:$0xff] %v7981_v58  ;;  %v3242_v29 = vsel %vm3214_vm11, %v7981_v58, %v3165_v63  ;;  %v7986_v21 = vpop.permute.xlu0 %3154  ;;  %v3736_v41 = vpack.c.bf16 %v3304_v57, %v3296_v48  ;;  %v8001_v63 = vld [vmem:[%s9231_s9 + $0x28] sm:$0xff] }
 0x826   :  { %9619 = vst [vmem:[#allocation17_spill] sm:$0xff] %v7986_v21  ;;  %v3303_v32 = vmul.f32 %v3250_v2, %v3242_v29  ;;  %v3241_v15 = vsel %vm3214_vm11, %v7986_v21, %v3163_v39  ;;  %2807 = vrot.lane.b32.xlu1 %v7994_v47, %s4856_s2 }
 0x827   :  { %v3295_v19 = vmul.f32 %v3250_v2, %v3241_v15  ;;  %2805 = vrot.lane.b32.xlu0 %v8001_v63, %s4856_s2  ;;  %3851 = vmatprep.subr.bf16.mxu0 %v3736_v41 }
 0x828   :  { %v3161_v57 = vpop.permute.xlu1 %3160 }
 0x829   :  { %v3159_v39 = vpop.permute.xlu0 %3158  ;;  %v3735_v7 = vpack.c.bf16 %v3303_v32, %v3295_v19  ;;  %v8022_v32 = vld [vmem:[%s9231_s9 + $0xf0] sm:$0xff] }
 0x82a   :  { %3517 = vrot.lane.b32.xlu1 %v7946_v25, %s4841_s12 }
 0x82b   :  { %3515 = vrot.lane.b32.xlu0 %v7956_v22, %s4841_s12  ;;  %3852 = vmatpush2.bf16.msra.mxu0 %v3735_v7  ;;  %v8029_v7 = vld [vmem:[%s9231_s9 + $0xb0] sm:$0xff] }
 0x82c   :  { %v8009_v48 = vpop.permute.xlu1 %3168 }
 0x82d   :  { %v3236_v29 = vsel %vm3214_vm11, %v3161_v57, %v8009_v48  ;;  %v8014_v15 = vpop.permute.xlu0 %3166 }
 0x82e   :  { %v3288_v21 = vmul.f32 %v3254_v16, %v3236_v29  ;;  %v3235_v41 = vsel %vm3214_vm11, %v3159_v39, %v8014_v15  ;;  %3525 = vrot.lane.b32.xlu1 %v8022_v32, %s4841_s12 }
 0x82f   :  { %v3280_v19 = vmul.f32 %v3254_v16, %v3235_v41  ;;  %3523 = vrot.lane.b32.xlu0 %v8029_v7, %s4841_s12 }
 0x830   :  { %v8033_v29 = vpop.permute.xlu1 %3152 }
 0x831   :  { %9620 = vst [vmem:[#allocation14_spill] sm:$0xff] %v8033_v29  ;;  %v3240_v58 = vsel %vm3214_vm11, %v8033_v29, %v3161_v57  ;;  %v8038_v54 = vpop.permute.xlu0 %3150  ;;  %v3728_v23 = vpack.c.bf16 %v3288_v21, %v3280_v19  ;;  %v3418_v57 = vrot.slane %v7553_v61, %v9605_v0 }
 0x832   :  { %9621 = vst [vmem:[#allocation51_spill] sm:$0xff] %v8038_v54  ;;  %v3287_v49 = vmul.f32 %v3250_v2, %v3240_v58  ;;  %v3239_v16 = vsel %vm3214_vm11, %v8038_v54, %v3159_v39  ;;  %2643 = vrot.lane.b32.xlu1 %v7890_v42, %s4847_s21  ;;  %v3422_v58 = vrot.slane %v7555_v4, %v9605_v0 }
 0x833   :  { %v3279_v41 = vmul.f32 %v3250_v2, %v3239_v16  ;;  %2641 = vrot.lane.b32.xlu0 %v7898_v8, %s4847_s21  ;;  %3853 = vmatprep.subr.bf16.mxu0 %v3728_v23 }
 0x834   :  { %v3342_v1 = vpop.permute.xlu1 %3341 }
 0x835   :  { %v3340_v33 = vpop.permute.xlu0 %3339  ;;  %v3727_v50 = vpack.c.bf16 %v3287_v49, %v3279_v41  ;;  %v3394_v2 = vsel %vm1333_vm7, %v7827_v28, %v3342_v1 }
 0x836   :  { %2651 = vrot.lane.b32.xlu1 %v7946_v25, %s4847_s21  ;;  %v3393_v23 = vsel %vm1333_vm7, %v7837_v51, %v3340_v33  ;;  %v3465_v19 = vmul.f32 %v3418_v57, %v3394_v2  ;;  %v8078_v2 = vld [vmem:[%s9231_s9 + $0x70] sm:$0xff] }
 0x837   :  { %2649 = vrot.lane.b32.xlu0 %v7956_v22, %s4847_s21  ;;  %3854 = vmatpush2.bf16.msra.mxu0 %v3727_v50  ;;  %v3457_v16 = vmul.f32 %v3418_v57, %v3393_v23 }
 0x838   :  { %v8061_v49 = vpop.permute.xlu1 %3349 }
 0x839   :  { %9622 = vst [vmem:[#allocation50_spill] sm:$0xff] %v8061_v49  ;;  %v3390_v21 = vsel %vm1333_vm7, %v3342_v1, %v8061_v49  ;;  %v8066_v39 = vpop.permute.xlu0 %3347  ;;  %v3753_v1 = vpack.c.bf16 %v3465_v19, %v3457_v16 }
 0x83a   :  { %9623 = vst [vmem:[#allocation21_spill] sm:$0xff] %v8066_v39  ;;  %v3466_v41 = vmul.f32 %v3422_v58, %v3390_v21  ;;  %v3389_v28 = vsel %vm1333_vm7, %v3340_v33, %v8066_v39  ;;  %3513 = vrot.lane.b32.xlu1 %v7994_v47, %s4841_s12  ;;  %v9624_v33 = vld [vmem:[#allocation32_spill] sm:$0xff] }
 0x83b   :  { %v3458_v51 = vmul.f32 %v3422_v58, %v3389_v28  ;;  %3511 = vrot.lane.b32.xlu0 %v8001_v63, %s4841_s12  ;;  %v3093_v23 = vrot.slane %v7332_v20, %v9624_v33  ;;  %v8087_v21 = vld [vmem:[%s9231_s9 + $0x30] sm:$0xff] }
 0x83c   :  { %v3005_v50 = vpop.permute.xlu1 %3004 }
 0x83d   :  { %v3003_v54 = vpop.permute.xlu0 %3002  ;;  %v3754_v29 = vpack.c.bf16 %v3466_v41, %v3458_v51 }
 0x83e   :  { %3521 = vrot.lane.b32.xlu1 %v8078_v2, %s4841_s12 }
 0x83f   :  { %3519 = vrot.lane.b32.xlu0 %v8087_v21, %s4841_s12  ;;  %3949 = vmatprep.subr.bf16.mxu1 %v3754_v29  ;;  %v3089_v29 = vrot.slane %v7345_v43, %v9624_v33 }
 0x840   :  { %3950 = vmatpush2.bf16.msra.mxu1 %v3753_v1  ;;  %v8091_v19 = vpop.permute.xlu1 %3012 }
 0x841   :  { %v3077_v16 = vsel %vm1043_vm6, %v3005_v50, %v8091_v19  ;;  %v8096_v41 = vpop.permute.xlu0 %3010 }
 0x842   :  { %v3143_v28 = vmul.f32 %v3093_v23, %v3077_v16  ;;  %v3076_v20 = vsel %vm1043_vm6, %v3003_v54, %v8096_v41  ;;  %2639 = vrot.lane.b32.xlu1 %v7798_v45, %s4847_s21 }
 0x843   :  { %v3135_v51 = vmul.f32 %v3093_v23, %v3076_v20  ;;  %2637 = vrot.lane.b32.xlu0 %v7811_v9, %s4847_s21 }
 0x844   :  { %v8107_v1 = vpop.permute.xlu1 %2996 }
 0x845   :  { %9625 = vst [vmem:[#allocation23_spill] sm:$0xff] %v8107_v1  ;;  %v3081_v16 = vsel %vm1043_vm6, %v8107_v1, %v3005_v50  ;;  %v8112_v39 = vpop.permute.xlu0 %2994  ;;  %v3720_v49 = vpack.c.bf16 %v3143_v28, %v3135_v51 }
 0x846   :  { %9626 = vst [vmem:[#allocation26_spill] sm:$0xff] %v8112_v39  ;;  %v3142_v0 = vmul.f32 %v3089_v29, %v3081_v16  ;;  %v3080_v13 = vsel %vm1043_vm6, %v8112_v39, %v3003_v54  ;;  %2647 = vrot.lane.b32.xlu1 %v7994_v47, %s4847_s21 }
 0x847   :  { %v3134_v43 = vmul.f32 %v3089_v29, %v3080_v13  ;;  %2645 = vrot.lane.b32.xlu0 %v8001_v63, %s4847_s21  ;;  %3855 = vmatprep.subr.bf16.mxu0 %v3720_v49 }
 0x848   :  { %v3338_v20 = vpop.permute.xlu1 %3337 }
 0x849   :  { %v3336_v6 = vpop.permute.xlu0 %3335  ;;  %v3719_v56 = vpack.c.bf16 %v3142_v0, %v3134_v43  ;;  %v3392_v50 = vsel %vm1333_vm7, %v7913_v38, %v3338_v20 }
 0x84a   :  { %2819 = vrot.lane.b32.xlu1 %v8022_v32, %s4856_s2  ;;  %v3391_v54 = vsel %vm1333_vm7, %v7918_v17, %v3336_v6  ;;  %v3449_v28 = vmul.f32 %v3418_v57, %v3392_v50 }
 0x84b   :  { %2817 = vrot.lane.b32.xlu0 %v8029_v7, %s4856_s2  ;;  %3856 = vmatpush2.bf16.msra.mxu0 %v3719_v56  ;;  %v3441_v51 = vmul.f32 %v3418_v57, %v3391_v54  ;;  %v4592_v57 = vld [vmem:[#allocation9 + $0x8] sm:$0xff] }
 0x84c   :  { %v8131_v13 = vpop.permute.xlu1 %3345 }
 0x84d   :  { %v3388_v0 = vsel %vm1333_vm7, %v3338_v20, %v8131_v13  ;;  %v8136_v49 = vpop.permute.xlu0 %3343  ;;  %v3745_v20 = vpack.c.bf16 %v3449_v28, %v3441_v51  ;;  %v4593_v28 = vld [vmem:[#allocation9] sm:$0xff] }
 0x84e   :  { %v3450_v16 = vmul.f32 %v3422_v58, %v3388_v0  ;;  %v3387_v38 = vsel %vm1333_vm7, %v3336_v6, %v8136_v49  ;;  %2483 = vrot.lane.b32.xlu1 %v7890_v42, %s4837_s30  ;;  %v9627_v42 = vld [vmem:[#allocation30_spill] sm:$0xff] }
 0x84f   :  { %v3442_v17 = vmul.f32 %v3422_v58, %v3387_v38  ;;  %2481 = vrot.lane.b32.xlu0 %v7898_v8, %s4837_s30  ;;  %v2933_v58 = vrot.slane %v4592_v57, %v9627_v42  ;;  %v2929_v51 = vrot.slane %v4593_v28, %v9627_v42  ;;  %v4594_v38 = vld [vmem:[%s9231_s9 + $0x88] sm:$0xff] }
 0x850   :  { %v3001_v56 = vpop.permute.xlu1 %3000 }
 0x851   :  { %v2999_v43 = vpop.permute.xlu0 %2998  ;;  %v3746_v39 = vpack.c.bf16 %v3450_v16, %v3442_v17  ;;  %v2975_v17 = vmul.f32 %v4594_v38, %v2933_v58 }
 0x852   :  { %2491 = vrot.lane.b32.xlu1 %v7946_v25, %s4837_s30 }
 0x853   :  { %2489 = vrot.lane.b32.xlu0 %v7956_v22, %s4837_s30  ;;  %3951 = vmatprep.subr.bf16.mxu1 %v3746_v39 }
 0x854   :  { %3952 = vmatpush2.bf16.msra.mxu1 %v3745_v20  ;;  %v8149_v6 = vpop.permute.xlu1 %3008  ;;  %v4595_v20 = vld [vmem:[%s9231_s9 + $0xc8] sm:$0xff] }
 0x855   :  { %v3075_v8 = vsel %vm1043_vm6, %v3001_v56, %v8149_v6  ;;  %v8155_v50 = vpop.permute.xlu0 %3006  ;;  %v2983_v57 = vmul.f32 %v4595_v20, %v2933_v58 }
 0x856   :  { %v3127_v54 = vmul.f32 %v3093_v23, %v3075_v8  ;;  %v3074_v0 = vsel %vm1043_vm6, %v2999_v43, %v8155_v50  ;;  %2815 = vrot.lane.b32.xlu1 %v8078_v2, %s4856_s2 }
 0x857   :  { %v3119_v39 = vmul.f32 %v3093_v23, %v3074_v0  ;;  %2813 = vrot.lane.b32.xlu0 %v8087_v21, %s4856_s2 }
 0x858   :  { %v8165_v16 = vpop.permute.xlu1 %2992 }
 0x859   :  { %9628 = vst [vmem:[#allocation32_spill] sm:$0xff] %v8165_v16  ;;  %v3079_v23 = vsel %vm1043_vm6, %v8165_v16, %v3001_v56  ;;  %v8176_v8 = vpop.permute.xlu0 %2990  ;;  %v3712_v0 = vpack.c.bf16 %v3127_v54, %v3119_v39  ;;  %v4596_v56 = vld [vmem:[%s9231_s9 + $0x80] sm:$0xff] }
 0x85a   :  { %9629 = vst [vmem:[#allocation30_spill] sm:$0xff] %v8176_v8  ;;  %v3126_v28 = vmul.f32 %v3089_v29, %v3079_v23  ;;  %v3078_v1 = vsel %vm1043_vm6, %v8176_v8, %v2999_v43  ;;  %2479 = vrot.lane.b32.xlu1 %v7798_v45, %s4837_s30  ;;  %v2974_v20 = vmul.f32 %v4596_v56, %v2929_v51  ;;  %v4597_v54 = vld [vmem:[%s9231_s9 + $0xc0] sm:$0xff]  ;;  %v4598_v45 = vld [vmem:[%s9231_s9 + $0x8] sm:$0xff] }
 0x85b   :  { %v3118_v38 = vmul.f32 %v3089_v29, %v3078_v1  ;;  %2477 = vrot.lane.b32.xlu0 %v7811_v9, %s4837_s30  ;;  %3857 = vmatprep.subr.bf16.mxu0 %v3712_v0  ;;  %v2982_v39 = vmul.f32 %v4597_v54, %v2929_v51  ;;  %v3704_v43 = vpack.c.bf16 %v2983_v57, %v2975_v17  ;;  %v4599_v9 = vld [vmem:[%s9231_s9 + $0x48] sm:$0xff] }
 0x85c   :  { %v3181_v23 = vpop.permute.xlu1 %3180  ;;  %v2959_v29 = vmul.f32 %v4598_v45, %v2933_v58  ;;  %v2967_v1 = vmul.f32 %v4599_v9, %v2933_v58  ;;  %v3258_v56 = vrot.slane %v7553_v61, %v9617_v27  ;;  %v3262_v17 = vrot.slane %v7555_v4, %v9617_v27  ;;  %v4600_v45 = vld [vmem:[%s9231_s9] sm:$0xff] }
 0x85d   :  { %v3179_v0 = vpop.permute.xlu0 %3178  ;;  %v3711_v8 = vpack.c.bf16 %v3126_v28, %v3118_v38  ;;  %v3234_v57 = vsel %vm3214_vm11, %v7962_v55, %v3181_v23  ;;  %v3703_v58 = vpack.c.bf16 %v2982_v39, %v2974_v20  ;;  %v2958_v9 = vmul.f32 %v4600_v45, %v2929_v51  ;;  %v4601_v55 = vld [vmem:[%s9231_s9 + $0x40] sm:$0xff] }
 0x85e   :  { %2487 = vrot.lane.b32.xlu1 %v7994_v47, %s4837_s30  ;;  %v3233_v54 = vsel %vm3214_vm11, %v7967_v36, %v3179_v0  ;;  %v3696_v38 = vpack.c.bf16 %v2967_v1, %v2959_v29  ;;  %v2966_v16 = vmul.f32 %v4601_v55, %v2929_v51  ;;  %v3305_v20 = vmul.f32 %v3258_v56, %v3234_v57  ;;  %v3779_v57 = vld [vmem:[#allocation7 + $0x18] sm:$0xff] }
 0x85f   :  { %2485 = vrot.lane.b32.xlu0 %v8001_v63, %s4837_s30  ;;  %3858 = vmatpush2.bf16.msra.mxu0 %v3711_v8  ;;  %v3297_v39 = vmul.f32 %v3258_v56, %v3233_v54 }
 0x860   :  { %v8211_v28 = vpop.permute.xlu1 %3188  ;;  %3859 = vmatprep.subr.bf16.mxu0 %v3704_v43 }
 0x861   :  { %v3230_v36 = vsel %vm3214_vm11, %v3181_v23, %v8211_v28  ;;  %v8222_v8 = vpop.permute.xlu0 %3186  ;;  %v3695_v23 = vpack.c.bf16 %v2966_v16, %v2958_v9  ;;  %v3737_v54 = vpack.c.bf16 %v3305_v20, %v3297_v39  ;;  %v8241_v16 = vld [vmem:[#allocation7] ss:$12 sps:$4 sm:$0xff]  }
 0x862   :  { %v3306_v43 = vmul.f32 %v3262_v17, %v3230_v36  ;;  %v3229_v29 = vsel %vm3214_vm11, %v3179_v0, %v8222_v8  ;;  %2659 = vrot.lane.b32.xlu1 %v8022_v32, %s4847_s21 }
 0x863   :  { %v3298_v1 = vmul.f32 %v3262_v17, %v3229_v29  ;;  %2657 = vrot.lane.b32.xlu0 %v8029_v7, %s4847_s21  ;;  %3860 = vmatpush2.bf16.msra.mxu0 %v3703_v58 }
 0x864   :  { %v3177_v51 = vpop.permute.xlu1 %3176  ;;  %3861 = vmatprep.subr.bf16.mxu0 %v3696_v38  ;;  %v8245_v38 = vcombine.high %v3779_v57, %v3779_v57 }
 0x865   :  { %v3175_v45 = vpop.permute.xlu0 %3174  ;;  %v3738_v55 = vpack.c.bf16 %v3306_v43, %v3298_v1  ;;  %v3232_v0 = vsel %vm3214_vm11, %v8009_v48, %v3177_v51 }
 0x866   :  { %2655 = vrot.lane.b32.xlu1 %v8078_v2, %s4847_s21  ;;  %v3231_v36 = vsel %vm3214_vm11, %v8014_v15, %v3175_v45  ;;  %v3289_v20 = vmul.f32 %v3258_v56, %v3232_v0  ;;  %v8275_v0 = vcombine.low %v3779_v57, %v3779_v57 }
 0x867   :  { %2653 = vrot.lane.b32.xlu0 %v8087_v21, %s4847_s21  ;;  %3953 = vmatprep.subr.bf16.mxu1 %v3738_v55  ;;  %v3281_v15 = vmul.f32 %v3258_v56, %v3231_v36  ;;  %v3097_v55 = vrot.slane %v7553_v61, %v9624_v33 }
 0x868   :  { %3954 = vmatpush2.bf16.msra.mxu1 %v3737_v54  ;;  %v8243_v58 = vpop.permute.xlu1 %3184  ;;  %3862 = vmatpush2.bf16.msra.mxu0 %v3695_v23  ;;  %9630 = vst [vmem:[#allocation70_spill] sm:$0xff] %v8275_v0 }
 0x869   :  { %v3228_v48 = vsel %vm3214_vm11, %v3177_v51, %v8243_v58  ;;  %v8250_v9 = vpop.permute.xlu0 %3182  ;;  %v3729_v56 = vpack.c.bf16 %v3289_v20, %v3281_v15 }
 0x86a   :  { %v3290_v39 = vmul.f32 %v3262_v17, %v3228_v48  ;;  %v3227_v43 = vsel %vm3214_vm11, %v3175_v45, %v8250_v9  ;;  %2499 = vrot.lane.b32.xlu1 %v8022_v32, %s4837_s30 }
 0x86b   :  { %v3282_v29 = vmul.f32 %v3262_v17, %v3227_v43  ;;  %2497 = vrot.lane.b32.xlu0 %v8029_v7, %s4837_s30  ;;  %3864 = vmatmul.mubr.bf16.vlgmr.msra.gmra.mxu0 %v8241_v16  ;;  %v3101_v17 = vrot.slane %v7555_v4, %v9624_v33 }
 0x86c   :  { %v3021_v1 = vpop.permute.xlu1 %3020  ;;  %3873 = vmatprep.mubr.bf16.mxu0 %v8245_v38 }
 0x86d   :  { %v3019_v51 = vpop.permute.xlu0 %3018  ;;  %v3730_v23 = vpack.c.bf16 %v3290_v39, %v3282_v29  ;;  %v3073_v45 = vsel %vm1043_vm6, %v8091_v19, %v3021_v1 }
 0x86e   :  { %3357 = vrot.lane.b32.xlu1 %v7946_v25, %s4844_s19  ;;  %v3072_v54 = vsel %vm1043_vm6, %v8096_v41, %v3019_v51  ;;  %v3144_v19 = vmul.f32 %v3097_v55, %v3073_v45 }
 0x86f   :  { %3355 = vrot.lane.b32.xlu0 %v7956_v22, %s4844_s19  ;;  %3955 = vmatprep.subr.bf16.mxu1 %v3730_v23  ;;  %v3136_v15 = vmul.f32 %v3097_v55, %v3072_v54  ;;  %v2941_v23 = vrot.slane %v7555_v4, %v9627_v42  ;;  %v2937_v4 = vrot.slane %v7553_v61, %v9627_v42 }
 0x870   :  { %3956 = vmatpush2.bf16.msra.mxu1 %v3729_v56  ;;  %v8277_v36 = vpop.permute.xlu1 %3028 }
 0x871   :  { %v3069_v48 = vsel %vm1043_vm6, %v3021_v1, %v8277_v36  ;;  %v8282_v20 = vpop.permute.xlu0 %3026  ;;  %v3721_v56 = vpack.c.bf16 %v3144_v19, %v3136_v15 }
 0x872   :  { %v3145_v39 = vmul.f32 %v3101_v17, %v3069_v48  ;;  %v3068_v41 = vsel %vm1043_vm6, %v3019_v51, %v8282_v20  ;;  %3365 = vrot.lane.b32.xlu1 %v8022_v32, %s4844_s19 }
 0x873   :  { %v3137_v57 = vmul.f32 %v3101_v17, %v3068_v41  ;;  %3363 = vrot.lane.b32.xlu0 %v8029_v7, %s4844_s19  ;;  %3874 = vmatmul.mubr.bf16.gmra.mxu0 %v8275_v0 }
 0x874   :  { %v3017_v43 = vpop.permute.xlu1 %3016  ;;  %4016 = vmatprep.mubr.bf16.mxu0 %v9517_v14 }
 0x875   :  { %v3015_v29 = vpop.permute.xlu0 %3014  ;;  %v3722_v1 = vpack.c.bf16 %v3145_v39, %v3137_v57  ;;  %v3071_v51 = vsel %vm1043_vm6, %v8149_v6, %v3017_v43  ;;  %v2977_v6 = vmul.f32 %v7858_v18, %v2941_v23  ;;  %v4602_v18 = vld [vmem:[%s9231_s9 + $0x90] sm:$0xff] }
 0x876   :  { %2495 = vrot.lane.b32.xlu1 %v8078_v2, %s4837_s30  ;;  %v3070_v45 = vsel %vm1043_vm6, %v8155_v50, %v3015_v29  ;;  %v2985_v50 = vmul.f32 %v7846_v30, %v2941_v23  ;;  %v3128_v15 = vmul.f32 %v3097_v55, %v3071_v51  ;;  %v2976_v30 = vmul.f32 %v4602_v18, %v2937_v4 }
 0x877   :  { %2493 = vrot.lane.b32.xlu0 %v8087_v21, %s4837_s30  ;;  %3957 = vmatprep.subr.bf16.mxu1 %v3722_v1  ;;  %v3120_v39 = vmul.f32 %v3097_v55, %v3070_v45  ;;  %v4603_v55 = vld [vmem:[%s9231_s9 + $0xd0] sm:$0xff]  ;;  %v2961_v45 = vmul.f32 %v7765_v5, %v2941_v23  ;;  %v4363_v5 = vld [vmem:[#allocation9 + $0x58] ss:$0 sm:$0xff] }
 0x878   :  { %3958 = vmatpush2.bf16.msra.mxu1 %v3721_v56  ;;  %v8305_v54 = vpop.permute.xlu1 %3024  ;;  %v2984_v1 = vmul.f32 %v4603_v55, %v2937_v4  ;;  %v3706_v51 = vpack.c.bf16 %v2985_v50, %v2977_v6  ;;  %v4604_v6 = vld [vmem:[%s9231_s9 + $0x10] sm:$0xff] }
 0x879   :  { %9631 = vst [vmem:[#allocation71_spill] sm:$0xff] %v8305_v54  ;;  %v3067_v48 = vsel %vm1043_vm6, %v3017_v43, %v8305_v54  ;;  %v8312_v19 = vpop.permute.xlu0 %3022  ;;  %v9634_v54 = vld [vmem:[#allocation57_spill] sm:$0xff]  ;;  %v2960_v50 = vmul.f32 %v4604_v6, %v2937_v4 }
 0x87a   :  { %9632 = vst [vmem:[#allocation72_spill] sm:$0xff] %v8312_v19  ;;  %v3129_v41 = vmul.f32 %v3101_v17, %v3067_v48  ;;  %v3066_v57 = vsel %vm1043_vm6, %v3015_v29, %v8312_v19  ;;  %3353 = vrot.lane.b32.xlu1 %v7994_v47, %s4844_s19  ;;  %v3713_v48 = vpack.c.bf16 %v3128_v15, %v3120_v39  ;;  %v9633_v19 = vld [vmem:[#allocation56_spill] sm:$0xff] }
 0x87b   :  { %v3121_v61 = vmul.f32 %v3101_v17, %v3066_v57  ;;  %3351 = vrot.lane.b32.xlu0 %v8001_v63, %s4844_s19  ;;  %v2969_v17 = vmul.f32 %v7907_v31, %v2941_v23  ;;  %v4362_v57 = vld [vmem:[#allocation9 + $0x50] ss:$0 sm:$0xff]  ;;  %v3705_v23 = vpack.c.bf16 %v2984_v1, %v2976_v30 }
 0x87c   :  { %v3502_v43 = vpop.permute.xlu1 %3501 }
 0x87d   :  { %v3500_v56 = vpop.permute.xlu0 %3499  ;;  %v3714_v29 = vpack.c.bf16 %v3129_v41, %v3121_v61  ;;  %v3554_v18 = vsel %vm1463_vm3, %v9633_v19, %v3502_v43  ;;  %v4605_v19 = vld [vmem:[%s9231_s9 + $0x50] sm:$0xff]  ;;  %v3698_v41 = vpack.c.bf16 %v2969_v17, %v2961_v45 }
 0x87e   :  { %3361 = vrot.lane.b32.xlu1 %v8078_v2, %s4844_s19  ;;  %v3553_v55 = vsel %vm1463_vm3, %v9634_v54, %v3500_v56  ;;  %v2968_v15 = vmul.f32 %v4605_v19, %v2937_v4  ;;  %v3625_v61 = vmul.f32 %v4362_v57, %v3554_v18 }
 0x87f   :  { %3359 = vrot.lane.b32.xlu0 %v8087_v21, %s4844_s19  ;;  %3959 = vmatprep.subr.bf16.mxu1 %v3714_v29  ;;  %v3617_v30 = vmul.f32 %v4362_v57, %v3553_v55 }
 0x880   :  { %3960 = vmatpush2.bf16.msra.mxu1 %v3713_v48  ;;  %v8341_v31 = vpop.permute.xlu1 %3509 }
 0x881   :  { %v3550_v54 = vsel %vm1463_vm3, %v3502_v43, %v8341_v31  ;;  %v8352_v39 = vpop.permute.xlu0 %3507  ;;  %3961 = vmatprep.subr.bf16.mxu1 %v3706_v51  ;;  %v3697_v43 = vpack.c.bf16 %v2968_v15, %v2960_v50  ;;  %v3769_v45 = vpack.c.bf16 %v3625_v61, %v3617_v30 }
 0x882   :  { %v3626_v1 = vmul.f32 %v4363_v5, %v3550_v54  ;;  %v3549_v29 = vsel %vm1463_vm3, %v3500_v56, %v8352_v39  ;;  %3196 = vrot.lane.b32.xlu1 %v7946_v25, %s4857_s29 }
 0x883   :  { %v3618_v48 = vmul.f32 %v4363_v5, %v3549_v29  ;;  %3194 = vrot.lane.b32.xlu0 %v7956_v22, %s4857_s29 }
 0x884   :  { %v3498_v4 = vpop.permute.xlu1 %3497  ;;  %3962 = vmatpush2.bf16.msra.mxu1 %v3705_v23 }
 0x885   :  { %v3496_v6 = vpop.permute.xlu0 %3495  ;;  %v3770_v51 = vpack.c.bf16 %v3626_v1, %v3618_v48  ;;  %3963 = vmatprep.subr.bf16.mxu1 %v3698_v41  ;;  %v3552_v56 = vsel %vm1463_vm3, %v7481_v26, %v3498_v4  ;;  %v8387_v41 = vld [vmem:[#allocation9 + $0x20] sm:$0xff] }
 0x886   :  { %3204 = vrot.lane.b32.xlu1 %v8022_v32, %s4857_s29  ;;  %v3551_v17 = vsel %vm1463_vm3, %v7483_v59, %v3496_v6  ;;  %v3609_v50 = vmul.f32 %v4362_v57, %v3552_v56  ;;  %v2881_v29 = vrot.slane %v8387_v41, %v9567_v37  ;;  %v8418_v56 = vld [vmem:[%s9231_s9 + $0xf8] sm:$0xff] }
 0x887   :  { %3202 = vrot.lane.b32.xlu0 %v8029_v7, %s4857_s29  ;;  %3996 = vmatprep.subr.bf16.mxu0 %v3770_v51  ;;  %v3601_v26 = vmul.f32 %v4362_v57, %v3551_v17  ;;  %v8389_v57 = vld [vmem:[#allocation9 + $0x28] sm:$0xff] }
 0x888   :  { %3997 = vmatpush1.bf16.msra.mxu0 %v3769_v45  ;;  %v8371_v18 = vpop.permute.xlu1 %3505  ;;  %3964 = vmatpush2.bf16.msra.mxu1 %v3697_v43 }
 0x889   :  { %v3548_v55 = vsel %vm1463_vm3, %v3498_v4, %v8371_v18  ;;  %v8376_v23 = vpop.permute.xlu0 %3503  ;;  %v3761_v1 = vpack.c.bf16 %v3609_v50, %v3601_v26  ;;  %v8429_v50 = vld [vmem:[#allocation7 + $0x8] ss:$12 sps:$4 sm:$0xff]  }
 0x88a   :  { %v3610_v19 = vmul.f32 %v4363_v5, %v3548_v55  ;;  %v3547_v59 = vsel %vm1463_vm3, %v3496_v6, %v8376_v23  ;;  %3192 = vrot.lane.b32.xlu1 %v7994_v47, %s4857_s29  ;;  %v8425_v55 = vld [vmem:[%s9231_s9 + $0xb8] sm:$0xff] }
 0x88b   :  { %v3602_v15 = vmul.f32 %v4363_v5, %v3547_v59  ;;  %3190 = vrot.lane.b32.xlu0 %v8001_v63, %s4857_s29  ;;  %3966 = vmatmul.mubr.bf16.vlgmr.msra.gmra.mxu1 %v8241_v16  ;;  %v2885_v5 = vrot.slane %v8389_v57, %v9567_v37 }
 0x88c   :  { %v2804_v54 = vpop.permute.xlu1 %2803  ;;  %3975 = vmatprep.mubr.bf16.mxu1 %v8245_v38 }
 0x88d   :  { %v2802_v61 = vpop.permute.xlu0 %2801  ;;  %v3762_v30 = vpack.c.bf16 %v3610_v19, %v3602_v15  ;;  %v2845_v16 = vsel %vm2829_vm5, %v7572_v3, %v2804_v54 }
 0x88e   :  { %3200 = vrot.lane.b32.xlu1 %v8078_v2, %s4857_s29  ;;  %v2844_v48 = vsel %vm2829_vm5, %v7582_v53, %v2802_v61  ;;  %v2922_v51 = vmul.f32 %v2881_v29, %v2845_v16 }
 0x88f   :  { %3198 = vrot.lane.b32.xlu0 %v8087_v21, %s4857_s29  ;;  %3998 = vmatprep.subr.bf16.mxu0 %v3762_v30  ;;  %v2914_v45 = vmul.f32 %v2881_v29, %v2844_v48 }
 0x890   :  { %3999 = vmatpush1.bf16.msra.mxu0 %v3761_v1  ;;  %v8405_v4 = vpop.permute.xlu1 %2811 }
 0x891   :  { %v2841_v43 = vsel %vm2829_vm5, %v2804_v54, %v8405_v4  ;;  %v8410_v6 = vpop.permute.xlu0 %2809  ;;  %v3691_v15 = vpack.c.bf16 %v2922_v51, %v2914_v45 }
 0x892   :  { %v2923_v3 = vmul.f32 %v2885_v5, %v2841_v43  ;;  %v2840_v53 = vsel %vm2829_vm5, %v2802_v61, %v8410_v6  ;;  %3373 = vrot.lane.b32.xlu1 %v8418_v56, %s4844_s19 }
 0x893   :  { %v2915_v17 = vmul.f32 %v2885_v5, %v2840_v53  ;;  %3371 = vrot.lane.b32.xlu0 %v8425_v55, %s4844_s19  ;;  %4376 = vmatmul.mubr.msk.bf16.vlgmr.msra.gmra.mxu0 %vm3824_vm8, %v8429_v50  ;;  %v4365_v53 = vld [vmem:[#allocation9 + $0x68] ss:$0 sm:$0xff] }
 0x894   :  { %v2800_v26 = vpop.permute.xlu1 %2799  ;;  %3976 = vmatmul.mubr.bf16.gmra.mxu1 %v8275_v0  ;;  %4026 = vmatprep.mubr.bf16.mxu0 %v9517_v14 }
 0x895   :  { %v2798_v19 = vpop.permute.xlu0 %2797  ;;  %v3692_v59 = vpack.c.bf16 %v2923_v3, %v2915_v17  ;;  %4118 = vmatprep.mubr.bf16.mxu1 %v9517_v14  ;;  %v2843_v54 = vsel %vm2829_vm5, %v7624_v40, %v2800_v26  ;;  %v8466_v3 = vld [vmem:[%s9231_s9 + $0x78] sm:$0xff] }
 0x896   :  { %3036 = vrot.lane.b32.xlu1 %v7946_v25, %s4845_s20  ;;  %v2842_v61 = vsel %vm2829_vm5, %v7639_v35, %v2798_v19  ;;  %v2906_v16 = vmul.f32 %v2881_v29, %v2843_v54  ;;  %9635 = vst [vmem:[#allocation56_spill] sm:$0xff] %v8466_v3 }
 0x897   :  { %3034 = vrot.lane.b32.xlu0 %v7956_v22, %s4845_s20  ;;  %4035 = vmatprep.subr.bf16.mxu0 %v3692_v59  ;;  %v2898_v48 = vmul.f32 %v2881_v29, %v2842_v61 }
 0x898   :  { %4036 = vmatpush1.bf16.msra.mxu0 %v3691_v15  ;;  %v8446_v30 = vpop.permute.xlu1 %2807 }
 0x899   :  { %v2839_v1 = vsel %vm2829_vm5, %v2800_v26, %v8446_v30  ;;  %v8451_v25 = vpop.permute.xlu0 %2805  ;;  %v3683_v45 = vpack.c.bf16 %v2906_v16, %v2898_v48 }
 0x89a   :  { %v2907_v40 = vmul.f32 %v2885_v5, %v2839_v1  ;;  %v2838_v35 = vsel %vm2829_vm5, %v2798_v19, %v8451_v25  ;;  %3044 = vrot.lane.b32.xlu1 %v8022_v32, %s4845_s20  ;;  %v4364_v32 = vld [vmem:[#allocation9 + $0x60] ss:$0 sm:$0xff] }
 0x89b   :  { %v2899_v22 = vmul.f32 %v2885_v5, %v2838_v35  ;;  %3042 = vrot.lane.b32.xlu0 %v8029_v7, %s4845_s20  ;;  %4377 = vmatmul.mubr.msk.bf16.gmra.mxu0 %vm3824_vm8, %v7960_v62  ;;  %v8479_v5 = vld [vmem:[%s9231_s9 + $0x38] sm:$0xff]  ;;  %v2724_v35 = vrot.slane %v8389_v57, %v9574_v60 }
 0x89c   :  { %v3518_v43 = vpop.permute.xlu1 %3517  ;;  %4067 = vmatprep.mubr.bf16.mxu0 %v7806_v46 }
 0x89d   :  { %v3516_v51 = vpop.permute.xlu0 %3515  ;;  %v3684_v29 = vpack.c.bf16 %v2907_v40, %v2899_v22  ;;  %v3546_v7 = vsel %vm1463_vm3, %v8341_v31, %v3518_v43  ;;  %v2720_v40 = vrot.slane %v8387_v41, %v9574_v60 }
 0x89e   :  { %3369 = vrot.lane.b32.xlu1 %v8466_v3, %s4844_s19  ;;  %v3545_v46 = vsel %vm1463_vm3, %v8352_v39, %v3516_v51  ;;  %v3627_v39 = vmul.f32 %v4364_v32, %v3546_v7  ;;  %v8697_v0 = vpop.f32.mrf.mxu1 }
 0x89f   :  { %3367 = vrot.lane.b32.xlu0 %v8479_v5, %s4844_s19  ;;  %4037 = vmatprep.subr.bf16.mxu0 %v3684_v29  ;;  %v3619_v19 = vmul.f32 %v4364_v32, %v3545_v46 }
 0x8a0   :  { %4038 = vmatpush1.bf16.msra.mxu0 %v3683_v45  ;;  %v8483_v17 = vpop.permute.xlu1 %3525 }
 0x8a1   :  { %9636 = vst [vmem:[#allocation57_spill] sm:$0xff] %v8483_v17  ;;  %v3542_v31 = vsel %vm1463_vm3, %v3518_v43, %v8483_v17  ;;  %v8488_v26 = vpop.permute.xlu0 %3523  ;;  %v3771_v48 = vpack.c.bf16 %v3627_v39, %v3619_v19 }
 0x8a2   :  { %9637 = vst [vmem:[#allocation73_spill] sm:$0xff] %v8488_v26  ;;  %v3628_v59 = vmul.f32 %v4365_v53, %v3542_v31  ;;  %v3541_v15 = vsel %vm1463_vm3, %v3516_v51, %v8488_v26  ;;  %3032 = vrot.lane.b32.xlu1 %v7994_v47, %s4845_s20 }
 0x8a3   :  { %v3620_v54 = vmul.f32 %v4365_v53, %v3541_v15  ;;  %3030 = vrot.lane.b32.xlu0 %v8001_v63, %s4845_s20 }
 0x8a4   :  { %v2644_v61 = vpop.permute.xlu1 %2643 }
 0x8a5   :  { %v2642_v1 = vpop.permute.xlu0 %2641  ;;  %v3772_v16 = vpack.c.bf16 %v3628_v59, %v3620_v54  ;;  %v2684_v47 = vsel %vm808_vm9, %v7704_v10, %v2644_v61 }
 0x8a6   :  { %3040 = vrot.lane.b32.xlu1 %v8078_v2, %s4845_s20  ;;  %v2683_v63 = vsel %vm808_vm9, %v7709_v11, %v2642_v1  ;;  %v2761_v51 = vmul.f32 %v2720_v40, %v2684_v47 }
 0x8a7   :  { %3038 = vrot.lane.b32.xlu0 %v8087_v21, %s4845_s20  ;;  %4098 = vmatprep.subr.bf16.mxu1 %v3772_v16  ;;  %v2753_v29 = vmul.f32 %v2720_v40, %v2683_v63 }
 0x8a8   :  { %4099 = vmatpush1.bf16.msra.mxu1 %v3771_v48  ;;  %v8511_v22 = vpop.permute.xlu1 %2651 }
 0x8a9   :  { %v2680_v2 = vsel %vm808_vm9, %v2644_v61, %v8511_v22  ;;  %v8516_v43 = vpop.permute.xlu0 %2649  ;;  %v3675_v31 = vpack.c.bf16 %v2761_v51, %v2753_v29  ;;  %v8561_v29 = vld [vmem:[#allocation9 + $0x30] sm:$0xff] }
 0x8aa   :  { %v2762_v10 = vmul.f32 %v2724_v35, %v2680_v2  ;;  %v2679_v11 = vsel %vm808_vm9, %v2642_v1, %v8516_v43  ;;  %3212 = vrot.lane.b32.xlu1 %v8418_v56, %s4857_s29 }
 0x8ab   :  { %v2754_v21 = vmul.f32 %v2724_v35, %v2679_v11  ;;  %3210 = vrot.lane.b32.xlu0 %v8425_v55, %s4857_s29 }
 0x8ac   :  { %v3514_v45 = vpop.permute.xlu1 %3513 }
 0x8ad   :  { %v3512_v7 = vpop.permute.xlu0 %3511  ;;  %v3676_v46 = vpack.c.bf16 %v2762_v10, %v2754_v21  ;;  %v3544_v39 = vsel %vm1463_vm3, %v8371_v18, %v3514_v45  ;;  %v8563_v10 = vld [vmem:[#allocation9 + $0x38] sm:$0xff] }
 0x8ae   :  { %3208 = vrot.lane.b32.xlu1 %v8466_v3, %s4857_s29  ;;  %v3543_v19 = vsel %vm1463_vm3, %v8376_v23, %v3512_v7  ;;  %v3611_v61 = vmul.f32 %v4364_v32, %v3544_v39 }
 0x8af   :  { %3206 = vrot.lane.b32.xlu0 %v8479_v5, %s4857_s29  ;;  %4039 = vmatprep.subr.bf16.mxu0 %v3676_v46  ;;  %v3603_v1 = vmul.f32 %v4364_v32, %v3543_v19  ;;  %v2889_v46 = vrot.slane %v8561_v29, %v9567_v37 }
 0x8b0   :  { %4040 = vmatpush1.bf16.msra.mxu0 %v3675_v31  ;;  %v8535_v59 = vpop.permute.xlu1 %3521 }
 0x8b1   :  { %9638 = vst [vmem:[#allocation74_spill] sm:$0xff] %v8535_v59  ;;  %v3540_v15 = vsel %vm1463_vm3, %v3514_v45, %v8535_v59  ;;  %v8540_v54 = vpop.permute.xlu0 %3519  ;;  %v3763_v2 = vpack.c.bf16 %v3611_v61, %v3603_v1  ;;  %v9660_v59 = vld [vmem:[#allocation28_spill] sm:$0xff] }
 0x8b2   :  { %9639 = vst [vmem:[#allocation75_spill] sm:$0xff] %v8540_v54  ;;  %v3612_v18 = vmul.f32 %v4365_v53, %v3540_v15  ;;  %v3539_v23 = vsel %vm1463_vm3, %v3512_v7, %v8540_v54  ;;  %3052 = vrot.lane.b32.xlu1 %v8418_v56, %s4845_s20  ;;  %v9640_v15 = vld [vmem:[#allocation24_spill] sm:$0xff] }
 0x8b3   :  { %v3604_v16 = vmul.f32 %v4365_v53, %v3539_v23  ;;  %3050 = vrot.lane.b32.xlu0 %v8425_v55, %s4845_s20  ;;  %9659 = vst [vmem:[#allocation24_spill] sm:$0xff] %v8697_v0  ;;  %v8715_v0 = vpop.f32.mrf.mxu1 }
 0x8b4   :  { %v2640_v48 = vpop.permute.xlu1 %2639 }
 0x8b5   :  { %v2638_v47 = vpop.permute.xlu0 %2637  ;;  %v3764_v63 = vpack.c.bf16 %v3612_v18, %v3604_v16  ;;  %v2682_v32 = vsel %vm808_vm9, %v7736_v12, %v2640_v48  ;;  %v9641_v16 = vld [vmem:[#allocation29_spill] sm:$0xff] }
 0x8b6   :  { %v2681_v51 = vsel %vm808_vm9, %v7751_v52, %v2638_v47  ;;  %3048 = vrot.lane.b32.xlu1 %v8466_v3, %s4845_s20  ;;  %v2745_v11 = vmul.f32 %v2720_v40, %v2682_v32  ;;  %v3781_v32 = vld [vmem:[%s9228_s6] sm:$0xff] }
 0x8b7   :  { %3046 = vrot.lane.b32.xlu0 %v8479_v5, %s4845_s20  ;;  %4100 = vmatprep.subr.bf16.mxu1 %v3764_v63  ;;  %v2737_v12 = vmul.f32 %v2720_v40, %v2681_v51  ;;  %v2893_v40 = vrot.slane %v8563_v10, %v9567_v37  ;;  %v2560_v51 = vrot.slane %v8387_v41, %v9583_v34 }
 0x8b8   :  { %4101 = vmatpush1.bf16.msra.mxu1 %v3763_v2  ;;  %v8559_v53 = vpop.permute.xlu1 %2647 }
 0x8b9   :  { %v2678_v52 = vsel %vm808_vm9, %v2640_v48, %v8559_v53  ;;  %v8568_v21 = vpop.permute.xlu0 %2645  ;;  %v3667_v19 = vpack.c.bf16 %v2745_v11, %v2737_v12 }
 0x8ba   :  { %v2746_v45 = vmul.f32 %v2724_v35, %v2678_v52  ;;  %v2677_v7 = vsel %vm808_vm9, %v2638_v47, %v8568_v21  ;;  %3533 = vrot.lane.b32.xlu1 %v8418_v56, %s4841_s12 }
 0x8bb   :  { %v2738_v31 = vmul.f32 %v2724_v35, %v2677_v7  ;;  %3531 = vrot.lane.b32.xlu0 %v8425_v55, %s4841_s12  ;;  %4378 = vmatmul.mubr.msk.bf16.vlgmr.msra.gmra.mxu1 %vm3824_vm8, %v8429_v50 }
 0x8bc   :  { %v2820_v39 = vpop.permute.xlu1 %2819  ;;  %4128 = vmatprep.mubr.bf16.mxu1 %v9517_v14  ;;  %v2732_v14 = vrot.slane %v8563_v10, %v9574_v60 }
 0x8bd   :  { %v2833_v61 = vsel %vm2829_vm5, %v2820_v39, %v9640_v15  ;;  %v2837_v1 = vsel %vm2829_vm5, %v8405_v4, %v2820_v39  ;;  %v2818_v37 = vpop.permute.xlu0 %2817  ;;  %v3668_v35 = vpack.c.bf16 %v2746_v45, %v2738_v31  ;;  %v3782_v4 = vld [vmem:[%s9228_s6 + $0x8] sm:$0xff]  ;;  %v2564_v31 = vrot.slane %v8389_v57, %v9583_v34  ;;  %v3783_v39 = vld [vmem:[%s9228_s6 + $0x10] sm:$0xff] }
 0x8be   :  { %v2924_v18 = vmul.f32 %v2889_v46, %v2837_v1  ;;  %v2925_v23 = vmul.f32 %v2893_v40, %v2833_v61  ;;  %v2832_v50 = vsel %vm2829_vm5, %v2818_v37, %v9641_v16  ;;  %v2836_v48 = vsel %vm2829_vm5, %v8410_v6, %v2818_v37  ;;  %3529 = vrot.lane.b32.xlu1 %v8466_v3, %s4841_s12  ;;  %v9642_v45 = vld [vmem:[#allocation43_spill] sm:$0xff]  ;;  %v9661_v3 = vld [vmem:[#allocation61_spill] sm:$0xff] }
 0x8bf   :  { %v2916_v47 = vmul.f32 %v2889_v46, %v2836_v48  ;;  %v2917_v63 = vmul.f32 %v2893_v40, %v2832_v50  ;;  %3527 = vrot.lane.b32.xlu0 %v8479_v5, %s4841_s12  ;;  %4041 = vmatprep.subr.bf16.mxu0 %v3668_v35  ;;  %v9643_v48 = vld [vmem:[#allocation54_spill] sm:$0xff] }
 0x8c0   :  { %4042 = vmatpush1.bf16.msra.mxu0 %v3667_v19  ;;  %v2484_v2 = vpop.permute.xlu1 %2483 }
 0x8c1   :  { %v3693_v6 = vpack.c.bf16 %v2924_v18, %v2916_v47  ;;  %v2482_v11 = vpop.permute.xlu0 %2481  ;;  %v3694_v12 = vpack.c.bf16 %v2925_v23, %v2917_v63  ;;  %v2524_v52 = vsel %vm678_vm12, %v9596_v44, %v2484_v2  ;;  %v4611_v18 = vld [vmem:[#allocation7 + $0x4] ss:$12 sps:$4 sm:$0xff]  }
 0x8c2   :  { %v2523_v7 = vsel %vm678_vm12, %v9642_v45, %v2482_v11  ;;  %3791 = vperm.xlu1 %4568, %v3782_v4   ;;  %v2601_v15 = vmul.f32 %v2560_v51, %v2524_v52 }
 0x8c3   :  { %4137 = vmatprep.subr.bf16.mxu1 %v3694_v12  ;;  %3786 = vperm.xlu0 %4567, %v3781_v32   ;;  %v2593_v61 = vmul.f32 %v2560_v51, %v2523_v7 }
 0x8c4   :  { %4138 = vmatpush1.bf16.msra.mxu1 %v3693_v6  ;;  %v8619_v19 = vpop.permute.xlu1 %2491  ;;  %v9644_v6 = vld [vmem:[#allocation55_spill] sm:$0xff] }
 0x8c5   :  { %v2520_v44 = vsel %vm678_vm12, %v2484_v2, %v8619_v19  ;;  %v8624_v1 = vpop.permute.xlu0 %2489  ;;  %4379 = vmatmul.mubr.msk.bf16.gmra.mxu1 %vm3824_vm8, %v7960_v62  ;;  %v3659_v50 = vpack.c.bf16 %v2601_v15, %v2593_v61  ;;  %v9645_v61 = vld [vmem:[#allocation36_spill] sm:$0xff] }
 0x8c6   :  { %v2602_v37 = vmul.f32 %v2564_v31, %v2520_v44  ;;  %v2519_v35 = vsel %vm678_vm12, %v2482_v11, %v8624_v1  ;;  %3796 = vperm.xlu1 %4568, %v3783_v39   ;;  %4169 = vmatprep.mubr.bf16.mxu1 %v4611_v18  ;;  %v9647_v18 = vld [vmem:[#allocation48_spill] sm:$0xff] }
 0x8c7   :  { %v2594_v23 = vmul.f32 %v2564_v31, %v2519_v35 }
 0x8c8   :  { %v2816_v16 = vpop.permute.xlu1 %2815 }
 0x8c9   :  { %v2831_v47 = vsel %vm2829_vm5, %v2816_v16, %v9643_v48  ;;  %v2835_v63 = vsel %vm2829_vm5, %v8446_v30, %v2816_v16  ;;  %v2814_v62 = vpop.permute.xlu0 %2813  ;;  %v3660_v4 = vpack.c.bf16 %v2602_v37, %v2594_v23  ;;  %v9646_v37 = vld [vmem:[#allocation18_spill] sm:$0xff]  ;;  %v9650_v16 = vld [vmem:[#allocation41_spill] sm:$0xff] }
 0x8ca   :  { %v2908_v2 = vmul.f32 %v2889_v46, %v2835_v63  ;;  %v2909_v32 = vmul.f32 %v2893_v40, %v2831_v47  ;;  %v2830_v11 = vsel %vm2829_vm5, %v2814_v62, %v9644_v6  ;;  %v2834_v12 = vsel %vm2829_vm5, %v8451_v25, %v2814_v62  ;;  %v9648_v23 = vld [vmem:[#allocation38_spill] sm:$0xff]  ;;  %v9652_v63 = vld [vmem:[#allocation25_spill] sm:$0xff] }
 0x8cb   :  { %v2900_v52 = vmul.f32 %v2889_v46, %v2834_v12  ;;  %v2901_v45 = vmul.f32 %v2893_v40, %v2830_v11  ;;  %4043 = vmatprep.subr.bf16.mxu0 %v3660_v4  ;;  %v2362_v25 = vsel %vm2348_vm10, %v9648_v23, %v9647_v18  ;;  %v9649_v46 = vld [vmem:[#allocation33_spill] sm:$0xff]  ;;  %v9653_v62 = vld [vmem:[#allocation22_spill] sm:$0xff] }
 0x8cc   :  { %4044 = vmatpush1.bf16.msra.mxu0 %v3659_v50  ;;  %v2480_v7 = vpop.permute.xlu1 %2479  ;;  %v2400_v40 = vrot.slane %v8387_v41, %v9649_v46  ;;  %v9651_v50 = vld [vmem:[#allocation39_spill] sm:$0xff]  ;;  %v2404_v47 = vrot.slane %v8389_v57, %v9649_v46  ;;  %v2364_v4 = vsel %vm2348_vm10, %v9653_v62, %v9652_v63  ;;  %v9656_v11 = vld [vmem:[#allocation45_spill] sm:$0xff] }
 0x8cd   :  { %v3685_v39 = vpack.c.bf16 %v2908_v2, %v2900_v52  ;;  %v2478_v15 = vpop.permute.xlu0 %2477  ;;  %v3686_v30 = vpack.c.bf16 %v2909_v32, %v2901_v45  ;;  %v2522_v44 = vsel %vm678_vm12, %v9645_v61, %v2480_v7  ;;  %v2361_v48 = vsel %vm2348_vm10, %v9651_v50, %v9650_v16  ;;  %v9654_v2 = vld [vmem:[#allocation53_spill] sm:$0xff]  ;;  %v9655_v32 = vld [vmem:[#allocation52_spill] sm:$0xff]  ;;  %v9657_v52 = vld [vmem:[#allocation47_spill] sm:$0xff] }
 0x8ce   :  { %v2521_v35 = vsel %vm678_vm12, %v9646_v37, %v2478_v15  ;;  %v2363_v6 = vsel %vm2348_vm10, %v9655_v32, %v9654_v2  ;;  %v2360_v12 = vsel %vm2348_vm10, %v9652_v63, %v9656_v11  ;;  %v2359_v45 = vsel %vm2348_vm10, %v9654_v2, %v9657_v52  ;;  %v9658_v61 = vld [vmem:[#allocation44_spill] sm:$0xff] }
 0x8cf   :  { %4139 = vmatprep.subr.bf16.mxu1 %v3686_v30  ;;  %v2358_v37 = vsel %vm2348_vm10, %v9647_v18, %v9658_v61  ;;  %v2585_v23 = vmul.f32 %v2560_v51, %v2522_v44  ;;  %v2577_v50 = vmul.f32 %v2560_v51, %v2521_v35  ;;  %v2728_v2 = vrot.slane %v8561_v29, %v9574_v60 }
 0x8d0   :  { %4140 = vmatpush1.bf16.msra.mxu1 %v3685_v39  ;;  %v8677_v30 = vpop.permute.xlu1 %2487  ;;  %v8695_v18 = vmul.f32 %v2400_v40, %v2362_v25  ;;  %v2442_v51 = vmul.f32 %v2404_v47, %v2360_v12  ;;  %v2434_v44 = vmul.f32 %v2404_v47, %v2359_v45  ;;  %v2433_v54 = vmul.f32 %v2400_v40, %v2363_v6  ;;  %v9662_v45 = vld [vmem:[#allocation62_spill] sm:$0xff] }
 0x8d1   :  { %v2518_v62 = vsel %vm678_vm12, %v2480_v7, %v8677_v30  ;;  %v8686_v63 = vpop.permute.xlu0 %2485  ;;  %v2441_v7 = vmul.f32 %v2400_v40, %v2364_v4  ;;  %v3651_v17 = vpack.c.bf16 %v2585_v23, %v2577_v50 }
 0x8d2   :  { %v2586_v32 = vmul.f32 %v2564_v31, %v2518_v62  ;;  %v2517_v39 = vsel %vm678_vm12, %v2478_v15, %v8686_v63  ;;  %v2426_v62 = vmul.f32 %v2404_v47, %v2358_v37  ;;  %v2357_v15 = vsel %vm2348_vm10, %v9650_v16, %v9660_v59 }
 0x8d3   :  { %v2578_v35 = vmul.f32 %v2564_v31, %v2517_v39  ;;  %v2418_v23 = vmul.f32 %v2404_v47, %v2357_v15  ;;  %v9663_v47 = vld [vmem:[#allocation34_spill] sm:$0xff] }
 0x8d4   :  { %v2660_v26 = vpop.permute.xlu1 %2659 }
 0x8d5   :  { %v2672_v60 = vsel %vm808_vm9, %v2660_v26, %v9661_v3  ;;  %v2676_v31 = vsel %vm808_vm9, %v8511_v22, %v2660_v26  ;;  %v2658_v25 = vpop.permute.xlu0 %2657  ;;  %v3652_v12 = vpack.c.bf16 %v2586_v32, %v2578_v35  ;;  %v3644_v3 = vpack.c.bf16 %v2442_v51, %v2434_v44  ;;  %v9664_v44 = vld [vmem:[#allocation65_spill] sm:$0xff] }
 0x8d6   :  { %v2763_v4 = vmul.f32 %v2728_v2, %v2676_v31  ;;  %v2764_v6 = vmul.f32 %v2732_v14, %v2672_v60  ;;  %v2671_v37 = vsel %vm808_vm9, %v2658_v25, %v9662_v45  ;;  %v2675_v16 = vsel %vm808_vm9, %v8516_v43, %v2658_v25 }
 0x8d7   :  { %v2755_v50 = vmul.f32 %v2728_v2, %v2675_v16  ;;  %v2756_v39 = vmul.f32 %v2732_v14, %v2671_v37  ;;  %4045 = vmatprep.subr.bf16.mxu0 %v3652_v12  ;;  %v2417_v26 = vmul.f32 %v2400_v40, %v2361_v48  ;;  %v3643_v22 = vpack.c.bf16 %v2441_v7, %v2433_v54  ;;  %v9665_v37 = vld [vmem:[#allocation66_spill] sm:$0xff] }
 0x8d8   :  { %4046 = vmatpush1.bf16.msra.mxu0 %v3651_v17  ;;  %v2656_v32 = vpop.permute.xlu1 %2655  ;;  %v8719_v35 = vrot.slane %v8561_v29, %v9583_v34  ;;  %v8723_v60 = vrot.slane %v8563_v10, %v9583_v34  ;;  %v3636_v12 = vpack.c.bf16 %v2426_v62, %v2418_v23 }
 0x8d9   :  { %v3677_v43 = vpack.c.bf16 %v2763_v4, %v2755_v50  ;;  %v2670_v15 = vsel %vm808_vm9, %v2656_v32, %v9663_v47  ;;  %v2674_v40 = vsel %vm808_vm9, %v8559_v53, %v2656_v32  ;;  %4047 = vmatprep.subr.bf16.mxu0 %v3644_v3  ;;  %v2654_v17 = vpop.permute.xlu0 %2653  ;;  %v3678_v54 = vpack.c.bf16 %v2764_v6, %v2756_v39  ;;  %v8737_v4 = vpop.f32.mrf.mxu1 }
 0x8da   :  { %v2747_v48 = vmul.f32 %v2728_v2, %v2674_v40  ;;  %v2748_v51 = vmul.f32 %v2732_v14, %v2670_v15  ;;  %v2669_v7 = vsel %vm808_vm9, %v2654_v17, %v9664_v44  ;;  %v2673_v34 = vsel %vm808_vm9, %v8568_v21, %v2654_v17 }
 0x8db   :  { %v2739_v31 = vmul.f32 %v2728_v2, %v2673_v34  ;;  %v2740_v25 = vmul.f32 %v2732_v14, %v2669_v7  ;;  %4141 = vmatprep.subr.bf16.mxu1 %v3678_v54  ;;  %v3635_v53 = vpack.c.bf16 %v8695_v18, %v2417_v26  ;;  %v9666_v18 = vld [vmem:[#allocation67_spill] sm:$0xff] }
 0x8dc   :  { %4048 = vmatpush1.bf16.msra.mxu0 %v3643_v22  ;;  %4142 = vmatpush1.bf16.msra.mxu1 %v3677_v43  ;;  %v2500_v6 = vpop.permute.xlu1 %2499  ;;  %v9667_v43 = vld [vmem:[#allocation27_spill] sm:$0xff] }
 0x8dd   :  { %v3669_v45 = vpack.c.bf16 %v2747_v48, %v2739_v31  ;;  %v2512_v16 = vsel %vm678_vm12, %v2500_v6, %v9665_v37  ;;  %v2516_v21 = vsel %vm678_vm12, %v8619_v19, %v2500_v6  ;;  %4049 = vmatprep.subr.bf16.mxu0 %v3636_v12  ;;  %v2498_v14 = vpop.permute.xlu0 %2497  ;;  %v3670_v2 = vpack.c.bf16 %v2748_v51, %v2740_v25  ;;  %v8756_v19 = vpop.f32.mrf.mxu1  ;;  %v9669_v48 = vld [vmem:[#allocation21_spill] sm:$0xff] }
 0x8de   :  { %v2603_v62 = vmul.f32 %v8719_v35, %v2516_v21  ;;  %v2604_v23 = vmul.f32 %v8723_v60, %v2512_v16  ;;  %v2511_v50 = vsel %vm678_vm12, %v2498_v14, %v9666_v18  ;;  %v2515_v39 = vsel %vm678_vm12, %v8624_v1, %v2498_v14  ;;  %v9668_v1 = vld [vmem:[#allocation50_spill] sm:$0xff]  ;;  %v9670_v21 = vld [vmem:[#allocation40_spill] sm:$0xff]  ;;  %v9671_v18 = vld [vmem:[#allocation37_spill] sm:$0xff] }
 0x8df   :  { %v2595_v3 = vmul.f32 %v8719_v35, %v2515_v39  ;;  %v2596_v26 = vmul.f32 %v8723_v60, %v2511_v50  ;;  %4143 = vmatprep.subr.bf16.mxu1 %v3670_v2  ;;  %v8760_v47 = vrot.slane %v8387_v41, %v9667_v43  ;;  %v8762_v17 = vpop.f32.mrf.mxu1  ;;  %v8772_v44 = vrot.slane %v8389_v57, %v9667_v43  ;;  %v9672_v39 = vld [vmem:[#allocation35_spill] sm:$0xff] }
 0x8e0   :  { %4050 = vmatpush1.bf16.msra.mxu0 %v3635_v53  ;;  %4144 = vmatpush1.bf16.msra.mxu1 %v3669_v45  ;;  %v3358_v22 = vpop.permute.xlu1 %3357  ;;  %v2408_v16 = vrot.slane %v8561_v29, %v9649_v46  ;;  %v2356_v14 = vsel %vm2348_vm10, %v9656_v11, %v9670_v21  ;;  %v2412_v2 = vrot.slane %v8563_v10, %v9649_v46 }
 0x8e1   :  { %v3661_v32 = vpack.c.bf16 %v2603_v62, %v2595_v3  ;;  %v3356_v15 = vpop.permute.xlu0 %3355  ;;  %v3662_v40 = vpack.c.bf16 %v2604_v23, %v2596_v26  ;;  %v3386_v54 = vsel %vm1333_vm7, %v9668_v1, %v3358_v22  ;;  %v8774_v7 = vpop.f32.mrf.mxu1  ;;  %v2355_v50 = vsel %vm2348_vm10, %v9657_v52, %v9671_v18  ;;  %v9673_v3 = vld [vmem:[#allocation19_spill] sm:$0xff]  ;;  %v9676_v1 = vld [vmem:[#allocation68_spill] sm:$0xff] }
 0x8e2   :  { %v3385_v51 = vsel %vm1333_vm7, %v9669_v48, %v3356_v15  ;;  %v3467_v31 = vmul.f32 %v8760_v47, %v3386_v54  ;;  %v2350_v26 = vsel %vm2348_vm10, %v9673_v3, %v9672_v39 }
 0x8e3   :  { %4145 = vmatprep.subr.bf16.mxu1 %v3662_v40  ;;  %v3459_v25 = vmul.f32 %v8760_v47, %v3385_v51  ;;  %v3930_v6 = vpop.f32.mrf.mxu1 }
 0x8e4   :  { %4146 = vmatpush1.bf16.msra.mxu1 %v3661_v32  ;;  %v8776_v34 = vpop.permute.xlu1 %3365  ;;  %v9675_v32 = vld [vmem:[#allocation16_spill] sm:$0xff] }
 0x8e5   :  { %v3382_v12 = vsel %vm1333_vm7, %v3358_v22, %v8776_v34  ;;  %v8783_v53 = vpop.permute.xlu0 %3363  ;;  %v3931_v23 = vpop.f32.mrf.mxu1  ;;  %v9674_v22 = vld [vmem:[#allocation42_spill] sm:$0xff]  ;;  %v2351_v46 = vsel %vm2348_vm10, %v9671_v18, %v9675_v32  ;;  %v3755_v40 = vpack.c.bf16 %v3467_v31, %v3459_v25  ;;  %v2443_v32 = vmul.f32 %v2408_v16, %v2356_v14 }
 0x8e6   :  { %v3468_v45 = vmul.f32 %v8772_v44, %v3382_v12  ;;  %v3381_v37 = vsel %vm1333_vm7, %v3356_v15, %v8783_v53  ;;  %v2352_v11 = vsel %vm2348_vm10, %v9670_v21, %v9674_v22  ;;  %v2436_v23 = vmul.f32 %v2412_v2, %v2351_v46 }
 0x8e7   :  { %v3460_v62 = vmul.f32 %v8772_v44, %v3381_v37  ;;  %v9677_v37 = vld [vmem:[#allocation69_spill] sm:$0xff]  ;;  %v2444_v25 = vmul.f32 %v2412_v2, %v2352_v11 }
 0x8e8   :  { %v2496_v15 = vpop.permute.xlu1 %2495 }
 0x8e9   :  { %v2510_v52 = vsel %vm678_vm12, %v2496_v15, %v9676_v1  ;;  %v2514_v54 = vsel %vm678_vm12, %v8677_v30, %v2496_v15  ;;  %v2494_v48 = vpop.permute.xlu0 %2493  ;;  %v3756_v51 = vpack.c.bf16 %v3468_v45, %v3460_v62  ;;  %v9678_v45 = vld [vmem:[#allocation20_spill] sm:$0xff]  ;;  %v9679_v62 = vld [vmem:[#allocation13_spill] sm:$0xff]  ;;  %v2435_v15 = vmul.f32 %v2408_v16, %v2355_v50 }
 0x8ea   :  { %v2587_v12 = vmul.f32 %v8719_v35, %v2514_v54  ;;  %v2588_v6 = vmul.f32 %v8723_v60, %v2510_v52  ;;  %v2509_v21 = vsel %vm678_vm12, %v2494_v48, %v9677_v37  ;;  %v2513_v31 = vsel %vm678_vm12, %v8686_v63, %v2494_v48 }
 0x8eb   :  { %v2579_v18 = vmul.f32 %v8719_v35, %v2513_v31  ;;  %v2580_v30 = vmul.f32 %v8723_v60, %v2509_v21  ;;  %4051 = vmatprep.subr.bf16.mxu0 %v3756_v51  ;;  %v2349_v39 = vsel %vm2348_vm10, %v9679_v62, %v9678_v45  ;;  %v2354_v63 = vsel %vm2348_vm10, %v9658_v61, %v9673_v3 }
 0x8ec   :  { %4052 = vmatpush2.bf16.msra.mxu0 %v3755_v40  ;;  %v3354_v22 = vpop.permute.xlu1 %3353  ;;  %v2353_v35 = vsel %vm2348_vm10, %v9660_v59, %v9679_v62  ;;  %v2428_v60 = vmul.f32 %v2412_v2, %v2350_v26  ;;  %v2420_v11 = vmul.f32 %v2412_v2, %v2349_v39  ;;  %v3646_v46 = vpack.c.bf16 %v2444_v25, %v2436_v23 }
 0x8ed   :  { %v3653_v1 = vpack.c.bf16 %v2587_v12, %v2579_v18  ;;  %v3352_v52 = vpop.permute.xlu0 %3351  ;;  %v3654_v54 = vpack.c.bf16 %v2588_v6, %v2580_v30  ;;  %v3384_v14 = vsel %vm1333_vm7, %v8131_v13, %v3354_v22  ;;  %v2427_v61 = vmul.f32 %v2408_v16, %v2354_v63 }
 0x8ee   :  { %v3383_v50 = vsel %vm1333_vm7, %v8136_v49, %v3352_v52  ;;  %v2419_v3 = vmul.f32 %v2408_v16, %v2353_v35  ;;  %v3645_v48 = vpack.c.bf16 %v2443_v32, %v2435_v15  ;;  %v3451_v13 = vmul.f32 %v8760_v47, %v3384_v14 }
 0x8ef   :  { %4147 = vmatprep.subr.bf16.mxu1 %v3654_v54  ;;  %v3443_v26 = vmul.f32 %v8760_v47, %v3383_v50  ;;  %v3638_v12 = vpack.c.bf16 %v2428_v60, %v2420_v11  ;;  %v3266_v23 = vrot.slane %v8387_v41, %v9617_v27  ;;  %v3270_v47 = vrot.slane %v8389_v57, %v9617_v27 }
 0x8f0   :  { %4148 = vmatpush1.bf16.msra.mxu1 %v3653_v1  ;;  %v8848_v40 = vpop.permute.xlu1 %3361  ;;  %v3637_v31 = vpack.c.bf16 %v2427_v61, %v2419_v3  ;;  %v3438_v3 = vrot.slane %v8563_v10, %v9667_v43 }
 0x8f1   :  { %v3380_v59 = vsel %vm1333_vm7, %v3354_v22, %v8848_v40  ;;  %4149 = vmatprep.subr.bf16.mxu1 %v3646_v46  ;;  %v8853_v2 = vpop.permute.xlu0 %3359  ;;  %v3747_v25 = vpack.c.bf16 %v3451_v13, %v3443_v26 }
 0x8f2   :  { %v3452_v49 = vmul.f32 %v8772_v44, %v3380_v59  ;;  %v3379_v51 = vsel %vm1333_vm7, %v3352_v52, %v8853_v2 }
 0x8f3   :  { %v3444_v16 = vmul.f32 %v8772_v44, %v3379_v51 }
 0x8f4   :  { %4150 = vmatpush1.bf16.msra.mxu1 %v3645_v48  ;;  %v3197_v6 = vpop.permute.xlu1 %3196 }
 0x8f5   :  { %4151 = vmatprep.subr.bf16.mxu1 %v3638_v12  ;;  %v3195_v37 = vpop.permute.xlu0 %3194  ;;  %v3748_v21 = vpack.c.bf16 %v3452_v49, %v3444_v16  ;;  %v3226_v18 = vsel %vm3214_vm11, %v8211_v28, %v3197_v6  ;;  %v9680_v49 = vld [vmem:[#allocation31_spill] sm:$0xff] }
 0x8f6   :  { %v3225_v44 = vsel %vm3214_vm11, %v8222_v8, %v3195_v37  ;;  %v3307_v39 = vmul.f32 %v3266_v23, %v3226_v18  ;;  %v3105_v18 = vrot.slane %v8387_v41, %v9624_v33 }
 0x8f7   :  { %4053 = vmatprep.subr.bf16.mxu0 %v3748_v21  ;;  %v3299_v22 = vmul.f32 %v3266_v23, %v3225_v44 }
 0x8f8   :  { %4054 = vmatpush2.bf16.msra.mxu0 %v3747_v25  ;;  %4152 = vmatpush1.bf16.msra.mxu1 %v3637_v31  ;;  %v8872_v30 = vpop.permute.xlu1 %3204 }
 0x8f9   :  { %v3222_v45 = vsel %vm3214_vm11, %v3197_v6, %v8872_v30  ;;  %v8877_v62 = vpop.permute.xlu0 %3202  ;;  %v3739_v54 = vpack.c.bf16 %v3307_v39, %v3299_v22  ;;  %v3109_v22 = vrot.slane %v8389_v57, %v9624_v33 }
 0x8fa   :  { %v3308_v32 = vmul.f32 %v3270_v47, %v3222_v45  ;;  %v3221_v28 = vsel %vm3214_vm11, %v3195_v37, %v8877_v62 }
 0x8fb   :  { %v3300_v15 = vmul.f32 %v3270_v47, %v3221_v28 }
 0x8fc   :  { %v3193_v8 = vpop.permute.xlu1 %3192 }
 0x8fd   :  { %v3191_v1 = vpop.permute.xlu0 %3190  ;;  %v3740_v52 = vpack.c.bf16 %v3308_v32, %v3300_v15  ;;  %v3224_v63 = vsel %vm3214_vm11, %v8243_v58, %v3193_v8 }
 0x8fe   :  { %v3223_v35 = vsel %vm3214_vm11, %v8250_v9, %v3191_v1  ;;  %v3291_v11 = vmul.f32 %v3266_v23, %v3224_v63  ;;  %v3434_v9 = vrot.slane %v8561_v29, %v9667_v43  ;;  %v9681_v43 = vld [vmem:[#allocation58_spill] sm:$0xff] }
 0x8ff   :  { %4055 = vmatprep.subr.bf16.mxu0 %v3740_v52  ;;  %v3283_v14 = vmul.f32 %v3266_v23, %v3223_v35 }
 0x900   :  { %4056 = vmatpush2.bf16.msra.mxu0 %v3739_v54  ;;  %v8888_v60 = vpop.permute.xlu1 %3200 }
 0x901   :  { %v3220_v50 = vsel %vm3214_vm11, %v3193_v8, %v8888_v60  ;;  %v8893_v46 = vpop.permute.xlu0 %3198  ;;  %v3731_v13 = vpack.c.bf16 %v3291_v11, %v3283_v14  ;;  %v9682_v11 = vld [vmem:[#allocation49_spill] sm:$0xff] }
 0x902   :  { %v3292_v61 = vmul.f32 %v3270_v47, %v3220_v50  ;;  %v3219_v58 = vsel %vm3214_vm11, %v3191_v1, %v8893_v46 }
 0x903   :  { %v3284_v48 = vmul.f32 %v3270_v47, %v3219_v58 }
 0x904   :  { %v3374_v59 = vpop.permute.xlu1 %3373 }
 0x905   :  { %v3378_v26 = vsel %vm1333_vm7, %v8776_v34, %v3374_v59  ;;  %v3406_v51 = vsel %vm1333_vm7, %v3374_v59, %v9680_v49  ;;  %v3372_v16 = vpop.permute.xlu0 %3371  ;;  %v3732_v12 = vpack.c.bf16 %v3292_v61, %v3284_v48 }
 0x906   :  { %v3469_v6 = vmul.f32 %v3434_v9, %v3378_v26  ;;  %v3470_v37 = vmul.f32 %v3438_v3, %v3406_v51  ;;  %v3377_v21 = vsel %vm1333_vm7, %v8783_v53, %v3372_v16  ;;  %v3405_v31 = vsel %vm1333_vm7, %v3372_v16, %v9681_v43 }
 0x907   :  { %v3461_v25 = vmul.f32 %v3434_v9, %v3377_v21  ;;  %v3462_v23 = vmul.f32 %v3438_v3, %v3405_v31  ;;  %4057 = vmatprep.subr.bf16.mxu0 %v3732_v12  ;;  %v2949_v16 = vrot.slane %v8389_v57, %v9627_v42  ;;  %v9684_v21 = vld [vmem:[#allocation71_spill] sm:$0xff] }
 0x908   :  { %4058 = vmatpush2.bf16.msra.mxu0 %v3731_v13  ;;  %v3037_v34 = vpop.permute.xlu1 %3036  ;;  %v9683_v13 = vld [vmem:[#allocation46_spill] sm:$0xff]  ;;  %v4612_v57 = vld [vmem:[%s9231_s9 + $0xa8] sm:$0xff] }
 0x909   :  { %v3757_v47 = vpack.c.bf16 %v3469_v6, %v3461_v25  ;;  %v3035_v44 = vpop.permute.xlu0 %3034  ;;  %v3758_v45 = vpack.c.bf16 %v3470_v37, %v3462_v23  ;;  %v3065_v39 = vsel %vm1043_vm6, %v8277_v36, %v3037_v34  ;;  %v2979_v25 = vmul.f32 %v4612_v57, %v2949_v16  ;;  %v4613_v23 = vld [vmem:[%s9231_s9 + $0xe8] sm:$0xff] }
 0x90a   :  { %v3064_v53 = vsel %vm1043_vm6, %v8282_v20, %v3035_v44  ;;  %v3146_v28 = vmul.f32 %v3105_v18, %v3065_v39 }
 0x90b   :  { %4153 = vmatprep.subr.bf16.mxu1 %v3758_v45  ;;  %v3138_v15 = vmul.f32 %v3105_v18, %v3064_v53 }
 0x90c   :  { %4154 = vmatpush2.bf16.msra.mxu1 %v3757_v47  ;;  %v8924_v32 = vpop.permute.xlu1 %3044 }
 0x90d   :  { %v3061_v8 = vsel %vm1043_vm6, %v3037_v34, %v8924_v32  ;;  %v8929_v1 = vpop.permute.xlu0 %3042  ;;  %v3723_v63 = vpack.c.bf16 %v3146_v28, %v3138_v15  ;;  %v2987_v34 = vmul.f32 %v4613_v23, %v2949_v16  ;;  %v3274_v28 = vrot.slane %v8561_v29, %v9617_v27 }
 0x90e   :  { %v3147_v36 = vmul.f32 %v3109_v22, %v3061_v8  ;;  %v3060_v20 = vsel %vm1043_vm6, %v3035_v44, %v8929_v1  ;;  %v3278_v15 = vrot.slane %v8563_v10, %v9617_v27  ;;  %v4617_v27 = vld [vmem:[%s9231_s9 + $0x68] sm:$0xff] }
 0x90f   :  { %v3139_v52 = vmul.f32 %v3109_v22, %v3060_v20  ;;  %v4615_v20 = vld [vmem:[%s9231_s9 + $0xe0] sm:$0xff] }
 0x910   :  { %v3370_v54 = vpop.permute.xlu1 %3369 }
 0x911   :  { %v3376_v35 = vsel %vm1333_vm7, %v8848_v40, %v3370_v54  ;;  %v3404_v14 = vsel %vm1333_vm7, %v3370_v54, %v9682_v11  ;;  %v3368_v50 = vpop.permute.xlu0 %3367  ;;  %v3724_v61 = vpack.c.bf16 %v3147_v36, %v3139_v52 }
 0x912   :  { %v3453_v58 = vmul.f32 %v3434_v9, %v3376_v35  ;;  %v3454_v48 = vmul.f32 %v3438_v3, %v3404_v14  ;;  %v3375_v59 = vsel %vm1333_vm7, %v8853_v2, %v3368_v50  ;;  %v3403_v26 = vsel %vm1333_vm7, %v3368_v50, %v9683_v13  ;;  %v9685_v2 = vld [vmem:[#allocation72_spill] sm:$0xff] }
 0x913   :  { %v3445_v49 = vmul.f32 %v3434_v9, %v3375_v59  ;;  %v3446_v51 = vmul.f32 %v3438_v3, %v3403_v26  ;;  %4059 = vmatprep.subr.bf16.mxu0 %v3724_v61  ;;  %v2945_v9 = vrot.slane %v8387_v41, %v9627_v42  ;;  %v4616_v35 = vld [vmem:[%s9231_s9 + $0x28] sm:$0xff] }
 0x914   :  { %4060 = vmatpush2.bf16.msra.mxu0 %v3723_v63  ;;  %v3033_v40 = vpop.permute.xlu1 %3032  ;;  %v3708_v63 = vpack.c.bf16 %v2987_v34, %v2979_v25  ;;  %v2963_v11 = vmul.f32 %v4616_v35, %v2949_v16  ;;  %v9686_v61 = vld [vmem:[#allocation15_spill] sm:$0xff]  ;;  %v9688_v34 = vld [vmem:[#allocation14_spill] sm:$0xff] }
 0x915   :  { %v3749_v12 = vpack.c.bf16 %v3453_v58, %v3445_v49  ;;  %v3031_v6 = vpop.permute.xlu0 %3030  ;;  %v3750_v37 = vpack.c.bf16 %v3454_v48, %v3446_v51  ;;  %v3063_v43 = vsel %vm1043_vm6, %v9684_v21, %v3033_v40  ;;  %v2986_v52 = vmul.f32 %v4615_v20, %v2945_v9  ;;  %v9687_v51 = vld [vmem:[#allocation17_spill] sm:$0xff]  ;;  %v9690_v35 = vld [vmem:[#allocation23_spill] sm:$0xff] }
 0x916   :  { %v3062_v31 = vsel %vm1043_vm6, %v9685_v2, %v3031_v6  ;;  %v3130_v47 = vmul.f32 %v3105_v18, %v3063_v43  ;;  %v3117_v21 = vrot.slane %v8563_v10, %v9624_v33 }
 0x917   :  { %4155 = vmatprep.subr.bf16.mxu1 %v3750_v37  ;;  %v3122_v44 = vmul.f32 %v3105_v18, %v3062_v31  ;;  %v4614_v18 = vld [vmem:[%s9231_s9 + $0xa0] sm:$0xff] }
 0x918   :  { %4156 = vmatpush2.bf16.msra.mxu1 %v3749_v12  ;;  %v8956_v3 = vpop.permute.xlu1 %3040  ;;  %v2978_v36 = vmul.f32 %v4614_v18, %v2945_v9  ;;  %v4619_v31 = vld [vmem:[%s9231_s9 + $0x60] sm:$0xff] }
 0x919   :  { %v3059_v45 = vsel %vm1043_vm6, %v3033_v40, %v8956_v3  ;;  %v8967_v41 = vpop.permute.xlu0 %3038  ;;  %v3715_v14 = vpack.c.bf16 %v3130_v47, %v3122_v44  ;;  %v2970_v57 = vmul.f32 %v4619_v31, %v2945_v9  ;;  %v4622_v31 = vld [vmem:[%s9231_s9 + $0xf0] sm:$0xff] }
 0x91a   :  { %v3131_v39 = vmul.f32 %v3109_v22, %v3059_v45  ;;  %v3058_v53 = vsel %vm1043_vm6, %v3031_v6, %v8967_v41  ;;  %v3113_v6 = vrot.slane %v8561_v29, %v9624_v33 }
 0x91b   :  { %v3123_v8 = vmul.f32 %v3109_v22, %v3058_v53  ;;  %v2971_v22 = vmul.f32 %v4617_v27, %v2949_v16 }
 0x91c   :  { %v3213_v54 = vpop.permute.xlu1 %3212 }
 0x91d   :  { %v3218_v50 = vsel %vm3214_vm11, %v8872_v30, %v3213_v54  ;;  %v3246_v58 = vsel %vm3214_vm11, %v3213_v54, %v9686_v61  ;;  %v3211_v48 = vpop.permute.xlu0 %3210  ;;  %v3716_v59 = vpack.c.bf16 %v3131_v39, %v3123_v8  ;;  %v3707_v30 = vpack.c.bf16 %v2986_v52, %v2978_v36  ;;  %v9689_v8 = vld [vmem:[#allocation51_spill] sm:$0xff] }
 0x91e   :  { %v3309_v13 = vmul.f32 %v3274_v28, %v3218_v50  ;;  %v3310_v26 = vmul.f32 %v3278_v15, %v3246_v58  ;;  %v3217_v49 = vsel %vm3214_vm11, %v8877_v62, %v3211_v48  ;;  %v3245_v40 = vsel %vm3214_vm11, %v3211_v48, %v9687_v51  ;;  %v4618_v62 = vld [vmem:[%s9231_s9 + $0x20] sm:$0xff]  ;;  %v4620_v48 = vld [vmem:[%s9231_s9 + $0xb0] sm:$0xff] }
 0x91f   :  { %v3301_v16 = vmul.f32 %v3274_v28, %v3217_v49  ;;  %v3302_v12 = vmul.f32 %v3278_v15, %v3245_v40  ;;  %4061 = vmatprep.subr.bf16.mxu0 %v3716_v59  ;;  %v3700_v43 = vpack.c.bf16 %v2971_v22, %v2963_v11  ;;  %v2962_v2 = vmul.f32 %v4618_v62, %v2945_v9  ;;  %v9060_v62 = vld [vmem:[#allocation7] ss:$12 sps:$4 sm:$0xff]  }
 0x920   :  { %4062 = vmatpush2.bf16.msra.mxu0 %v3715_v14  ;;  %v3209_v37 = vpop.permute.xlu1 %3208  ;;  %v2957_v52 = vrot.slane %v8563_v10, %v9627_v42  ;;  %v9026_v54 = vrot.slane %v8561_v29, %v9627_v42  ;;  %v9691_v42 = vld [vmem:[#allocation26_spill] sm:$0xff] }
 0x921   :  { %v3741_v25 = vpack.c.bf16 %v3309_v13, %v3301_v16  ;;  %v3216_v23 = vsel %vm3214_vm11, %v8888_v60, %v3209_v37  ;;  %v3244_v33 = vsel %vm3214_vm11, %v3209_v37, %v9688_v34  ;;  %v3207_v47 = vpop.permute.xlu0 %3206  ;;  %4063 = vmatprep.subr.bf16.mxu0 %v3708_v63  ;;  %v3742_v44 = vpack.c.bf16 %v3310_v26, %v3302_v12  ;;  %v9692_v26 = vld [vmem:[#allocation32_spill] sm:$0xff]  ;;  %v9693_v12 = vld [vmem:[#allocation30_spill] sm:$0xff] }
 0x922   :  { %v3293_v45 = vmul.f32 %v3274_v28, %v3216_v23  ;;  %v3294_v39 = vmul.f32 %v3278_v15, %v3244_v33  ;;  %v3215_v53 = vsel %vm3214_vm11, %v8893_v46, %v3207_v47  ;;  %v3243_v9 = vsel %vm3214_vm11, %v3207_v47, %v9689_v8  ;;  %v9695_v47 = vld [vmem:[#allocation57_spill] sm:$0xff] }
 0x923   :  { %v3285_v18 = vmul.f32 %v3274_v28, %v3215_v53  ;;  %v3286_v36 = vmul.f32 %v3278_v15, %v3243_v9  ;;  %4157 = vmatprep.subr.bf16.mxu1 %v3742_v44  ;;  %v3699_v20 = vpack.c.bf16 %v2970_v57, %v2962_v2  ;;  %v2981_v61 = vmul.f32 %v8425_v55, %v2957_v52  ;;  %v4367_v2 = vld [vmem:[#allocation9 + $0x78] ss:$0 sm:$0xff] }
 0x924   :  { %4064 = vmatpush2.bf16.msra.mxu0 %v3707_v30  ;;  %4158 = vmatpush2.bf16.msra.mxu1 %v3741_v25  ;;  %v3053_v60 = vpop.permute.xlu1 %3052  ;;  %v2989_v58 = vmul.f32 %v8418_v56, %v2957_v52  ;;  %v2988_v57 = vmul.f32 %v4622_v31, %v9026_v54 }
 0x925   :  { %v3733_v63 = vpack.c.bf16 %v3293_v45, %v3285_v18  ;;  %v3057_v46 = vsel %vm1043_vm6, %v8924_v32, %v3053_v60  ;;  %v3085_v28 = vsel %vm1043_vm6, %v3053_v60, %v9690_v35  ;;  %v3051_v15 = vpop.permute.xlu0 %3050  ;;  %4065 = vmatprep.subr.bf16.mxu0 %v3700_v43  ;;  %v3734_v11 = vpack.c.bf16 %v3294_v39, %v3286_v36  ;;  %v9696_v45 = vld [vmem:[#allocation59_spill] sm:$0xff]  ;;  %v9697_v60 = vld [vmem:[#allocation73_spill] sm:$0xff] }
 0x926   :  { %v3148_v27 = vmul.f32 %v3113_v6, %v3057_v46  ;;  %v3149_v22 = vmul.f32 %v3117_v21, %v3085_v28  ;;  %v3056_v10 = vsel %vm1043_vm6, %v8929_v1, %v3051_v15  ;;  %v3084_v29 = vsel %vm1043_vm6, %v3051_v15, %v9691_v42 }
 0x927   :  { %v3140_v14 = vmul.f32 %v3113_v6, %v3056_v10  ;;  %v3141_v50 = vmul.f32 %v3117_v21, %v3084_v29  ;;  %4159 = vmatprep.subr.bf16.mxu1 %v3734_v11  ;;  %v9046_v1 = vmul.f32 %v4620_v48, %v9026_v54  ;;  %v3710_v23 = vpack.c.bf16 %v2989_v58, %v2981_v61  ;;  %v4624_v10 = vld [vmem:[%s9231_s9 + $0x70] sm:$0xff] }
 0x928   :  { %4066 = vmatpush2.bf16.msra.mxu0 %v3699_v20  ;;  %4160 = vmatpush2.bf16.msra.mxu1 %v3733_v63  ;;  %v3049_v32 = vpop.permute.xlu1 %3048  ;;  %v9698_v20 = vld [vmem:[#allocation60_spill] sm:$0xff]  ;;  %v2972_v42 = vmul.f32 %v4624_v10, %v9026_v54 }
 0x929   :  { %v3725_v59 = vpack.c.bf16 %v3148_v27, %v3140_v14  ;;  %v3055_v13 = vsel %vm1043_vm6, %v8956_v3, %v3049_v32  ;;  %v3083_v49 = vsel %vm1043_vm6, %v3049_v32, %v9692_v26  ;;  %v3047_v51 = vpop.permute.xlu0 %3046  ;;  %v3726_v55 = vpack.c.bf16 %v3149_v22, %v3141_v50  ;;  %v4366_v3 = vld [vmem:[#allocation9 + $0x70] ss:$0 sm:$0xff]  ;;  %v4623_v27 = vld [vmem:[%s9231_s9 + $0x30] sm:$0xff]  ;;  %v9699_v14 = vld [vmem:[#allocation74_spill] sm:$0xff] }
 0x92a   :  { %v3132_v40 = vmul.f32 %v3113_v6, %v3055_v13  ;;  %v3133_v56 = vmul.f32 %v3117_v21, %v3083_v49  ;;  %v3054_v16 = vsel %vm1043_vm6, %v8967_v41, %v3047_v51  ;;  %v3082_v30 = vsel %vm1043_vm6, %v3047_v51, %v9693_v12  ;;  %v9700_v32 = vld [vmem:[#allocation63_spill] sm:$0xff] }
 0x92b   :  { %v3124_v37 = vmul.f32 %v3113_v6, %v3054_v16  ;;  %v3125_v43 = vmul.f32 %v3117_v21, %v3082_v30  ;;  %4068 = vmatmul.mubr.bf16.vlgmr.msra.gmra.mxu0 %v9060_v62  ;;  %4161 = vmatprep.subr.bf16.mxu1 %v3726_v55  ;;  %v9067_v41 = vpop.f32.mrf.mxu0  ;;  %v2965_v6 = vmul.f32 %v8479_v5, %v2957_v52  ;;  %v9694_v21 = vld [vmem:[#allocation56_spill] sm:$0xff]  ;;  %v9701_v26 = vld [vmem:[#allocation75_spill] sm:$0xff] }
 0x92c   :  { %4162 = vmatpush2.bf16.msra.mxu1 %v3725_v59  ;;  %v3534_v25 = vpop.permute.xlu1 %3533  ;;  %4077 = vmatprep.mubr.bf16.mxu0 %v8245_v38  ;;  %v2973_v34 = vmul.f32 %v9694_v21, %v2957_v52  ;;  %v3709_v15 = vpack.c.bf16 %v2988_v57, %v9046_v1  ;;  %v2964_v22 = vmul.f32 %v4623_v27, %v9026_v54  ;;  %v9702_v54 = vld [vmem:[#allocation64_spill] sm:$0xff] }
 0x92d   :  { %v3717_v33 = vpack.c.bf16 %v3132_v40, %v3124_v37  ;;  %v3538_v44 = vsel %vm1463_vm3, %v9695_v47, %v3534_v25  ;;  %v3566_v39 = vsel %vm1463_vm3, %v3534_v25, %v9696_v45  ;;  %v3532_v53 = vpop.permute.xlu0 %3531  ;;  %v3718_v8 = vpack.c.bf16 %v3133_v56, %v3125_v43  ;;  %v3867_v9 = vpop.f32.mrf.mxu0  ;;  %v9703_v56 = vld [vmem:[#allocation70_spill] sm:$0xff] }
 0x92e   :  { %v3629_v18 = vmul.f32 %v4366_v3, %v3538_v44  ;;  %v3630_v36 = vmul.f32 %v4367_v2, %v3566_v39  ;;  %v3537_v5 = vsel %vm1463_vm3, %v9697_v60, %v3532_v53  ;;  %v3565_v52 = vsel %vm1463_vm3, %v3532_v53, %v9698_v20 }
 0x92f   :  { %v3621_v63 = vmul.f32 %v4366_v3, %v3537_v5  ;;  %v3622_v46 = vmul.f32 %v4367_v2, %v3565_v52  ;;  %4163 = vmatprep.subr.bf16.mxu1 %v3718_v8  ;;  %v3869_v35 = vpop.f32.mrf.mxu0  ;;  %v3702_v11 = vpack.c.bf16 %v2973_v34, %v2965_v6  ;;  %v3701_v12 = vpack.c.bf16 %v2972_v42, %v2964_v22 }
 0x930   :  { %4164 = vmatpush2.bf16.msra.mxu1 %v3717_v33  ;;  %v3530_v28 = vpop.permute.xlu1 %3529  ;;  %v9704_v43 = vmov 0  }
 0x931   :  { %v3773_v29 = vpack.c.bf16 %v3629_v18, %v3621_v63  ;;  %v3536_v50 = vsel %vm1463_vm3, %v9699_v14, %v3530_v28  ;;  %v3564_v61 = vsel %vm1463_vm3, %v3530_v28, %v9700_v32  ;;  %v3528_v58 = vpop.permute.xlu0 %3527  ;;  %v3774_v48 = vpack.c.bf16 %v3630_v36, %v3622_v46  ;;  %4165 = vmatprep.subr.bf16.mxu1 %v3710_v23  ;;  %v3871_v1 = vpop.f32.mrf.mxu0 }
 0x932   :  { %v3613_v59 = vmul.f32 %v4366_v3, %v3536_v50  ;;  %v3614_v13 = vmul.f32 %v4367_v2, %v3564_v61  ;;  %v3535_v49 = vsel %vm1463_vm3, %v9701_v26, %v3528_v58  ;;  %v3563_v51 = vsel %vm1463_vm3, %v3528_v58, %v9702_v54 }
 0x933   :  { %v3605_v55 = vmul.f32 %v4366_v3, %v3535_v49  ;;  %v3606_v40 = vmul.f32 %v4367_v2, %v3563_v51  ;;  %4200 = vmatprep.subr.bf16.mxu0 %v3774_v48  ;;  %4078 = vmatmul.mubr.bf16.gmra.mxu0 %v9703_v56  ;;  %v3875_v16 = vpop.f32.mrf.mxu0  ;;  %v4625_v3 = vld [vmem:[#allocation7 + $0x8] ss:$12 sps:$4 sm:$0xff]  }
 0x934   :  { %4201 = vmatpush1.bf16.msra.mxu0 %v3773_v29  ;;  %4166 = vmatpush2.bf16.msra.mxu1 %v3709_v15 }
 0x935   :  { %v3765_v30 = vpack.c.bf16 %v3613_v59, %v3605_v55  ;;  %v3766_v37 = vpack.c.bf16 %v3614_v13, %v3606_v40  ;;  %4167 = vmatprep.subr.bf16.mxu1 %v3702_v11  ;;  %4220 = vmatprep.mubr.bf16.mxu0 %v9704_v43  ;;  %v3877_v31 = vpop.f32.mrf.mxu0 }
 0x937   :  { %4202 = vmatprep.subr.bf16.mxu0 %v3766_v37  ;;  %v3879_v57 = vpop.f32.mrf.mxu0 }
 0x938   :  { %4203 = vmatpush1.bf16.msra.mxu0 %v3765_v30  ;;  %4168 = vmatpush2.bf16.msra.mxu1 %v3701_v12 }
 0x939   :  { %v3880_v24 = vpop.f32.mrf.mxu0 }
 0x93b   :  { %4170 = vmatmul.mubr.bf16.vlgmr.msra.gmra.mxu1 %v9060_v62  ;;  %4380 = vmatmul.mubr.msk.bf16.vlgmr.msra.gmra.mxu0 %vm3824_vm8, %v4625_v3 }
 0x93c   :  { %4179 = vmatprep.mubr.bf16.mxu1 %v8245_v38  ;;  %4230 = vmatprep.mubr.bf16.mxu0 %v9704_v43  ;;  %v9705_v38 = vld [vmem:[#allocation24_spill] sm:$0xff] }
 0x93d   :  { %v9111_v2 = vpop.permute.xlu1 %3791 }
 0x93e   :  { %v3872_v25 = vadd.f32 %v3871_v1, %v9111_v2  ;;  %v3870_v23 = vadd.f32 %v3869_v35, %v9111_v2  ;;  %v9115_v6 = vpop.permute.xlu0 %3786 }
 0x93f   :  { %v3866_v21 = vadd.f32 %v9067_v41, %v9115_v6  ;;  %v3868_v62 = vadd.f32 %v3867_v9, %v9115_v6 }
 0x940   :  { %v3921_v34 = vadd.f32 %v8737_v4, %v3870_v23  ;;  %v3923_v33 = vadd.f32 %v8756_v19, %v3872_v25  ;;  %v4626_v19 = vld [vmem:[#allocation7 + $0x20] ss:$0 sps:$4 sm:$0xff]  }
 0x941   :  { %v3917_v47 = vadd.f32 %v9705_v38, %v3866_v21  ;;  %v3919_v44 = vadd.f32 %v8715_v0, %v3868_v62  ;;  %v9124_v45 = vpop.permute.xlu1 %3796 }
 0x942   :  { %4247 = vst [vmem:[%s9232_s10 + $0x40] sm:$0xff] %v3921_v34  ;;  %4248 = vst [vmem:[%s9232_s10 + $0x48] sm:$0xff] %v3923_v33  ;;  %v3876_v41 = vadd.f32 %v3875_v16, %v9124_v45  ;;  %v3878_v4 = vadd.f32 %v3877_v31, %v9124_v45 }
 0x943   :  { %4180 = vmatmul.mubr.bf16.gmra.mxu1 %v9703_v56  ;;  %4381 = vmatmul.mubr.msk.bf16.gmra.mxu0 %vm3824_vm8, %v4626_v19  ;;  %4239 = vst [vmem:[%s9232_s10] sm:$0xff] %v3917_v47  ;;  %4240 = vst [vmem:[%s9232_s10 + $0x8] sm:$0xff] %v3919_v44 }
 0x944   :  { %v3927_v0 = vadd.f32 %v8762_v17, %v3876_v41  ;;  %v3929_v39 = vadd.f32 %v8774_v7, %v3878_v4 }
 0x946   :  { %4255 = vst [vmem:[%s9232_s10 + $0x80] sm:$0xff] %v3927_v0  ;;  %4256 = vst [vmem:[%s9232_s10 + $0x88] sm:$0xff] %v3929_v39 }
 0x94b   :  { %v3967_v53 = vpop.f32.mrf.mxu1 }
 0x94c   :  { %v3968_v18 = vadd.f32 %v3967_v53, %v9115_v6 }
 0x94d   :  { %v3969_v8 = vpop.f32.mrf.mxu1 }
 0x94e   :  { %v3970_v60 = vadd.f32 %v3969_v8, %v9115_v6 }
 0x94f   :  { %v3971_v9 = vpop.f32.mrf.mxu1 }
 0x950   :  { %v3972_v7 = vadd.f32 %v3971_v9, %v9111_v2 }
 0x951   :  { %v3973_v36 = vpop.f32.mrf.mxu1 }
 0x952   :  { %v3974_v46 = vadd.f32 %v3973_v36, %v9111_v2 }
 0x953   :  { %v4018_v5 = vpop.f32.mrf.mxu0 }
 0x954   :  { %v4019_v17 = vadd.f32 %v4018_v5, %v3968_v18  ;;  %v3977_v20 = vpop.f32.mrf.mxu1 }
 0x955   :  { %v4020_v52 = vpop.f32.mrf.mxu0  ;;  %v3978_v11 = vadd.f32 %v3977_v20, %v9124_v45 }
 0x956   :  { %4241 = vst [vmem:[%s9232_s10 + $0x10] sm:$0xff] %v4019_v17  ;;  %v4021_v63 = vadd.f32 %v4020_v52, %v3970_v60  ;;  %v3979_v35 = vpop.f32.mrf.mxu1 }
 0x957   :  { %v4022_v28 = vpop.f32.mrf.mxu0  ;;  %v3980_v42 = vadd.f32 %v3979_v35, %v9124_v45 }
 0x958   :  { %4242 = vst [vmem:[%s9232_s10 + $0x18] sm:$0xff] %v4021_v63  ;;  %v4023_v15 = vadd.f32 %v4022_v28, %v3972_v7  ;;  %v3981_v27 = vpop.f32.mrf.mxu1 }
 0x959   :  { %v4024_v22 = vpop.f32.mrf.mxu0 }
 0x95a   :  { %4249 = vst [vmem:[%s9232_s10 + $0x50] sm:$0xff] %v4023_v15  ;;  %v4025_v10 = vadd.f32 %v4024_v22, %v3974_v46  ;;  %v3982_v29 = vpop.f32.mrf.mxu1 }
 0x95b   :  { %v4028_v14 = vpop.f32.mrf.mxu0 }
 0x95c   :  { %4250 = vst [vmem:[%s9232_s10 + $0x58] sm:$0xff] %v4025_v10  ;;  %v4029_v50 = vadd.f32 %v4028_v14, %v3978_v11 }
 0x95d   :  { %v4030_v32 = vpop.f32.mrf.mxu0 }
 0x95e   :  { %4257 = vst [vmem:[%s9232_s10 + $0x90] sm:$0xff] %v4029_v50  ;;  %v4031_v61 = vadd.f32 %v4030_v32, %v3980_v42 }
 0x95f   :  { %v4032_v58 = vpop.f32.mrf.mxu0 }
 0x960   :  { %4258 = vst [vmem:[%s9232_s10 + $0x98] sm:$0xff] %v4031_v61 }
 0x961   :  { %v4033_v48 = vpop.f32.mrf.mxu0 }
 0x97b   :  { %v4120_v1 = vpop.f32.mrf.mxu1 }
 0x97d   :  { %v4122_v59 = vpop.f32.mrf.mxu1 }
 0x97f   :  { %v4124_v13 = vpop.f32.mrf.mxu1 }
 0x981   :  { %v4126_v26 = vpop.f32.mrf.mxu1 }
 0x985   :  { %v4130_v49 = vpop.f32.mrf.mxu1 }
 0x987   :  { %v4132_v54 = vpop.f32.mrf.mxu1 }
 0x989   :  { %v4134_v51 = vpop.f32.mrf.mxu1 }
 0x98b   :  { %v4135_v55 = vpop.f32.mrf.mxu1 }
 0x9eb   :  { %v4069_v40 = vpop.f32.mrf.mxu0 }
 0x9ec   :  { %v4070_v56 = vadd.f32 %v4069_v40, %v9115_v6 }
 0x9ed   :  { %v4071_v16 = vpop.f32.mrf.mxu0 }
 0x9ee   :  { %v4121_v12 = vadd.f32 %v4120_v1, %v4070_v56  ;;  %v4072_v30 = vadd.f32 %v4071_v16, %v9115_v6 }
 0x9ef   :  { %v4073_v37 = vpop.f32.mrf.mxu0 }
 0x9f0   :  { %4243 = vst [vmem:[%s9232_s10 + $0x20] sm:$0xff] %v4121_v12  ;;  %v4123_v43 = vadd.f32 %v4122_v59, %v4072_v30  ;;  %v4074_v31 = vadd.f32 %v4073_v37, %v9111_v2 }
 0x9f1   :  { %v4075_v57 = vpop.f32.mrf.mxu0 }
 0x9f2   :  { %4244 = vst [vmem:[%s9232_s10 + $0x28] sm:$0xff] %v4123_v43  ;;  %v4125_v24 = vadd.f32 %v4124_v13, %v4074_v31  ;;  %v4076_v3 = vadd.f32 %v4075_v57, %v9111_v2 }
 0x9f3   :  { %v4079_v25 = vpop.f32.mrf.mxu0 }
 0x9f4   :  { %4251 = vst [vmem:[%s9232_s10 + $0x60] sm:$0xff] %v4125_v24  ;;  %v4127_v23 = vadd.f32 %v4126_v26, %v4076_v3  ;;  %v4080_v21 = vadd.f32 %v4079_v25, %v9124_v45 }
 0x9f5   :  { %v4081_v62 = vpop.f32.mrf.mxu0 }
 0x9f6   :  { %4252 = vst [vmem:[%s9232_s10 + $0x68] sm:$0xff] %v4127_v23  ;;  %v4131_v34 = vadd.f32 %v4130_v49, %v4080_v21  ;;  %v4082_v33 = vadd.f32 %v4081_v62, %v9124_v45 }
 0x9f7   :  { %v4083_v38 = vpop.f32.mrf.mxu0 }
 0x9f8   :  { %4259 = vst [vmem:[%s9232_s10 + $0xa0] sm:$0xff] %v4131_v34  ;;  %v4133_v47 = vadd.f32 %v4132_v54, %v4082_v33 }
 0x9f9   :  { %v4084_v44 = vpop.f32.mrf.mxu0 }
 0x9fa   :  { %4260 = vst [vmem:[%s9232_s10 + $0xa8] sm:$0xff] %v4133_v47 }
 0x9fb   :  { %v4171_v41 = vpop.f32.mrf.mxu1  ;;  %v4222_v4 = vpop.f32.mrf.mxu0 }
 0x9fc   :  { %v4172_v19 = vadd.f32 %v4171_v41, %v9115_v6 }
 0x9fd   :  { %v4173_v0 = vpop.f32.mrf.mxu1  ;;  %v4224_v39 = vpop.f32.mrf.mxu0 }
 0x9fe   :  { %v4174_v53 = vadd.f32 %v4173_v0, %v9115_v6  ;;  %v4223_v8 = vadd.f32 %v4222_v4, %v4172_v19 }
 0x9ff   :  { %v4175_v9 = vpop.f32.mrf.mxu1  ;;  %v4226_v18 = vpop.f32.mrf.mxu0 }
 0xa00   :  { %4245 = vst [vmem:[%s9232_s10 + $0x30] sm:$0xff] %v4223_v8  ;;  %v4176_v36 = vadd.f32 %v4175_v9, %v9111_v2  ;;  %v4225_v60 = vadd.f32 %v4224_v39, %v4174_v53 }
 0xa01   :  { %v4177_v5 = vpop.f32.mrf.mxu1  ;;  %v4228_v17 = vpop.f32.mrf.mxu0 }
 0xa02   :  { %4246 = vst [vmem:[%s9232_s10 + $0x38] sm:$0xff] %v4225_v60  ;;  %v4178_v7 = vadd.f32 %v4177_v5, %v9111_v2  ;;  %v4227_v20 = vadd.f32 %v4226_v18, %v4176_v36 }
 0xa03   :  { %v4181_v6 = vpop.f32.mrf.mxu1  ;;  %v4232_v52 = vpop.f32.mrf.mxu0 }
 0xa04   :  { %4253 = vst [vmem:[%s9232_s10 + $0x70] sm:$0xff] %v4227_v20  ;;  %v4229_v63 = vadd.f32 %v4228_v17, %v4178_v7  ;;  %v4182_v46 = vadd.f32 %v4181_v6, %v9124_v45 }
 0xa05   :  { %v4183_v35 = vpop.f32.mrf.mxu1  ;;  %v4234_v28 = vpop.f32.mrf.mxu0 }
 0xa06   :  { %4254 = vst [vmem:[%s9232_s10 + $0x78] sm:$0xff] %v4229_v63  ;;  %v4233_v15 = vadd.f32 %v4232_v52, %v4182_v46  ;;  %v4184_v11 = vadd.f32 %v4183_v35, %v9124_v45 }
 0xa07   :  { %v4185_v2 = vpop.f32.mrf.mxu1  ;;  %v4236_v27 = vpop.f32.mrf.mxu0 }
 0xa08   :  { %4261 = vst [vmem:[%s9232_s10 + $0xb0] sm:$0xff] %v4233_v15  ;;  %v4235_v22 = vadd.f32 %v4234_v28, %v4184_v11 }
 0xa09   :  { %v4186_v10 = vpop.f32.mrf.mxu1  ;;  %v4237_v42 = vpop.f32.mrf.mxu0 }
 0xa0a   :  { %4262 = vst [vmem:[%s9232_s10 + $0xb8] sm:$0xff] %v4235_v22 }
 0xa0b   :  { %4275 = vsyncpa [#allocation3], 1 }
 0xa0c   :  { %4276 = vsyncpa [#allocation5], 1 }
 0xa0d   :  { %4277 = vsyncpa [#allocation8], 1 }

</bundles_post_ra>
